<compile_context>
chip_gen: v7x
topology: tpu7x:2x2x1
jax: 0.10.0
libtpu: 0.0.40
codegen_flags: <defaults>
</compile_context>

<pallas_src>
import functools
import math

import jax
import jax.numpy as jnp
import numpy as np
from jax.experimental import pallas as pl
from jax.experimental.pallas import tpu as pltpu

# ---- hyper-parameters (small shapes consistent with the module) ----
BATCH = 2
SEQ_TRG = 8        # decoder (target) length
SEQ_SRC = 16       # encoder (source) length
EMB = 32           # embedding_size
HID = 32           # hidden_size
NUM_LAYERS = 2
NUM_HEADS = 2
KEY_DEPTH = 32     # total_key_depth
VAL_DEPTH = 32     # total_value_depth
FILTER = 64        # filter_size
EPS = 1e-6
NEG_INF = -1e18


# --------------------------------------------------------------------------
# parameter / signal construction (plain JAX glue)
# --------------------------------------------------------------------------
def gen_timing_signal(length, channels, min_timescale=1.0, max_timescale=1.0e4):
    position = np.arange(length)
    num_timescales = channels // 2
    log_timescale_increment = math.log(float(max_timescale) / float(min_timescale)) / (
        float(num_timescales) - 1
    )
    inv_timescales = min_timescale * np.exp(
        np.arange(num_timescales).astype(np.float64) * -log_timescale_increment
    )
    scaled_time = position[:, None] * inv_timescales[None, :]
    signal = np.concatenate([np.sin(scaled_time), np.cos(scaled_time)], axis=1)
    signal = np.pad(signal, [[0, 0], [0, channels % 2]], mode="constant")
    return jnp.asarray(signal, dtype=jnp.float32)  # (length, channels)


def init_params(key):
    # Linear weights stored transposed to (in, out): y = x @ W  ==  torch x @ W.T.
    # Conv1d weights (out, in, 3) stored as (3, in, out) so tap k multiplies x[t-2+k].
    def nrm(k, shape, scale=0.05):
        return scale * jax.random.normal(k, shape, dtype=jnp.float32)

    keys = jax.random.split(key, 3 + NUM_LAYERS)
    params = {"emb_w": nrm(keys[0], (EMB, HID))}                 # embedding_proj (no bias)
    params["lng"] = 1.0 + nrm(keys[1], (HID,), 0.02)             # final LayerNorm
    params["lnb"] = nrm(keys[2], (HID,), 0.02)
    layers = []
    for i in range(NUM_LAYERS):
        lk = jax.random.split(keys[3 + i], 14)
        layers.append(dict(
            ln_g=1.0 + nrm(lk[12], (3, HID), 0.02),              # [mha_dec, mha_enc, ffn]
            ln_b=nrm(lk[13], (3, HID), 0.02),
            wq_s=nrm(lk[0], (HID, KEY_DEPTH)),
            wk_s=nrm(lk[1], (HID, KEY_DEPTH)),
            wv_s=nrm(lk[2], (HID, VAL_DEPTH)),
            wo_s=nrm(lk[3], (VAL_DEPTH, HID)),
            wq_c=nrm(lk[4], (HID, KEY_DEPTH)),
            wk_c=nrm(lk[5], (HID, KEY_DEPTH)),
            wv_c=nrm(lk[6], (HID, VAL_DEPTH)),
            wo_c=nrm(lk[7], (VAL_DEPTH, HID)),
            c1w=nrm(lk[8], (3, HID, FILTER)),
            c1b=nrm(lk[9], (FILTER,)),
            c2w=nrm(lk[10], (3, FILTER, HID)),
            c2b=nrm(lk[11], (HID,)),
        ))
    params["layers"] = layers
    return params


# --------------------------------------------------------------------------
# fused Pallas kernel: proj + timing + N decoder layers + final LayerNorm
# --------------------------------------------------------------------------
def decoder_kernel(num_layers, num_heads, key_depth, value_depth,
                   x_ref, enc_ref, smask_ref, cmask_ref, shift_ref, timing_ref,
                   embw_ref, lng_ref, lnb_ref,
                   wqkv_s_ref, wo_s_ref, wq_c_ref, wkv_c_ref, wo_c_ref,
                   c1w_ref, c1b_ref, c2w_ref, c2b_ref,
                   y_ref, attn_ref):
    B, L, Ls = attn_ref.shape
    dk = key_depth // num_heads
    dv = value_depth // num_heads
    scale = dk ** -0.5

    # ---- loop-invariant values, hoisted once (review: hoist invariants) ----
    smask = smask_ref[...] > 0.5          # (B*L, B*L)   True = masked
    cmask = cmask_ref[...] > 0.5          # (B*L, B*Ls)  True = masked
    m1 = shift_ref[:, 0:1]                # zero rows with t < 1 within each batch block
    m2 = shift_ref[:, 1:2]                # zero rows with t < 2 within each batch block
    enc = enc_ref[...]                    # (B*Ls, H) encoder output, batch-flattened

    def layer_norm(z, idx):
        # custom LayerNorm: unbiased std, eps added to std
        g = lng_ref[idx:idx + 1, :]
        b = lnb_ref[idx:idx + 1, :]
        mean = jnp.mean(z, axis=-1, keepdims=True)
        var = jnp.sum((z - mean) ** 2, axis=-1, keepdims=True) / (z.shape[-1] - 1)
        return g * (z - mean) / (jnp.sqrt(var) + EPS) + b

    def mha(q, k, v, maskb, want_logit_sum):
        # q: (B*L, KD); k/v: (N, KD/VD) flat. Block-diagonal batch mask is inside maskb.
        ctxs = []
        lsum = None
        for h in range(num_heads):                       # static unroll over heads
            qh = q[:, h * dk:(h + 1) * dk]
            kh = k[:, h * dk:(h + 1) * dk]
            vh = v[:, h * dv:(h + 1) * dv]
            logits = jnp.dot(qh, kh.T, preferred_element_type=jnp.float32)
            logits = jnp.where(maskb, NEG_INF, logits)
            if want_logit_sum:
                lsum = logits if lsum is None else lsum + logits
            lmax = jnp.max(logits, axis=-1, keepdims=True)
            e = jnp.exp(logits - lmax)
            inv = pl.reciprocal(jnp.sum(e, axis=-1, keepdims=True), approx=False)
            ctxs.append(jnp.dot(e * inv, vh, preferred_element_type=jnp.float32))
        # merged heads -> a SINGLE output-projection matmul outside (review item)
        return jnp.concatenate(ctxs, axis=1), lsum

    def shift_down(z, n, m):
        # z[t] <- z[t-n] within each batch block (causal left padding); the first
        # n rows of every block are zeroed by m. Static sublane slices instead of
        # (L,L) shift-matrix matmuls / in-kernel iota (review item).
        zer = jnp.zeros((n, z.shape[1]), jnp.float32)
        return jnp.concatenate([zer, z[:z.shape[0] - n, :]], axis=0) * m

    def conv3(inp, w, bias):
        # 3-tap causal Conv1d fused into one (B*L, 3*Cin) @ (3*Cin, Cout) matmul.
        cat = jnp.concatenate([shift_down(inp, 2, m2),   # tap 0: x[t-2]
                               shift_down(inp, 1, m1),   # tap 1: x[t-1]
                               inp], axis=1)             # tap 2: x[t]
        return jnp.dot(cat, w, preferred_element_type=jnp.float32) + bias

    # ---- embedding projection (no bias) + timing signal ----
    x = jnp.dot(x_ref[...], embw_ref[...],
                preferred_element_type=jnp.float32) + timing_ref[...]

    for li in range(num_layers):                         # static unroll, weights resident
        # -- masked multi-head self-attention (pre-LN, residual) --
        xn = layer_norm(x, 3 * li + 0)
        qkv = jnp.dot(xn, wqkv_s_ref[li], preferred_element_type=jnp.float32)
        q = qkv[:, 0:key_depth] * scale
        k = qkv[:, key_depth:2 * key_depth]
        v = qkv[:, 2 * key_depth:2 * key_depth + value_depth]
        ctx, _ = mha(q, k, v, smask, False)
        x = x + jnp.dot(ctx, wo_s_ref[li], preferred_element_type=jnp.float32)

        # -- encoder-decoder attention (pre-LN, residual) --
        xn = layer_norm(x, 3 * li + 1)
        q = jnp.dot(xn, wq_c_ref[li], preferred_element_type=jnp.float32) * scale
        kv = jnp.dot(enc, wkv_c_ref[li], preferred_element_type=jnp.float32)
        k = kv[:, 0:key_depth]
        v = kv[:, key_depth:key_depth + value_depth]
        last = li == num_layers - 1
        ctx, lsum = mha(q, k, v, cmask, last)
        if last:
            inv_h = 1.0 / num_heads
            for b in range(B):   # extract per-batch block-diagonal (L, Ls) tiles
                attn_ref[b] = lsum[b * L:(b + 1) * L, b * Ls:(b + 1) * Ls] * inv_h
        x = x + jnp.dot(ctx, wo_c_ref[li], preferred_element_type=jnp.float32)

        # -- position-wise FFN: two causal Conv1d(k=3, left pad), ReLU after each --
        xn = layer_norm(x, 3 * li + 2)
        h1 = jnp.maximum(conv3(xn, c1w_ref[li], c1b_ref[li:li + 1, :]), 0.0)
        h2 = jnp.maximum(conv3(h1, c2w_ref[li], c2b_ref[li:li + 1, :]), 0.0)
        x = x + h2

    y_ref[...] = layer_norm(x, 3 * num_layers)           # final LayerNorm


# --------------------------------------------------------------------------
# wrapper: flatten batch, build flat masks, pack weights, ONE pallas_call
# --------------------------------------------------------------------------
@jax.jit
def decoder_forward(inputs, encoder_output, mask_src, mask_trg, params, timing):
    B, L, E = inputs.shape
    Ls = encoder_output.shape[1]
    H = params["emb_w"].shape[1]
    BL, BLs = B * L, B * Ls

    # ---- flat (batch-folded) masks, 1.0 = masked ----
    row_b = jnp.repeat(jnp.arange(B), L)
    row_t = jnp.tile(jnp.arange(L), (B,))
    key_b = jnp.repeat(jnp.arange(B), Ls)
    trg_pad = mask_trg[:, 0, :].reshape(BL) > 0
    src_pad = mask_src[:, 0, :].reshape(BLs) > 0
    self_mask = ((row_b[:, None] != row_b[None, :])            # no cross-batch attention
                 | (row_t[None, :] > row_t[:, None])            # subsequent (causal) mask
                 | trg_pad[None, :]).astype(jnp.float32)        # target key padding
    cross_mask = ((row_b[:, None] != key_b[None, :])
                  | src_pad[None, :]).astype(jnp.float32)       # source key padding
    shift_mask = jnp.stack([(row_t >= 1), (row_t >= 2)], axis=1).astype(jnp.float32)
    timing_flat = jnp.tile(timing[:L], (B, 1))                  # (B*L, H)

    # ---- pack / stack weights (fewer, larger operands; one DMA each) ----
    layers = params["layers"]
    lng = jnp.concatenate([l["ln_g"] for l in layers] + [params["lng"][None, :]], 0)
    lnb = jnp.concatenate([l["ln_b"] for l in layers] + [params["lnb"][None, :]], 0)
    wqkv_s = jnp.stack([jnp.concatenate([l["wq_s"], l["wk_s"], l["wv_s"]], 1) for l in layers])
    wo_s = jnp.stack([l["wo_s"] for l in layers])
    wq_c = jnp.stack([l["wq_c"] for l in layers])
    wkv_c = jnp.stack([jnp.concatenate([l["wk_c"], l["wv_c"]], 1) for l in layers])
    wo_c = jnp.stack([l["wo_c"] for l in layers])
    c1w = jnp.stack([l["c1w"].reshape(3 * H, FILTER) for l in layers])
    c1b = jnp.stack([l["c1b"] for l in layers])
    c2w = jnp.stack([l["c2w"].reshape(3 * FILTER, H) for l in layers])
    c2b = jnp.stack([l["c2b"] for l in layers])

    kern = functools.partial(decoder_kernel, NUM_LAYERS, NUM_HEADS, KEY_DEPTH, VAL_DEPTH)
    y_flat, attn = pl.pallas_call(
        kern,
        out_shape=(jax.ShapeDtypeStruct((BL, H), jnp.float32),      # y, flat slab
                   jax.ShapeDtypeStruct((B, L, Ls), jnp.float32)),  # attn_dist
    )(inputs.reshape(BL, E), encoder_output.reshape(BLs, H),
      self_mask, cross_mask, shift_mask, timing_flat,
      params["emb_w"], lng, lnb,
      wqkv_s, wo_s, wq_c, wkv_c, wo_c, c1w, c1b, c2w, c2b)
    return y_flat.reshape(B, L, H), attn


# --------------------------------------------------------------------------
# pure-JAX reference (mirrors the PyTorch Decoder forward exactly)
# --------------------------------------------------------------------------
def ref_layer_norm(x, g, b):
    mean = x.mean(-1, keepdims=True)
    std = jnp.sqrt(jnp.sum((x - mean) ** 2, -1, keepdims=True) / (x.shape[-1] - 1))
    return g * (x - mean) / (std + EPS) + b


def ref_mha(q_in, k_in, v_in, wq, wk, wv, wo, mask4):
    B, Lq, _ = q_in.shape
    dk = KEY_DEPTH // NUM_HEADS
    dv = VAL_DEPTH // NUM_HEADS

    def split(t, d):
        return t.reshape(B, -1, NUM_HEADS, d).transpose(0, 2, 1, 3)

    q = split(q_in @ wq, dk) * (dk ** -0.5)
    k = split(k_in @ wk, dk)
    v = split(v_in @ wv, dv)
    logits = jnp.einsum("bhqd,bhkd->bhqk", q, k)
    logits = jnp.where(mask4, NEG_INF, logits)
    attn_w = logits.sum(axis=1) / NUM_HEADS
    w = jax.nn.softmax(logits, axis=-1)
    ctx = jnp.einsum("bhqk,bhkd->bhqd", w, v).transpose(0, 2, 1, 3).reshape(B, Lq, VAL_DEPTH)
    return ctx @ wo, attn_w


def ref_conv_left(x, w3, b):
    L = x.shape[1]
    pad = jnp.pad(x, ((0, 0), (2, 0), (0, 0)))
    return pad[:, 0:L] @ w3[0] + pad[:, 1:L + 1] @ w3[1] + pad[:, 2:L + 2] @ w3[2] + b


def ref_forward(inputs, encoder_output, mask_src, mask_trg, params, timing):
    B, L, _ = inputs.shape
    sub = jnp.triu(jnp.ones((L, L), jnp.float32), k=1)
    dec_mask = ((mask_trg + sub[None]) > 0)[:, None]     # (B,1,L,L)
    src_mask = (mask_src > 0)[:, None]                   # (B,1,1,Ls)
    x = inputs @ params["emb_w"] + timing[None, :L]
    attn_dist = None
    for lp in params["layers"]:
        xn = ref_layer_norm(x, lp["ln_g"][0], lp["ln_b"][0])
        y, _ = ref_mha(xn, xn, xn, lp["wq_s"], lp["wk_s"], lp["wv_s"], lp["wo_s"], dec_mask)
        x = x + y
        xn = ref_layer_norm(x, lp["ln_g"][1], lp["ln_b"][1])
        y, attn_dist = ref_mha(xn, encoder_output, encoder_output,
                               lp["wq_c"], lp["wk_c"], lp["wv_c"], lp["wo_c"], src_mask)
        x = x + y
        xn = ref_layer_norm(x, lp["ln_g"][2], lp["ln_b"][2])
        h = jax.nn.relu(ref_conv_left(xn, lp["c1w"], lp["c1b"]))
        h = jax.nn.relu(ref_conv_left(h, lp["c2w"], lp["c2b"]))
        x = x + h
    y = ref_layer_norm(x, params["lng"], params["lnb"])
    return y, attn_dist


# --------------------------------------------------------------------------
if __name__ == "__main__":
    key = jax.random.PRNGKey(0)
    k_in, k_enc, k_par = jax.random.split(key, 3)

    inputs = jax.random.normal(k_in, (BATCH, SEQ_TRG, EMB), dtype=jnp.float32)
    enc_out = jax.random.normal(k_enc, (BATCH, SEQ_SRC, HID), dtype=jnp.float32)

    trg_lens = jnp.array([SEQ_TRG, SEQ_TRG - 3], dtype=jnp.int32)
    src_lens = jnp.array([SEQ_SRC, SEQ_SRC - 5], dtype=jnp.int32)
    mask_trg = (jnp.arange(SEQ_TRG)[None, :] >= trg_lens[:, None]
                ).astype(jnp.float32)[:, None, :]        # (B, 1, L_trg), 1 = padded
    mask_src = (jnp.arange(SEQ_SRC)[None, :] >= src_lens[:, None]
                ).astype(jnp.float32)[:, None, :]        # (B, 1, L_src), 1 = padded

    params = init_params(k_par)
    timing = gen_timing_signal(1000, HID)                # (max_length, H)

    y, attn = decoder_forward(inputs, enc_out, mask_src, mask_trg, params, timing)
    y = jax.block_until_ready(y)
    attn = jax.block_until_ready(attn)

    y_ref, attn_ref = ref_forward(inputs, enc_out, mask_src, mask_trg, params, timing)
    assert y.shape == (BATCH, SEQ_TRG, HID)
    assert attn.shape == (BATCH, SEQ_TRG, SEQ_SRC)
    np.testing.assert_allclose(np.asarray(y), np.asarray(y_ref), rtol=2e-3, atol=2e-3)
    np.testing.assert_allclose(np.asarray(attn), np.asarray(attn_ref), rtol=2e-3, atol=2e-3)
    print("KERNEL_OK")
</pallas_src>

<mosaic_0001>
module attributes {stable_mosaic.version = 11 : i64} {
  func.func @decoder_kernel(%arg0: memref<16x32xf32, #tpu.memory_space<vmem>>, %arg1: memref<32x32xf32, #tpu.memory_space<vmem>>, %arg2: memref<16x16xf32, #tpu.memory_space<vmem>>, %arg3: memref<16x32xf32, #tpu.memory_space<vmem>>, %arg4: memref<16x2xf32, #tpu.memory_space<vmem>>, %arg5: memref<16x32xf32, #tpu.memory_space<vmem>>, %arg6: memref<32x32xf32, #tpu.memory_space<vmem>>, %arg7: memref<7x32xf32, #tpu.memory_space<vmem>>, %arg8: memref<7x32xf32, #tpu.memory_space<vmem>>, %arg9: memref<2x32x96xf32, #tpu.memory_space<vmem>>, %arg10: memref<2x32x32xf32, #tpu.memory_space<vmem>>, %arg11: memref<2x32x32xf32, #tpu.memory_space<vmem>>, %arg12: memref<2x32x64xf32, #tpu.memory_space<vmem>>, %arg13: memref<2x32x32xf32, #tpu.memory_space<vmem>>, %arg14: memref<2x96x64xf32, #tpu.memory_space<vmem>>, %arg15: memref<2x64xf32, #tpu.memory_space<vmem>>, %arg16: memref<2x192x32xf32, #tpu.memory_space<vmem>>, %arg17: memref<2x32xf32, #tpu.memory_space<vmem>>, %arg18: memref<16x32xf32, #tpu.memory_space<vmem>>, %arg19: memref<2x8x16xf32, #tpu.memory_space<vmem>>) attributes {dimension_semantics = [], scalar_prefetch = 0 : i64, scratch_operands = 0 : i64, tpu.core_type = #tpu.core_type<tc>} {
    %c0 = arith.constant 0 : index
    %c0_0 = arith.constant 0 : index
    %0 = vector.load %arg2[%c0, %c0_0] : memref<16x16xf32, #tpu.memory_space<vmem>>, vector<16x16xf32>
    %cst = arith.constant 5.000000e-01 : f32
    %1 = vector.broadcast %cst : f32 to vector<16x16xf32>
    %2 = arith.cmpf ogt, %0, %1 : vector<16x16xf32>
    %c0_1 = arith.constant 0 : index
    %c0_2 = arith.constant 0 : index
    %3 = vector.load %arg3[%c0_1, %c0_2] : memref<16x32xf32, #tpu.memory_space<vmem>>, vector<16x32xf32>
    %cst_3 = arith.constant 5.000000e-01 : f32
    %4 = vector.broadcast %cst_3 : f32 to vector<16x32xf32>
    %5 = arith.cmpf ogt, %3, %4 : vector<16x32xf32>
    %c0_4 = arith.constant 0 : index
    %c0_5 = arith.constant 0 : index
    %6 = vector.load %arg4[%c0_4, %c0_5] : memref<16x2xf32, #tpu.memory_space<vmem>>, vector<16x1xf32>
    %c0_6 = arith.constant 0 : index
    %c1 = arith.constant 1 : index
    %7 = vector.load %arg4[%c0_6, %c1] : memref<16x2xf32, #tpu.memory_space<vmem>>, vector<16x1xf32>
    %c0_7 = arith.constant 0 : index
    %c0_8 = arith.constant 0 : index
    %8 = vector.load %arg1[%c0_7, %c0_8] : memref<32x32xf32, #tpu.memory_space<vmem>>, vector<32x32xf32>
    %c0_9 = arith.constant 0 : index
    %c0_10 = arith.constant 0 : index
    %9 = vector.load %arg0[%c0_9, %c0_10] : memref<16x32xf32, #tpu.memory_space<vmem>>, vector<16x32xf32>
    %c0_11 = arith.constant 0 : index
    %c0_12 = arith.constant 0 : index
    %10 = vector.load %arg6[%c0_11, %c0_12] : memref<32x32xf32, #tpu.memory_space<vmem>>, vector<32x32xf32>
    %cst_13 = arith.constant dense<0.000000e+00> : vector<16x32xf32>
    %11 = tpu.matmul %9, %10, %cst_13 {dimension_numbers = #tpu.dot_dimension_numbers<[1], [0], [0], [1], [0, 0, 1, 1], [], []>} : vector<16x32xf32>, vector<32x32xf32>, vector<16x32xf32> -> vector<16x32xf32>
    %c0_14 = arith.constant 0 : index
    %c0_15 = arith.constant 0 : index
    %12 = vector.load %arg5[%c0_14, %c0_15] : memref<16x32xf32, #tpu.memory_space<vmem>>, vector<16x32xf32>
    %13 = arith.addf %11, %12 : vector<16x32xf32>
    %c0_16 = arith.constant 0 : index
    %c0_17 = arith.constant 0 : index
    %14 = vector.load %arg7[%c0_16, %c0_17] : memref<7x32xf32, #tpu.memory_space<vmem>>, vector<1x32xf32>
    %c0_18 = arith.constant 0 : index
    %c0_19 = arith.constant 0 : index
    %15 = vector.load %arg8[%c0_18, %c0_19] : memref<7x32xf32, #tpu.memory_space<vmem>>, vector<1x32xf32>
    %cst_20 = arith.constant dense<0.000000e+00> : vector<16xf32>
    %16 = vector.multi_reduction <add>, %13, %cst_20 [1] : vector<16x32xf32> to vector<16xf32>
    %17 = vector.shape_cast %16 : vector<16xf32> to vector<16x1xf32>
    %cst_21 = arith.constant 3.200000e+01 : f32
    %18 = vector.broadcast %cst_21 : f32 to vector<16x1xf32>
    %19 = arith.divf %17, %18 : vector<16x1xf32>
    %20 = vector.broadcast %19 : vector<16x1xf32> to vector<16x32xf32>
    %21 = arith.subf %13, %20 : vector<16x32xf32>
    %22 = arith.mulf %21, %21 : vector<16x32xf32>
    %cst_22 = arith.constant dense<0.000000e+00> : vector<16xf32>
    %23 = vector.multi_reduction <add>, %22, %cst_22 [1] : vector<16x32xf32> to vector<16xf32>
    %24 = vector.shape_cast %23 : vector<16xf32> to vector<16x1xf32>
    %cst_23 = arith.constant 3.100000e+01 : f32
    %25 = vector.broadcast %cst_23 : f32 to vector<16x1xf32>
    %26 = arith.divf %24, %25 : vector<16x1xf32>
    %27 = vector.broadcast %19 : vector<16x1xf32> to vector<16x32xf32>
    %28 = arith.subf %13, %27 : vector<16x32xf32>
    %29 = vector.broadcast %14 : vector<1x32xf32> to vector<16x32xf32>
    %30 = arith.mulf %29, %28 : vector<16x32xf32>
    %31 = math.sqrt %26 : vector<16x1xf32>
    %cst_24 = arith.constant 9.99999997E-7 : f32
    %32 = vector.broadcast %cst_24 : f32 to vector<16x1xf32>
    %33 = arith.addf %31, %32 : vector<16x1xf32>
    %34 = vector.broadcast %33 : vector<16x1xf32> to vector<16x32xf32>
    %35 = arith.divf %30, %34 : vector<16x32xf32>
    %36 = vector.broadcast %15 : vector<1x32xf32> to vector<16x32xf32>
    %37 = arith.addf %35, %36 : vector<16x32xf32>
    %c0_25 = arith.constant 0 : index
    %c0_26 = arith.constant 0 : index
    %c0_27 = arith.constant 0 : index
    %38 = vector.load %arg9[%c0_25, %c0_26, %c0_27] : memref<2x32x96xf32, #tpu.memory_space<vmem>>, vector<1x32x96xf32>
    %39 = vector.shape_cast %38 : vector<1x32x96xf32> to vector<32x96xf32>
    %cst_28 = arith.constant dense<0.000000e+00> : vector<16x96xf32>
    %40 = tpu.matmul %37, %39, %cst_28 {dimension_numbers = #tpu.dot_dimension_numbers<[1], [0], [0], [1], [0, 0, 1, 1], [], []>} : vector<16x32xf32>, vector<32x96xf32>, vector<16x96xf32> -> vector<16x96xf32>
    %41 = vector.extract_strided_slice %40 {offsets = [0, 0], sizes = [16, 32], strides = [1, 1]} : vector<16x96xf32> to vector<16x32xf32>
    %cst_29 = arith.constant 2.500000e-01 : f32
    %42 = vector.broadcast %cst_29 : f32 to vector<16x32xf32>
    %43 = arith.mulf %41, %42 : vector<16x32xf32>
    %44 = vector.extract_strided_slice %40 {offsets = [0, 32], sizes = [16, 32], strides = [1, 1]} : vector<16x96xf32> to vector<16x32xf32>
    %45 = vector.extract_strided_slice %40 {offsets = [0, 64], sizes = [16, 32], strides = [1, 1]} : vector<16x96xf32> to vector<16x32xf32>
    %46 = vector.extract_strided_slice %43 {offsets = [0, 0], sizes = [16, 16], strides = [1, 1]} : vector<16x32xf32> to vector<16x16xf32>
    %47 = vector.extract_strided_slice %44 {offsets = [0, 0], sizes = [16, 16], strides = [1, 1]} : vector<16x32xf32> to vector<16x16xf32>
    %48 = vector.extract_strided_slice %45 {offsets = [0, 0], sizes = [16, 16], strides = [1, 1]} : vector<16x32xf32> to vector<16x16xf32>
    %49 = tpu.transpose %47, [1, 0] : vector<16x16xf32> -> vector<16x16xf32>
    %cst_30 = arith.constant dense<0.000000e+00> : vector<16x16xf32>
    %50 = tpu.matmul %46, %49, %cst_30 {dimension_numbers = #tpu.dot_dimension_numbers<[1], [0], [0], [1], [0, 0, 1, 1], [], []>} : vector<16x16xf32>, vector<16x16xf32>, vector<16x16xf32> -> vector<16x16xf32>
    %cst_31 = arith.constant -9.99999984E+17 : f32
    %51 = vector.broadcast %cst_31 : f32 to vector<16x16xf32>
    %52 = arith.select %2, %51, %50 : vector<16x16xi1>, vector<16x16xf32>
    %cst_32 = arith.constant dense<0xFF800000> : vector<16xf32>
    %53 = vector.multi_reduction <maximumf>, %52, %cst_32 [1] : vector<16x16xf32> to vector<16xf32>
    %54 = vector.shape_cast %53 : vector<16xf32> to vector<16x1xf32>
    %55 = vector.broadcast %54 : vector<16x1xf32> to vector<16x16xf32>
    %56 = arith.subf %52, %55 : vector<16x16xf32>
    %57 = math.exp %56 : vector<16x16xf32>
    %cst_33 = arith.constant dense<0.000000e+00> : vector<16xf32>
    %58 = vector.multi_reduction <add>, %57, %cst_33 [1] : vector<16x16xf32> to vector<16xf32>
    %59 = vector.shape_cast %58 : vector<16xf32> to vector<16x1xf32>
    %60 = tpu.reciprocal %59 : vector<16x1xf32> -> vector<16x1xf32>
    %61 = vector.broadcast %60 : vector<16x1xf32> to vector<16x16xf32>
    %62 = arith.mulf %57, %61 : vector<16x16xf32>
    %cst_34 = arith.constant dense<0.000000e+00> : vector<16x16xf32>
    %63 = tpu.matmul %62, %48, %cst_34 {dimension_numbers = #tpu.dot_dimension_numbers<[1], [0], [0], [1], [0, 0, 1, 1], [], []>} : vector<16x16xf32>, vector<16x16xf32>, vector<16x16xf32> -> vector<16x16xf32>
    %64 = vector.extract_strided_slice %43 {offsets = [0, 16], sizes = [16, 16], strides = [1, 1]} : vector<16x32xf32> to vector<16x16xf32>
    %65 = vector.extract_strided_slice %44 {offsets = [0, 16], sizes = [16, 16], strides = [1, 1]} : vector<16x32xf32> to vector<16x16xf32>
    %66 = vector.extract_strided_slice %45 {offsets = [0, 16], sizes = [16, 16], strides = [1, 1]} : vector<16x32xf32> to vector<16x16xf32>
    %67 = tpu.transpose %65, [1, 0] : vector<16x16xf32> -> vector<16x16xf32>
    %cst_35 = arith.constant dense<0.000000e+00> : vector<16x16xf32>
    %68 = tpu.matmul %64, %67, %cst_35 {dimension_numbers = #tpu.dot_dimension_numbers<[1], [0], [0], [1], [0, 0, 1, 1], [], []>} : vector<16x16xf32>, vector<16x16xf32>, vector<16x16xf32> -> vector<16x16xf32>
    %cst_36 = arith.constant -9.99999984E+17 : f32
    %69 = vector.broadcast %cst_36 : f32 to vector<16x16xf32>
    %70 = arith.select %2, %69, %68 : vector<16x16xi1>, vector<16x16xf32>
    %cst_37 = arith.constant dense<0xFF800000> : vector<16xf32>
    %71 = vector.multi_reduction <maximumf>, %70, %cst_37 [1] : vector<16x16xf32> to vector<16xf32>
    %72 = vector.shape_cast %71 : vector<16xf32> to vector<16x1xf32>
    %73 = vector.broadcast %72 : vector<16x1xf32> to vector<16x16xf32>
    %74 = arith.subf %70, %73 : vector<16x16xf32>
    %75 = math.exp %74 : vector<16x16xf32>
    %cst_38 = arith.constant dense<0.000000e+00> : vector<16xf32>
    %76 = vector.multi_reduction <add>, %75, %cst_38 [1] : vector<16x16xf32> to vector<16xf32>
    %77 = vector.shape_cast %76 : vector<16xf32> to vector<16x1xf32>
    %78 = tpu.reciprocal %77 : vector<16x1xf32> -> vector<16x1xf32>
    %79 = vector.broadcast %78 : vector<16x1xf32> to vector<16x16xf32>
    %80 = arith.mulf %75, %79 : vector<16x16xf32>
    %cst_39 = arith.constant dense<0.000000e+00> : vector<16x16xf32>
    %81 = tpu.matmul %80, %66, %cst_39 {dimension_numbers = #tpu.dot_dimension_numbers<[1], [0], [0], [1], [0, 0, 1, 1], [], []>} : vector<16x16xf32>, vector<16x16xf32>, vector<16x16xf32> -> vector<16x16xf32>
    %82 = tpu.concatenate %63, %81 in 1 : vector<16x16xf32>, vector<16x16xf32> -> vector<16x32xf32>
    %c0_40 = arith.constant 0 : index
    %c0_41 = arith.constant 0 : index
    %c0_42 = arith.constant 0 : index
    %83 = vector.load %arg10[%c0_40, %c0_41, %c0_42] : memref<2x32x32xf32, #tpu.memory_space<vmem>>, vector<1x32x32xf32>
    %84 = vector.shape_cast %83 : vector<1x32x32xf32> to vector<32x32xf32>
    %cst_43 = arith.constant dense<0.000000e+00> : vector<16x32xf32>
    %85 = tpu.matmul %82, %84, %cst_43 {dimension_numbers = #tpu.dot_dimension_numbers<[1], [0], [0], [1], [0, 0, 1, 1], [], []>} : vector<16x32xf32>, vector<32x32xf32>, vector<16x32xf32> -> vector<16x32xf32>
    %86 = arith.addf %13, %85 : vector<16x32xf32>
    %c1_44 = arith.constant 1 : index
    %c0_45 = arith.constant 0 : index
    %87 = vector.load %arg7[%c1_44, %c0_45] : memref<7x32xf32, #tpu.memory_space<vmem>>, vector<1x32xf32>
    %c1_46 = arith.constant 1 : index
    %c0_47 = arith.constant 0 : index
    %88 = vector.load %arg8[%c1_46, %c0_47] : memref<7x32xf32, #tpu.memory_space<vmem>>, vector<1x32xf32>
    %cst_48 = arith.constant dense<0.000000e+00> : vector<16xf32>
    %89 = vector.multi_reduction <add>, %86, %cst_48 [1] : vector<16x32xf32> to vector<16xf32>
    %90 = vector.shape_cast %89 : vector<16xf32> to vector<16x1xf32>
    %cst_49 = arith.constant 3.200000e+01 : f32
    %91 = vector.broadcast %cst_49 : f32 to vector<16x1xf32>
    %92 = arith.divf %90, %91 : vector<16x1xf32>
    %93 = vector.broadcast %92 : vector<16x1xf32> to vector<16x32xf32>
    %94 = arith.subf %86, %93 : vector<16x32xf32>
    %95 = arith.mulf %94, %94 : vector<16x32xf32>
    %cst_50 = arith.constant dense<0.000000e+00> : vector<16xf32>
    %96 = vector.multi_reduction <add>, %95, %cst_50 [1] : vector<16x32xf32> to vector<16xf32>
    %97 = vector.shape_cast %96 : vector<16xf32> to vector<16x1xf32>
    %cst_51 = arith.constant 3.100000e+01 : f32
    %98 = vector.broadcast %cst_51 : f32 to vector<16x1xf32>
    %99 = arith.divf %97, %98 : vector<16x1xf32>
    %100 = vector.broadcast %92 : vector<16x1xf32> to vector<16x32xf32>
    %101 = arith.subf %86, %100 : vector<16x32xf32>
    %102 = vector.broadcast %87 : vector<1x32xf32> to vector<16x32xf32>
    %103 = arith.mulf %102, %101 : vector<16x32xf32>
    %104 = math.sqrt %99 : vector<16x1xf32>
    %cst_52 = arith.constant 9.99999997E-7 : f32
    %105 = vector.broadcast %cst_52 : f32 to vector<16x1xf32>
    %106 = arith.addf %104, %105 : vector<16x1xf32>
    %107 = vector.broadcast %106 : vector<16x1xf32> to vector<16x32xf32>
    %108 = arith.divf %103, %107 : vector<16x32xf32>
    %109 = vector.broadcast %88 : vector<1x32xf32> to vector<16x32xf32>
    %110 = arith.addf %108, %109 : vector<16x32xf32>
    %c0_53 = arith.constant 0 : index
    %c0_54 = arith.constant 0 : index
    %c0_55 = arith.constant 0 : index
    %111 = vector.load %arg11[%c0_53, %c0_54, %c0_55] : memref<2x32x32xf32, #tpu.memory_space<vmem>>, vector<1x32x32xf32>
    %112 = vector.shape_cast %111 : vector<1x32x32xf32> to vector<32x32xf32>
    %cst_56 = arith.constant dense<0.000000e+00> : vector<16x32xf32>
    %113 = tpu.matmul %110, %112, %cst_56 {dimension_numbers = #tpu.dot_dimension_numbers<[1], [0], [0], [1], [0, 0, 1, 1], [], []>} : vector<16x32xf32>, vector<32x32xf32>, vector<16x32xf32> -> vector<16x32xf32>
    %cst_57 = arith.constant 2.500000e-01 : f32
    %114 = vector.broadcast %cst_57 : f32 to vector<16x32xf32>
    %115 = arith.mulf %113, %114 : vector<16x32xf32>
    %c0_58 = arith.constant 0 : index
    %c0_59 = arith.constant 0 : index
    %c0_60 = arith.constant 0 : index
    %116 = vector.load %arg12[%c0_58, %c0_59, %c0_60] : memref<2x32x64xf32, #tpu.memory_space<vmem>>, vector<1x32x64xf32>
    %117 = vector.shape_cast %116 : vector<1x32x64xf32> to vector<32x64xf32>
    %cst_61 = arith.constant dense<0.000000e+00> : vector<32x64xf32>
    %118 = tpu.matmul %8, %117, %cst_61 {dimension_numbers = #tpu.dot_dimension_numbers<[1], [0], [0], [1], [0, 0, 1, 1], [], []>} : vector<32x32xf32>, vector<32x64xf32>, vector<32x64xf32> -> vector<32x64xf32>
    %119 = vector.extract_strided_slice %118 {offsets = [0, 0], sizes = [32, 32], strides = [1, 1]} : vector<32x64xf32> to vector<32x32xf32>
    %120 = vector.extract_strided_slice %118 {offsets = [0, 32], sizes = [32, 32], strides = [1, 1]} : vector<32x64xf32> to vector<32x32xf32>
    %121 = vector.extract_strided_slice %115 {offsets = [0, 0], sizes = [16, 16], strides = [1, 1]} : vector<16x32xf32> to vector<16x16xf32>
    %122 = vector.extract_strided_slice %119 {offsets = [0, 0], sizes = [32, 16], strides = [1, 1]} : vector<32x32xf32> to vector<32x16xf32>
    %123 = vector.extract_strided_slice %120 {offsets = [0, 0], sizes = [32, 16], strides = [1, 1]} : vector<32x32xf32> to vector<32x16xf32>
    %124 = tpu.transpose %122, [1, 0] : vector<32x16xf32> -> vector<16x32xf32>
    %cst_62 = arith.constant dense<0.000000e+00> : vector<16x32xf32>
    %125 = tpu.matmul %121, %124, %cst_62 {dimension_numbers = #tpu.dot_dimension_numbers<[1], [0], [0], [1], [0, 0, 1, 1], [], []>} : vector<16x16xf32>, vector<16x32xf32>, vector<16x32xf32> -> vector<16x32xf32>
    %cst_63 = arith.constant -9.99999984E+17 : f32
    %126 = vector.broadcast %cst_63 : f32 to vector<16x32xf32>
    %127 = arith.select %5, %126, %125 : vector<16x32xi1>, vector<16x32xf32>
    %cst_64 = arith.constant dense<0xFF800000> : vector<16xf32>
    %128 = vector.multi_reduction <maximumf>, %127, %cst_64 [1] : vector<16x32xf32> to vector<16xf32>
    %129 = vector.shape_cast %128 : vector<16xf32> to vector<16x1xf32>
    %130 = vector.broadcast %129 : vector<16x1xf32> to vector<16x32xf32>
    %131 = arith.subf %127, %130 : vector<16x32xf32>
    %132 = math.exp %131 : vector<16x32xf32>
    %cst_65 = arith.constant dense<0.000000e+00> : vector<16xf32>
    %133 = vector.multi_reduction <add>, %132, %cst_65 [1] : vector<16x32xf32> to vector<16xf32>
    %134 = vector.shape_cast %133 : vector<16xf32> to vector<16x1xf32>
    %135 = tpu.reciprocal %134 : vector<16x1xf32> -> vector<16x1xf32>
    %136 = vector.broadcast %135 : vector<16x1xf32> to vector<16x32xf32>
    %137 = arith.mulf %132, %136 : vector<16x32xf32>
    %cst_66 = arith.constant dense<0.000000e+00> : vector<16x16xf32>
    %138 = tpu.matmul %137, %123, %cst_66 {dimension_numbers = #tpu.dot_dimension_numbers<[1], [0], [0], [1], [0, 0, 1, 1], [], []>} : vector<16x32xf32>, vector<32x16xf32>, vector<16x16xf32> -> vector<16x16xf32>
    %139 = vector.extract_strided_slice %115 {offsets = [0, 16], sizes = [16, 16], strides = [1, 1]} : vector<16x32xf32> to vector<16x16xf32>
    %140 = vector.extract_strided_slice %119 {offsets = [0, 16], sizes = [32, 16], strides = [1, 1]} : vector<32x32xf32> to vector<32x16xf32>
    %141 = vector.extract_strided_slice %120 {offsets = [0, 16], sizes = [32, 16], strides = [1, 1]} : vector<32x32xf32> to vector<32x16xf32>
    %142 = tpu.transpose %140, [1, 0] : vector<32x16xf32> -> vector<16x32xf32>
    %cst_67 = arith.constant dense<0.000000e+00> : vector<16x32xf32>
    %143 = tpu.matmul %139, %142, %cst_67 {dimension_numbers = #tpu.dot_dimension_numbers<[1], [0], [0], [1], [0, 0, 1, 1], [], []>} : vector<16x16xf32>, vector<16x32xf32>, vector<16x32xf32> -> vector<16x32xf32>
    %cst_68 = arith.constant -9.99999984E+17 : f32
    %144 = vector.broadcast %cst_68 : f32 to vector<16x32xf32>
    %145 = arith.select %5, %144, %143 : vector<16x32xi1>, vector<16x32xf32>
    %cst_69 = arith.constant dense<0xFF800000> : vector<16xf32>
    %146 = vector.multi_reduction <maximumf>, %145, %cst_69 [1] : vector<16x32xf32> to vector<16xf32>
    %147 = vector.shape_cast %146 : vector<16xf32> to vector<16x1xf32>
    %148 = vector.broadcast %147 : vector<16x1xf32> to vector<16x32xf32>
    %149 = arith.subf %145, %148 : vector<16x32xf32>
    %150 = math.exp %149 : vector<16x32xf32>
    %cst_70 = arith.constant dense<0.000000e+00> : vector<16xf32>
    %151 = vector.multi_reduction <add>, %150, %cst_70 [1] : vector<16x32xf32> to vector<16xf32>
    %152 = vector.shape_cast %151 : vector<16xf32> to vector<16x1xf32>
    %153 = tpu.reciprocal %152 : vector<16x1xf32> -> vector<16x1xf32>
    %154 = vector.broadcast %153 : vector<16x1xf32> to vector<16x32xf32>
    %155 = arith.mulf %150, %154 : vector<16x32xf32>
    %cst_71 = arith.constant dense<0.000000e+00> : vector<16x16xf32>
    %156 = tpu.matmul %155, %141, %cst_71 {dimension_numbers = #tpu.dot_dimension_numbers<[1], [0], [0], [1], [0, 0, 1, 1], [], []>} : vector<16x32xf32>, vector<32x16xf32>, vector<16x16xf32> -> vector<16x16xf32>
    %157 = tpu.concatenate %138, %156 in 1 : vector<16x16xf32>, vector<16x16xf32> -> vector<16x32xf32>
    %c0_72 = arith.constant 0 : index
    %c0_73 = arith.constant 0 : index
    %c0_74 = arith.constant 0 : index
    %158 = vector.load %arg13[%c0_72, %c0_73, %c0_74] : memref<2x32x32xf32, #tpu.memory_space<vmem>>, vector<1x32x32xf32>
    %159 = vector.shape_cast %158 : vector<1x32x32xf32> to vector<32x32xf32>
    %cst_75 = arith.constant dense<0.000000e+00> : vector<16x32xf32>
    %160 = tpu.matmul %157, %159, %cst_75 {dimension_numbers = #tpu.dot_dimension_numbers<[1], [0], [0], [1], [0, 0, 1, 1], [], []>} : vector<16x32xf32>, vector<32x32xf32>, vector<16x32xf32> -> vector<16x32xf32>
    %161 = arith.addf %86, %160 : vector<16x32xf32>
    %c2 = arith.constant 2 : index
    %c0_76 = arith.constant 0 : index
    %162 = vector.load %arg7[%c2, %c0_76] : memref<7x32xf32, #tpu.memory_space<vmem>>, vector<1x32xf32>
    %c2_77 = arith.constant 2 : index
    %c0_78 = arith.constant 0 : index
    %163 = vector.load %arg8[%c2_77, %c0_78] : memref<7x32xf32, #tpu.memory_space<vmem>>, vector<1x32xf32>
    %cst_79 = arith.constant dense<0.000000e+00> : vector<16xf32>
    %164 = vector.multi_reduction <add>, %161, %cst_79 [1] : vector<16x32xf32> to vector<16xf32>
    %165 = vector.shape_cast %164 : vector<16xf32> to vector<16x1xf32>
    %cst_80 = arith.constant 3.200000e+01 : f32
    %166 = vector.broadcast %cst_80 : f32 to vector<16x1xf32>
    %167 = arith.divf %165, %166 : vector<16x1xf32>
    %168 = vector.broadcast %167 : vector<16x1xf32> to vector<16x32xf32>
    %169 = arith.subf %161, %168 : vector<16x32xf32>
    %170 = arith.mulf %169, %169 : vector<16x32xf32>
    %cst_81 = arith.constant dense<0.000000e+00> : vector<16xf32>
    %171 = vector.multi_reduction <add>, %170, %cst_81 [1] : vector<16x32xf32> to vector<16xf32>
    %172 = vector.shape_cast %171 : vector<16xf32> to vector<16x1xf32>
    %cst_82 = arith.constant 3.100000e+01 : f32
    %173 = vector.broadcast %cst_82 : f32 to vector<16x1xf32>
    %174 = arith.divf %172, %173 : vector<16x1xf32>
    %175 = vector.broadcast %167 : vector<16x1xf32> to vector<16x32xf32>
    %176 = arith.subf %161, %175 : vector<16x32xf32>
    %177 = vector.broadcast %162 : vector<1x32xf32> to vector<16x32xf32>
    %178 = arith.mulf %177, %176 : vector<16x32xf32>
    %179 = math.sqrt %174 : vector<16x1xf32>
    %cst_83 = arith.constant 9.99999997E-7 : f32
    %180 = vector.broadcast %cst_83 : f32 to vector<16x1xf32>
    %181 = arith.addf %179, %180 : vector<16x1xf32>
    %182 = vector.broadcast %181 : vector<16x1xf32> to vector<16x32xf32>
    %183 = arith.divf %178, %182 : vector<16x32xf32>
    %184 = vector.broadcast %163 : vector<1x32xf32> to vector<16x32xf32>
    %185 = arith.addf %183, %184 : vector<16x32xf32>
    %c0_84 = arith.constant 0 : index
    %c0_85 = arith.constant 0 : index
    %c0_86 = arith.constant 0 : index
    %186 = vector.load %arg14[%c0_84, %c0_85, %c0_86] : memref<2x96x64xf32, #tpu.memory_space<vmem>>, vector<1x96x64xf32>
    %187 = vector.shape_cast %186 : vector<1x96x64xf32> to vector<96x64xf32>
    %c0_87 = arith.constant 0 : index
    %c0_88 = arith.constant 0 : index
    %188 = vector.load %arg15[%c0_87, %c0_88] : memref<2x64xf32, #tpu.memory_space<vmem>>, vector<1x64xf32>
    %cst_89 = arith.constant 0.000000e+00 : f32
    %189 = vector.broadcast %cst_89 : f32 to vector<2x32xf32>
    %190 = vector.extract_strided_slice %185 {offsets = [0, 0], sizes = [14, 32], strides = [1, 1]} : vector<16x32xf32> to vector<14x32xf32>
    %191 = tpu.concatenate %189, %190 in 0 : vector<2x32xf32>, vector<14x32xf32> -> vector<16x32xf32>
    %192 = vector.broadcast %7 : vector<16x1xf32> to vector<16x32xf32>
    %193 = arith.mulf %191, %192 : vector<16x32xf32>
    %cst_90 = arith.constant 0.000000e+00 : f32
    %194 = vector.broadcast %cst_90 : f32 to vector<1x32xf32>
    %195 = vector.extract_strided_slice %185 {offsets = [0, 0], sizes = [15, 32], strides = [1, 1]} : vector<16x32xf32> to vector<15x32xf32>
    %196 = tpu.concatenate %194, %195 in 0 : vector<1x32xf32>, vector<15x32xf32> -> vector<16x32xf32>
    %197 = vector.broadcast %6 : vector<16x1xf32> to vector<16x32xf32>
    %198 = arith.mulf %196, %197 : vector<16x32xf32>
    %199 = tpu.concatenate %193, %198, %185 in 1 : vector<16x32xf32>, vector<16x32xf32>, vector<16x32xf32> -> vector<16x96xf32>
    %cst_91 = arith.constant dense<0.000000e+00> : vector<16x64xf32>
    %200 = tpu.matmul %199, %187, %cst_91 {dimension_numbers = #tpu.dot_dimension_numbers<[1], [0], [0], [1], [0, 0, 1, 1], [], []>} : vector<16x96xf32>, vector<96x64xf32>, vector<16x64xf32> -> vector<16x64xf32>
    %201 = vector.broadcast %188 : vector<1x64xf32> to vector<16x64xf32>
    %202 = arith.addf %200, %201 : vector<16x64xf32>
    %cst_92 = arith.constant 0.000000e+00 : f32
    %203 = vector.broadcast %cst_92 : f32 to vector<16x64xf32>
    %204 = arith.maximumf %202, %203 : vector<16x64xf32>
    %c0_93 = arith.constant 0 : index
    %c0_94 = arith.constant 0 : index
    %c0_95 = arith.constant 0 : index
    %205 = vector.load %arg16[%c0_93, %c0_94, %c0_95] : memref<2x192x32xf32, #tpu.memory_space<vmem>>, vector<1x192x32xf32>
    %206 = vector.shape_cast %205 : vector<1x192x32xf32> to vector<192x32xf32>
    %c0_96 = arith.constant 0 : index
    %c0_97 = arith.constant 0 : index
    %207 = vector.load %arg17[%c0_96, %c0_97] : memref<2x32xf32, #tpu.memory_space<vmem>>, vector<1x32xf32>
    %cst_98 = arith.constant 0.000000e+00 : f32
    %208 = vector.broadcast %cst_98 : f32 to vector<2x64xf32>
    %209 = vector.extract_strided_slice %204 {offsets = [0, 0], sizes = [14, 64], strides = [1, 1]} : vector<16x64xf32> to vector<14x64xf32>
    %210 = tpu.concatenate %208, %209 in 0 : vector<2x64xf32>, vector<14x64xf32> -> vector<16x64xf32>
    %211 = vector.broadcast %7 : vector<16x1xf32> to vector<16x64xf32>
    %212 = arith.mulf %210, %211 : vector<16x64xf32>
    %cst_99 = arith.constant 0.000000e+00 : f32
    %213 = vector.broadcast %cst_99 : f32 to vector<1x64xf32>
    %214 = vector.extract_strided_slice %204 {offsets = [0, 0], sizes = [15, 64], strides = [1, 1]} : vector<16x64xf32> to vector<15x64xf32>
    %215 = tpu.concatenate %213, %214 in 0 : vector<1x64xf32>, vector<15x64xf32> -> vector<16x64xf32>
    %216 = vector.broadcast %6 : vector<16x1xf32> to vector<16x64xf32>
    %217 = arith.mulf %215, %216 : vector<16x64xf32>
    %218 = tpu.concatenate %212, %217, %204 in 1 : vector<16x64xf32>, vector<16x64xf32>, vector<16x64xf32> -> vector<16x192xf32>
    %cst_100 = arith.constant dense<0.000000e+00> : vector<16x32xf32>
    %219 = tpu.matmul %218, %206, %cst_100 {dimension_numbers = #tpu.dot_dimension_numbers<[1], [0], [0], [1], [0, 0, 1, 1], [], []>} : vector<16x192xf32>, vector<192x32xf32>, vector<16x32xf32> -> vector<16x32xf32>
    %220 = vector.broadcast %207 : vector<1x32xf32> to vector<16x32xf32>
    %221 = arith.addf %219, %220 : vector<16x32xf32>
    %cst_101 = arith.constant 0.000000e+00 : f32
    %222 = vector.broadcast %cst_101 : f32 to vector<16x32xf32>
    %223 = arith.maximumf %221, %222 : vector<16x32xf32>
    %224 = arith.addf %161, %223 : vector<16x32xf32>
    %c3 = arith.constant 3 : index
    %c0_102 = arith.constant 0 : index
    %225 = vector.load %arg7[%c3, %c0_102] : memref<7x32xf32, #tpu.memory_space<vmem>>, vector<1x32xf32>
    %c3_103 = arith.constant 3 : index
    %c0_104 = arith.constant 0 : index
    %226 = vector.load %arg8[%c3_103, %c0_104] : memref<7x32xf32, #tpu.memory_space<vmem>>, vector<1x32xf32>
    %cst_105 = arith.constant dense<0.000000e+00> : vector<16xf32>
    %227 = vector.multi_reduction <add>, %224, %cst_105 [1] : vector<16x32xf32> to vector<16xf32>
    %228 = vector.shape_cast %227 : vector<16xf32> to vector<16x1xf32>
    %cst_106 = arith.constant 3.200000e+01 : f32
    %229 = vector.broadcast %cst_106 : f32 to vector<16x1xf32>
    %230 = arith.divf %228, %229 : vector<16x1xf32>
    %231 = vector.broadcast %230 : vector<16x1xf32> to vector<16x32xf32>
    %232 = arith.subf %224, %231 : vector<16x32xf32>
    %233 = arith.mulf %232, %232 : vector<16x32xf32>
    %cst_107 = arith.constant dense<0.000000e+00> : vector<16xf32>
    %234 = vector.multi_reduction <add>, %233, %cst_107 [1] : vector<16x32xf32> to vector<16xf32>
    %235 = vector.shape_cast %234 : vector<16xf32> to vector<16x1xf32>
    %cst_108 = arith.constant 3.100000e+01 : f32
    %236 = vector.broadcast %cst_108 : f32 to vector<16x1xf32>
    %237 = arith.divf %235, %236 : vector<16x1xf32>
    %238 = vector.broadcast %230 : vector<16x1xf32> to vector<16x32xf32>
    %239 = arith.subf %224, %238 : vector<16x32xf32>
    %240 = vector.broadcast %225 : vector<1x32xf32> to vector<16x32xf32>
    %241 = arith.mulf %240, %239 : vector<16x32xf32>
    %242 = math.sqrt %237 : vector<16x1xf32>
    %cst_109 = arith.constant 9.99999997E-7 : f32
    %243 = vector.broadcast %cst_109 : f32 to vector<16x1xf32>
    %244 = arith.addf %242, %243 : vector<16x1xf32>
    %245 = vector.broadcast %244 : vector<16x1xf32> to vector<16x32xf32>
    %246 = arith.divf %241, %245 : vector<16x32xf32>
    %247 = vector.broadcast %226 : vector<1x32xf32> to vector<16x32xf32>
    %248 = arith.addf %246, %247 : vector<16x32xf32>
    %c1_110 = arith.constant 1 : index
    %c0_111 = arith.constant 0 : index
    %c0_112 = arith.constant 0 : index
    %249 = vector.load %arg9[%c1_110, %c0_111, %c0_112] : memref<2x32x96xf32, #tpu.memory_space<vmem>>, vector<1x32x96xf32>
    %250 = vector.shape_cast %249 : vector<1x32x96xf32> to vector<32x96xf32>
    %cst_113 = arith.constant dense<0.000000e+00> : vector<16x96xf32>
    %251 = tpu.matmul %248, %250, %cst_113 {dimension_numbers = #tpu.dot_dimension_numbers<[1], [0], [0], [1], [0, 0, 1, 1], [], []>} : vector<16x32xf32>, vector<32x96xf32>, vector<16x96xf32> -> vector<16x96xf32>
    %252 = vector.extract_strided_slice %251 {offsets = [0, 0], sizes = [16, 32], strides = [1, 1]} : vector<16x96xf32> to vector<16x32xf32>
    %cst_114 = arith.constant 2.500000e-01 : f32
    %253 = vector.broadcast %cst_114 : f32 to vector<16x32xf32>
    %254 = arith.mulf %252, %253 : vector<16x32xf32>
    %255 = vector.extract_strided_slice %251 {offsets = [0, 32], sizes = [16, 32], strides = [1, 1]} : vector<16x96xf32> to vector<16x32xf32>
    %256 = vector.extract_strided_slice %251 {offsets = [0, 64], sizes = [16, 32], strides = [1, 1]} : vector<16x96xf32> to vector<16x32xf32>
    %257 = vector.extract_strided_slice %254 {offsets = [0, 0], sizes = [16, 16], strides = [1, 1]} : vector<16x32xf32> to vector<16x16xf32>
    %258 = vector.extract_strided_slice %255 {offsets = [0, 0], sizes = [16, 16], strides = [1, 1]} : vector<16x32xf32> to vector<16x16xf32>
    %259 = vector.extract_strided_slice %256 {offsets = [0, 0], sizes = [16, 16], strides = [1, 1]} : vector<16x32xf32> to vector<16x16xf32>
    %260 = tpu.transpose %258, [1, 0] : vector<16x16xf32> -> vector<16x16xf32>
    %cst_115 = arith.constant dense<0.000000e+00> : vector<16x16xf32>
    %261 = tpu.matmul %257, %260, %cst_115 {dimension_numbers = #tpu.dot_dimension_numbers<[1], [0], [0], [1], [0, 0, 1, 1], [], []>} : vector<16x16xf32>, vector<16x16xf32>, vector<16x16xf32> -> vector<16x16xf32>
    %cst_116 = arith.constant -9.99999984E+17 : f32
    %262 = vector.broadcast %cst_116 : f32 to vector<16x16xf32>
    %263 = arith.select %2, %262, %261 : vector<16x16xi1>, vector<16x16xf32>
    %cst_117 = arith.constant dense<0xFF800000> : vector<16xf32>
    %264 = vector.multi_reduction <maximumf>, %263, %cst_117 [1] : vector<16x16xf32> to vector<16xf32>
    %265 = vector.shape_cast %264 : vector<16xf32> to vector<16x1xf32>
    %266 = vector.broadcast %265 : vector<16x1xf32> to vector<16x16xf32>
    %267 = arith.subf %263, %266 : vector<16x16xf32>
    %268 = math.exp %267 : vector<16x16xf32>
    %cst_118 = arith.constant dense<0.000000e+00> : vector<16xf32>
    %269 = vector.multi_reduction <add>, %268, %cst_118 [1] : vector<16x16xf32> to vector<16xf32>
    %270 = vector.shape_cast %269 : vector<16xf32> to vector<16x1xf32>
    %271 = tpu.reciprocal %270 : vector<16x1xf32> -> vector<16x1xf32>
    %272 = vector.broadcast %271 : vector<16x1xf32> to vector<16x16xf32>
    %273 = arith.mulf %268, %272 : vector<16x16xf32>
    %cst_119 = arith.constant dense<0.000000e+00> : vector<16x16xf32>
    %274 = tpu.matmul %273, %259, %cst_119 {dimension_numbers = #tpu.dot_dimension_numbers<[1], [0], [0], [1], [0, 0, 1, 1], [], []>} : vector<16x16xf32>, vector<16x16xf32>, vector<16x16xf32> -> vector<16x16xf32>
    %275 = vector.extract_strided_slice %254 {offsets = [0, 16], sizes = [16, 16], strides = [1, 1]} : vector<16x32xf32> to vector<16x16xf32>
    %276 = vector.extract_strided_slice %255 {offsets = [0, 16], sizes = [16, 16], strides = [1, 1]} : vector<16x32xf32> to vector<16x16xf32>
    %277 = vector.extract_strided_slice %256 {offsets = [0, 16], sizes = [16, 16], strides = [1, 1]} : vector<16x32xf32> to vector<16x16xf32>
    %278 = tpu.transpose %276, [1, 0] : vector<16x16xf32> -> vector<16x16xf32>
    %cst_120 = arith.constant dense<0.000000e+00> : vector<16x16xf32>
    %279 = tpu.matmul %275, %278, %cst_120 {dimension_numbers = #tpu.dot_dimension_numbers<[1], [0], [0], [1], [0, 0, 1, 1], [], []>} : vector<16x16xf32>, vector<16x16xf32>, vector<16x16xf32> -> vector<16x16xf32>
    %cst_121 = arith.constant -9.99999984E+17 : f32
    %280 = vector.broadcast %cst_121 : f32 to vector<16x16xf32>
    %281 = arith.select %2, %280, %279 : vector<16x16xi1>, vector<16x16xf32>
    %cst_122 = arith.constant dense<0xFF800000> : vector<16xf32>
    %282 = vector.multi_reduction <maximumf>, %281, %cst_122 [1] : vector<16x16xf32> to vector<16xf32>
    %283 = vector.shape_cast %282 : vector<16xf32> to vector<16x1xf32>
    %284 = vector.broadcast %283 : vector<16x1xf32> to vector<16x16xf32>
    %285 = arith.subf %281, %284 : vector<16x16xf32>
    %286 = math.exp %285 : vector<16x16xf32>
    %cst_123 = arith.constant dense<0.000000e+00> : vector<16xf32>
    %287 = vector.multi_reduction <add>, %286, %cst_123 [1] : vector<16x16xf32> to vector<16xf32>
    %288 = vector.shape_cast %287 : vector<16xf32> to vector<16x1xf32>
    %289 = tpu.reciprocal %288 : vector<16x1xf32> -> vector<16x1xf32>
    %290 = vector.broadcast %289 : vector<16x1xf32> to vector<16x16xf32>
    %291 = arith.mulf %286, %290 : vector<16x16xf32>
    %cst_124 = arith.constant dense<0.000000e+00> : vector<16x16xf32>
    %292 = tpu.matmul %291, %277, %cst_124 {dimension_numbers = #tpu.dot_dimension_numbers<[1], [0], [0], [1], [0, 0, 1, 1], [], []>} : vector<16x16xf32>, vector<16x16xf32>, vector<16x16xf32> -> vector<16x16xf32>
    %293 = tpu.concatenate %274, %292 in 1 : vector<16x16xf32>, vector<16x16xf32> -> vector<16x32xf32>
    %c1_125 = arith.constant 1 : index
    %c0_126 = arith.constant 0 : index
    %c0_127 = arith.constant 0 : index
    %294 = vector.load %arg10[%c1_125, %c0_126, %c0_127] : memref<2x32x32xf32, #tpu.memory_space<vmem>>, vector<1x32x32xf32>
    %295 = vector.shape_cast %294 : vector<1x32x32xf32> to vector<32x32xf32>
    %cst_128 = arith.constant dense<0.000000e+00> : vector<16x32xf32>
    %296 = tpu.matmul %293, %295, %cst_128 {dimension_numbers = #tpu.dot_dimension_numbers<[1], [0], [0], [1], [0, 0, 1, 1], [], []>} : vector<16x32xf32>, vector<32x32xf32>, vector<16x32xf32> -> vector<16x32xf32>
    %297 = arith.addf %224, %296 : vector<16x32xf32>
    %c4 = arith.constant 4 : index
    %c0_129 = arith.constant 0 : index
    %298 = vector.load %arg7[%c4, %c0_129] : memref<7x32xf32, #tpu.memory_space<vmem>>, vector<1x32xf32>
    %c4_130 = arith.constant 4 : index
    %c0_131 = arith.constant 0 : index
    %299 = vector.load %arg8[%c4_130, %c0_131] : memref<7x32xf32, #tpu.memory_space<vmem>>, vector<1x32xf32>
    %cst_132 = arith.constant dense<0.000000e+00> : vector<16xf32>
    %300 = vector.multi_reduction <add>, %297, %cst_132 [1] : vector<16x32xf32> to vector<16xf32>
    %301 = vector.shape_cast %300 : vector<16xf32> to vector<16x1xf32>
    %cst_133 = arith.constant 3.200000e+01 : f32
    %302 = vector.broadcast %cst_133 : f32 to vector<16x1xf32>
    %303 = arith.divf %301, %302 : vector<16x1xf32>
    %304 = vector.broadcast %303 : vector<16x1xf32> to vector<16x32xf32>
    %305 = arith.subf %297, %304 : vector<16x32xf32>
    %306 = arith.mulf %305, %305 : vector<16x32xf32>
    %cst_134 = arith.constant dense<0.000000e+00> : vector<16xf32>
    %307 = vector.multi_reduction <add>, %306, %cst_134 [1] : vector<16x32xf32> to vector<16xf32>
    %308 = vector.shape_cast %307 : vector<16xf32> to vector<16x1xf32>
    %cst_135 = arith.constant 3.100000e+01 : f32
    %309 = vector.broadcast %cst_135 : f32 to vector<16x1xf32>
    %310 = arith.divf %308, %309 : vector<16x1xf32>
    %311 = vector.broadcast %303 : vector<16x1xf32> to vector<16x32xf32>
    %312 = arith.subf %297, %311 : vector<16x32xf32>
    %313 = vector.broadcast %298 : vector<1x32xf32> to vector<16x32xf32>
    %314 = arith.mulf %313, %312 : vector<16x32xf32>
    %315 = math.sqrt %310 : vector<16x1xf32>
    %cst_136 = arith.constant 9.99999997E-7 : f32
    %316 = vector.broadcast %cst_136 : f32 to vector<16x1xf32>
    %317 = arith.addf %315, %316 : vector<16x1xf32>
    %318 = vector.broadcast %317 : vector<16x1xf32> to vector<16x32xf32>
    %319 = arith.divf %314, %318 : vector<16x32xf32>
    %320 = vector.broadcast %299 : vector<1x32xf32> to vector<16x32xf32>
    %321 = arith.addf %319, %320 : vector<16x32xf32>
    %c1_137 = arith.constant 1 : index
    %c0_138 = arith.constant 0 : index
    %c0_139 = arith.constant 0 : index
    %322 = vector.load %arg11[%c1_137, %c0_138, %c0_139] : memref<2x32x32xf32, #tpu.memory_space<vmem>>, vector<1x32x32xf32>
    %323 = vector.shape_cast %322 : vector<1x32x32xf32> to vector<32x32xf32>
    %cst_140 = arith.constant dense<0.000000e+00> : vector<16x32xf32>
    %324 = tpu.matmul %321, %323, %cst_140 {dimension_numbers = #tpu.dot_dimension_numbers<[1], [0], [0], [1], [0, 0, 1, 1], [], []>} : vector<16x32xf32>, vector<32x32xf32>, vector<16x32xf32> -> vector<16x32xf32>
    %cst_141 = arith.constant 2.500000e-01 : f32
    %325 = vector.broadcast %cst_141 : f32 to vector<16x32xf32>
    %326 = arith.mulf %324, %325 : vector<16x32xf32>
    %c1_142 = arith.constant 1 : index
    %c0_143 = arith.constant 0 : index
    %c0_144 = arith.constant 0 : index
    %327 = vector.load %arg12[%c1_142, %c0_143, %c0_144] : memref<2x32x64xf32, #tpu.memory_space<vmem>>, vector<1x32x64xf32>
    %328 = vector.shape_cast %327 : vector<1x32x64xf32> to vector<32x64xf32>
    %cst_145 = arith.constant dense<0.000000e+00> : vector<32x64xf32>
    %329 = tpu.matmul %8, %328, %cst_145 {dimension_numbers = #tpu.dot_dimension_numbers<[1], [0], [0], [1], [0, 0, 1, 1], [], []>} : vector<32x32xf32>, vector<32x64xf32>, vector<32x64xf32> -> vector<32x64xf32>
    %330 = vector.extract_strided_slice %329 {offsets = [0, 0], sizes = [32, 32], strides = [1, 1]} : vector<32x64xf32> to vector<32x32xf32>
    %331 = vector.extract_strided_slice %329 {offsets = [0, 32], sizes = [32, 32], strides = [1, 1]} : vector<32x64xf32> to vector<32x32xf32>
    %332 = vector.extract_strided_slice %326 {offsets = [0, 0], sizes = [16, 16], strides = [1, 1]} : vector<16x32xf32> to vector<16x16xf32>
    %333 = vector.extract_strided_slice %330 {offsets = [0, 0], sizes = [32, 16], strides = [1, 1]} : vector<32x32xf32> to vector<32x16xf32>
    %334 = vector.extract_strided_slice %331 {offsets = [0, 0], sizes = [32, 16], strides = [1, 1]} : vector<32x32xf32> to vector<32x16xf32>
    %335 = tpu.transpose %333, [1, 0] : vector<32x16xf32> -> vector<16x32xf32>
    %cst_146 = arith.constant dense<0.000000e+00> : vector<16x32xf32>
    %336 = tpu.matmul %332, %335, %cst_146 {dimension_numbers = #tpu.dot_dimension_numbers<[1], [0], [0], [1], [0, 0, 1, 1], [], []>} : vector<16x16xf32>, vector<16x32xf32>, vector<16x32xf32> -> vector<16x32xf32>
    %cst_147 = arith.constant -9.99999984E+17 : f32
    %337 = vector.broadcast %cst_147 : f32 to vector<16x32xf32>
    %338 = arith.select %5, %337, %336 : vector<16x32xi1>, vector<16x32xf32>
    %cst_148 = arith.constant dense<0xFF800000> : vector<16xf32>
    %339 = vector.multi_reduction <maximumf>, %338, %cst_148 [1] : vector<16x32xf32> to vector<16xf32>
    %340 = vector.shape_cast %339 : vector<16xf32> to vector<16x1xf32>
    %341 = vector.broadcast %340 : vector<16x1xf32> to vector<16x32xf32>
    %342 = arith.subf %338, %341 : vector<16x32xf32>
    %343 = math.exp %342 : vector<16x32xf32>
    %cst_149 = arith.constant dense<0.000000e+00> : vector<16xf32>
    %344 = vector.multi_reduction <add>, %343, %cst_149 [1] : vector<16x32xf32> to vector<16xf32>
    %345 = vector.shape_cast %344 : vector<16xf32> to vector<16x1xf32>
    %346 = tpu.reciprocal %345 : vector<16x1xf32> -> vector<16x1xf32>
    %347 = vector.broadcast %346 : vector<16x1xf32> to vector<16x32xf32>
    %348 = arith.mulf %343, %347 : vector<16x32xf32>
    %cst_150 = arith.constant dense<0.000000e+00> : vector<16x16xf32>
    %349 = tpu.matmul %348, %334, %cst_150 {dimension_numbers = #tpu.dot_dimension_numbers<[1], [0], [0], [1], [0, 0, 1, 1], [], []>} : vector<16x32xf32>, vector<32x16xf32>, vector<16x16xf32> -> vector<16x16xf32>
    %350 = vector.extract_strided_slice %326 {offsets = [0, 16], sizes = [16, 16], strides = [1, 1]} : vector<16x32xf32> to vector<16x16xf32>
    %351 = vector.extract_strided_slice %330 {offsets = [0, 16], sizes = [32, 16], strides = [1, 1]} : vector<32x32xf32> to vector<32x16xf32>
    %352 = vector.extract_strided_slice %331 {offsets = [0, 16], sizes = [32, 16], strides = [1, 1]} : vector<32x32xf32> to vector<32x16xf32>
    %353 = tpu.transpose %351, [1, 0] : vector<32x16xf32> -> vector<16x32xf32>
    %cst_151 = arith.constant dense<0.000000e+00> : vector<16x32xf32>
    %354 = tpu.matmul %350, %353, %cst_151 {dimension_numbers = #tpu.dot_dimension_numbers<[1], [0], [0], [1], [0, 0, 1, 1], [], []>} : vector<16x16xf32>, vector<16x32xf32>, vector<16x32xf32> -> vector<16x32xf32>
    %cst_152 = arith.constant -9.99999984E+17 : f32
    %355 = vector.broadcast %cst_152 : f32 to vector<16x32xf32>
    %356 = arith.select %5, %355, %354 : vector<16x32xi1>, vector<16x32xf32>
    %357 = arith.addf %338, %356 : vector<16x32xf32>
    %cst_153 = arith.constant dense<0xFF800000> : vector<16xf32>
    %358 = vector.multi_reduction <maximumf>, %356, %cst_153 [1] : vector<16x32xf32> to vector<16xf32>
    %359 = vector.shape_cast %358 : vector<16xf32> to vector<16x1xf32>
    %360 = vector.broadcast %359 : vector<16x1xf32> to vector<16x32xf32>
    %361 = arith.subf %356, %360 : vector<16x32xf32>
    %362 = math.exp %361 : vector<16x32xf32>
    %cst_154 = arith.constant dense<0.000000e+00> : vector<16xf32>
    %363 = vector.multi_reduction <add>, %362, %cst_154 [1] : vector<16x32xf32> to vector<16xf32>
    %364 = vector.shape_cast %363 : vector<16xf32> to vector<16x1xf32>
    %365 = tpu.reciprocal %364 : vector<16x1xf32> -> vector<16x1xf32>
    %366 = vector.broadcast %365 : vector<16x1xf32> to vector<16x32xf32>
    %367 = arith.mulf %362, %366 : vector<16x32xf32>
    %cst_155 = arith.constant dense<0.000000e+00> : vector<16x16xf32>
    %368 = tpu.matmul %367, %352, %cst_155 {dimension_numbers = #tpu.dot_dimension_numbers<[1], [0], [0], [1], [0, 0, 1, 1], [], []>} : vector<16x32xf32>, vector<32x16xf32>, vector<16x16xf32> -> vector<16x16xf32>
    %369 = tpu.concatenate %349, %368 in 1 : vector<16x16xf32>, vector<16x16xf32> -> vector<16x32xf32>
    %370 = vector.extract_strided_slice %357 {offsets = [0, 0], sizes = [8, 16], strides = [1, 1]} : vector<16x32xf32> to vector<8x16xf32>
    %cst_156 = arith.constant 5.000000e-01 : f32
    %371 = vector.broadcast %cst_156 : f32 to vector<8x16xf32>
    %372 = arith.mulf %370, %371 : vector<8x16xf32>
    %c0_157 = arith.constant 0 : index
    %c0_158 = arith.constant 0 : index
    %c0_159 = arith.constant 0 : index
    %373 = vector.load %arg19[%c0_157, %c0_158, %c0_159] : memref<2x8x16xf32, #tpu.memory_space<vmem>>, vector<1x8x16xf32>
    %374 = vector.shape_cast %373 : vector<1x8x16xf32> to vector<8x16xf32>
    %375 = vector.shape_cast %372 : vector<8x16xf32> to vector<1x8x16xf32>
    tpu.vector_store %arg19[%c0_157, %c0_158, %c0_159], %375 {strides = array<i32>} : memref<2x8x16xf32, #tpu.memory_space<vmem>>, vector<1x8x16xf32>,
    %376 = vector.extract_strided_slice %357 {offsets = [8, 16], sizes = [8, 16], strides = [1, 1]} : vector<16x32xf32> to vector<8x16xf32>
    %cst_160 = arith.constant 5.000000e-01 : f32
    %377 = vector.broadcast %cst_160 : f32 to vector<8x16xf32>
    %378 = arith.mulf %376, %377 : vector<8x16xf32>
    %c1_161 = arith.constant 1 : index
    %c0_162 = arith.constant 0 : index
    %c0_163 = arith.constant 0 : index
    %379 = vector.load %arg19[%c1_161, %c0_162, %c0_163] : memref<2x8x16xf32, #tpu.memory_space<vmem>>, vector<1x8x16xf32>
    %380 = vector.shape_cast %379 : vector<1x8x16xf32> to vector<8x16xf32>
    %381 = vector.shape_cast %378 : vector<8x16xf32> to vector<1x8x16xf32>
    tpu.vector_store %arg19[%c1_161, %c0_162, %c0_163], %381 {strides = array<i32>} : memref<2x8x16xf32, #tpu.memory_space<vmem>>, vector<1x8x16xf32>,
    %c1_164 = arith.constant 1 : index
    %c0_165 = arith.constant 0 : index
    %c0_166 = arith.constant 0 : index
    %382 = vector.load %arg13[%c1_164, %c0_165, %c0_166] : memref<2x32x32xf32, #tpu.memory_space<vmem>>, vector<1x32x32xf32>
    %383 = vector.shape_cast %382 : vector<1x32x32xf32> to vector<32x32xf32>
    %cst_167 = arith.constant dense<0.000000e+00> : vector<16x32xf32>
    %384 = tpu.matmul %369, %383, %cst_167 {dimension_numbers = #tpu.dot_dimension_numbers<[1], [0], [0], [1], [0, 0, 1, 1], [], []>} : vector<16x32xf32>, vector<32x32xf32>, vector<16x32xf32> -> vector<16x32xf32>
    %385 = arith.addf %297, %384 : vector<16x32xf32>
    %c5 = arith.constant 5 : index
    %c0_168 = arith.constant 0 : index
    %386 = vector.load %arg7[%c5, %c0_168] : memref<7x32xf32, #tpu.memory_space<vmem>>, vector<1x32xf32>
    %c5_169 = arith.constant 5 : index
    %c0_170 = arith.constant 0 : index
    %387 = vector.load %arg8[%c5_169, %c0_170] : memref<7x32xf32, #tpu.memory_space<vmem>>, vector<1x32xf32>
    %cst_171 = arith.constant dense<0.000000e+00> : vector<16xf32>
    %388 = vector.multi_reduction <add>, %385, %cst_171 [1] : vector<16x32xf32> to vector<16xf32>
    %389 = vector.shape_cast %388 : vector<16xf32> to vector<16x1xf32>
    %cst_172 = arith.constant 3.200000e+01 : f32
    %390 = vector.broadcast %cst_172 : f32 to vector<16x1xf32>
    %391 = arith.divf %389, %390 : vector<16x1xf32>
    %392 = vector.broadcast %391 : vector<16x1xf32> to vector<16x32xf32>
    %393 = arith.subf %385, %392 : vector<16x32xf32>
    %394 = arith.mulf %393, %393 : vector<16x32xf32>
    %cst_173 = arith.constant dense<0.000000e+00> : vector<16xf32>
    %395 = vector.multi_reduction <add>, %394, %cst_173 [1] : vector<16x32xf32> to vector<16xf32>
    %396 = vector.shape_cast %395 : vector<16xf32> to vector<16x1xf32>
    %cst_174 = arith.constant 3.100000e+01 : f32
    %397 = vector.broadcast %cst_174 : f32 to vector<16x1xf32>
    %398 = arith.divf %396, %397 : vector<16x1xf32>
    %399 = vector.broadcast %391 : vector<16x1xf32> to vector<16x32xf32>
    %400 = arith.subf %385, %399 : vector<16x32xf32>
    %401 = vector.broadcast %386 : vector<1x32xf32> to vector<16x32xf32>
    %402 = arith.mulf %401, %400 : vector<16x32xf32>
    %403 = math.sqrt %398 : vector<16x1xf32>
    %cst_175 = arith.constant 9.99999997E-7 : f32
    %404 = vector.broadcast %cst_175 : f32 to vector<16x1xf32>
    %405 = arith.addf %403, %404 : vector<16x1xf32>
    %406 = vector.broadcast %405 : vector<16x1xf32> to vector<16x32xf32>
    %407 = arith.divf %402, %406 : vector<16x32xf32>
    %408 = vector.broadcast %387 : vector<1x32xf32> to vector<16x32xf32>
    %409 = arith.addf %407, %408 : vector<16x32xf32>
    %c1_176 = arith.constant 1 : index
    %c0_177 = arith.constant 0 : index
    %c0_178 = arith.constant 0 : index
    %410 = vector.load %arg14[%c1_176, %c0_177, %c0_178] : memref<2x96x64xf32, #tpu.memory_space<vmem>>, vector<1x96x64xf32>
    %411 = vector.shape_cast %410 : vector<1x96x64xf32> to vector<96x64xf32>
    %c1_179 = arith.constant 1 : index
    %c0_180 = arith.constant 0 : index
    %412 = vector.load %arg15[%c1_179, %c0_180] : memref<2x64xf32, #tpu.memory_space<vmem>>, vector<1x64xf32>
    %cst_181 = arith.constant 0.000000e+00 : f32
    %413 = vector.broadcast %cst_181 : f32 to vector<2x32xf32>
    %414 = vector.extract_strided_slice %409 {offsets = [0, 0], sizes = [14, 32], strides = [1, 1]} : vector<16x32xf32> to vector<14x32xf32>
    %415 = tpu.concatenate %413, %414 in 0 : vector<2x32xf32>, vector<14x32xf32> -> vector<16x32xf32>
    %416 = vector.broadcast %7 : vector<16x1xf32> to vector<16x32xf32>
    %417 = arith.mulf %415, %416 : vector<16x32xf32>
    %cst_182 = arith.constant 0.000000e+00 : f32
    %418 = vector.broadcast %cst_182 : f32 to vector<1x32xf32>
    %419 = vector.extract_strided_slice %409 {offsets = [0, 0], sizes = [15, 32], strides = [1, 1]} : vector<16x32xf32> to vector<15x32xf32>
    %420 = tpu.concatenate %418, %419 in 0 : vector<1x32xf32>, vector<15x32xf32> -> vector<16x32xf32>
    %421 = vector.broadcast %6 : vector<16x1xf32> to vector<16x32xf32>
    %422 = arith.mulf %420, %421 : vector<16x32xf32>
    %423 = tpu.concatenate %417, %422, %409 in 1 : vector<16x32xf32>, vector<16x32xf32>, vector<16x32xf32> -> vector<16x96xf32>
    %cst_183 = arith.constant dense<0.000000e+00> : vector<16x64xf32>
    %424 = tpu.matmul %423, %411, %cst_183 {dimension_numbers = #tpu.dot_dimension_numbers<[1], [0], [0], [1], [0, 0, 1, 1], [], []>} : vector<16x96xf32>, vector<96x64xf32>, vector<16x64xf32> -> vector<16x64xf32>
    %425 = vector.broadcast %412 : vector<1x64xf32> to vector<16x64xf32>
    %426 = arith.addf %424, %425 : vector<16x64xf32>
    %cst_184 = arith.constant 0.000000e+00 : f32
    %427 = vector.broadcast %cst_184 : f32 to vector<16x64xf32>
    %428 = arith.maximumf %426, %427 : vector<16x64xf32>
    %c1_185 = arith.constant 1 : index
    %c0_186 = arith.constant 0 : index
    %c0_187 = arith.constant 0 : index
    %429 = vector.load %arg16[%c1_185, %c0_186, %c0_187] : memref<2x192x32xf32, #tpu.memory_space<vmem>>, vector<1x192x32xf32>
    %430 = vector.shape_cast %429 : vector<1x192x32xf32> to vector<192x32xf32>
    %c1_188 = arith.constant 1 : index
    %c0_189 = arith.constant 0 : index
    %431 = vector.load %arg17[%c1_188, %c0_189] : memref<2x32xf32, #tpu.memory_space<vmem>>, vector<1x32xf32>
    %cst_190 = arith.constant 0.000000e+00 : f32
    %432 = vector.broadcast %cst_190 : f32 to vector<2x64xf32>
    %433 = vector.extract_strided_slice %428 {offsets = [0, 0], sizes = [14, 64], strides = [1, 1]} : vector<16x64xf32> to vector<14x64xf32>
    %434 = tpu.concatenate %432, %433 in 0 : vector<2x64xf32>, vector<14x64xf32> -> vector<16x64xf32>
    %435 = vector.broadcast %7 : vector<16x1xf32> to vector<16x64xf32>
    %436 = arith.mulf %434, %435 : vector<16x64xf32>
    %cst_191 = arith.constant 0.000000e+00 : f32
    %437 = vector.broadcast %cst_191 : f32 to vector<1x64xf32>
    %438 = vector.extract_strided_slice %428 {offsets = [0, 0], sizes = [15, 64], strides = [1, 1]} : vector<16x64xf32> to vector<15x64xf32>
    %439 = tpu.concatenate %437, %438 in 0 : vector<1x64xf32>, vector<15x64xf32> -> vector<16x64xf32>
    %440 = vector.broadcast %6 : vector<16x1xf32> to vector<16x64xf32>
    %441 = arith.mulf %439, %440 : vector<16x64xf32>
    %442 = tpu.concatenate %436, %441, %428 in 1 : vector<16x64xf32>, vector<16x64xf32>, vector<16x64xf32> -> vector<16x192xf32>
    %cst_192 = arith.constant dense<0.000000e+00> : vector<16x32xf32>
    %443 = tpu.matmul %442, %430, %cst_192 {dimension_numbers = #tpu.dot_dimension_numbers<[1], [0], [0], [1], [0, 0, 1, 1], [], []>} : vector<16x192xf32>, vector<192x32xf32>, vector<16x32xf32> -> vector<16x32xf32>
    %444 = vector.broadcast %431 : vector<1x32xf32> to vector<16x32xf32>
    %445 = arith.addf %443, %444 : vector<16x32xf32>
    %cst_193 = arith.constant 0.000000e+00 : f32
    %446 = vector.broadcast %cst_193 : f32 to vector<16x32xf32>
    %447 = arith.maximumf %445, %446 : vector<16x32xf32>
    %448 = arith.addf %385, %447 : vector<16x32xf32>
    %c6 = arith.constant 6 : index
    %c0_194 = arith.constant 0 : index
    %449 = vector.load %arg7[%c6, %c0_194] : memref<7x32xf32, #tpu.memory_space<vmem>>, vector<1x32xf32>
    %c6_195 = arith.constant 6 : index
    %c0_196 = arith.constant 0 : index
    %450 = vector.load %arg8[%c6_195, %c0_196] : memref<7x32xf32, #tpu.memory_space<vmem>>, vector<1x32xf32>
    %cst_197 = arith.constant dense<0.000000e+00> : vector<16xf32>
    %451 = vector.multi_reduction <add>, %448, %cst_197 [1] : vector<16x32xf32> to vector<16xf32>
    %452 = vector.shape_cast %451 : vector<16xf32> to vector<16x1xf32>
    %cst_198 = arith.constant 3.200000e+01 : f32
    %453 = vector.broadcast %cst_198 : f32 to vector<16x1xf32>
    %454 = arith.divf %452, %453 : vector<16x1xf32>
    %455 = vector.broadcast %454 : vector<16x1xf32> to vector<16x32xf32>
    %456 = arith.subf %448, %455 : vector<16x32xf32>
    %457 = arith.mulf %456, %456 : vector<16x32xf32>
    %cst_199 = arith.constant dense<0.000000e+00> : vector<16xf32>
    %458 = vector.multi_reduction <add>, %457, %cst_199 [1] : vector<16x32xf32> to vector<16xf32>
    %459 = vector.shape_cast %458 : vector<16xf32> to vector<16x1xf32>
    %cst_200 = arith.constant 3.100000e+01 : f32
    %460 = vector.broadcast %cst_200 : f32 to vector<16x1xf32>
    %461 = arith.divf %459, %460 : vector<16x1xf32>
    %462 = vector.broadcast %454 : vector<16x1xf32> to vector<16x32xf32>
    %463 = arith.subf %448, %462 : vector<16x32xf32>
    %464 = vector.broadcast %449 : vector<1x32xf32> to vector<16x32xf32>
    %465 = arith.mulf %464, %463 : vector<16x32xf32>
    %466 = math.sqrt %461 : vector<16x1xf32>
    %cst_201 = arith.constant 9.99999997E-7 : f32
    %467 = vector.broadcast %cst_201 : f32 to vector<16x1xf32>
    %468 = arith.addf %466, %467 : vector<16x1xf32>
    %469 = vector.broadcast %468 : vector<16x1xf32> to vector<16x32xf32>
    %470 = arith.divf %465, %469 : vector<16x32xf32>
    %471 = vector.broadcast %450 : vector<1x32xf32> to vector<16x32xf32>
    %472 = arith.addf %470, %471 : vector<16x32xf32>
    %c0_202 = arith.constant 0 : index
    %c0_203 = arith.constant 0 : index
    %473 = vector.load %arg18[%c0_202, %c0_203] : memref<16x32xf32, #tpu.memory_space<vmem>>, vector<16x32xf32>
    tpu.vector_store %arg18[%c0_202, %c0_203], %472 {strides = array<i32>} : memref<16x32xf32, #tpu.memory_space<vmem>>, vector<16x32xf32>,
    return
  }
}

</mosaic_0001>

<bundles_post_ra>
// kernel: ne.15
= control target key start
LH: loop header
LB: loop body
LE: loop exit
PB: predicated region body
PF: predicated region fallthrough
CT: control target
= control target key end

     0   :  { %vm7_vm0 = vcmask 64512   ;;  %vm13_vm1 = vcmask 130112   ;;  %s39_s0 = inlined_call_operand.vmem [shape: s32[2,8], index: 0, kind: input, shape index: {}]   ;;  %s40_s1 = inlined_call_operand.vmem [shape: s32[16], index: 1, kind: output, shape index: {}]  }
   0x1   :  { %v4_v0 = vld [vmem:[%s39_s0] sm:$0x3]  ;;  %s22_s0 = smov 8  }
   0x2   :  { %5 = vst [vmem:[#allocation1] sm:$0x3] %v4_v0 }
   0x9   :  { %v10_v1 = vld [vmem:[#allocation1 + $0x1] sm:$0x1]   ;;  %v6_v2 = vld [vmem:[#allocation1] sm:$0x1]  }
   0xa   :  { %11 = vrot.lane.b32.xlu0 %v10_v1, %s22_s0  ;;  %8 = vst.msk [vmem:[#allocation0] sm:$0x1] %vm7_vm0, %v6_v2  }
  0x7c   :  { %v12_v3 = vpop.permute.xlu0 %11  }
  0x7d   :  { %14 = vst.msk [vmem:[#allocation0] sm:$0x1] %vm13_vm1, %v12_v3  }
  0x84   :  { %v18_v4 = vld [vmem:[#allocation0] sm:$0x1] }
  0x85   :  { %20 = vst [vmem:[%s40_s1] sm:$0x1] %v18_v4 }

// kernel: ne.25
= control target key start
LH: loop header
LB: loop body
LE: loop exit
PB: predicated region body
PF: predicated region fallthrough
CT: control target
= control target key end

     0   :  { %vm7_vm0 = vcmask 130048   ;;  %vm13_vm1 = vcmask 261248   ;;  %s39_s0 = inlined_call_operand.vmem [shape: s32[2,16], index: 0, kind: input, shape index: {}]   ;;  %s40_s1 = inlined_call_operand.vmem [shape: s32[32], index: 1, kind: output, shape index: {}]  }
   0x1   :  { %v4_v0 = vld [vmem:[%s39_s0] sm:$0x3]  ;;  %s22_s0 = smov 16  }
   0x2   :  { %5 = vst [vmem:[#allocation1] sm:$0x3] %v4_v0 }
   0x9   :  { %v10_v1 = vld [vmem:[#allocation1 + $0x1] sm:$0x1]   ;;  %v6_v2 = vld [vmem:[#allocation1] sm:$0x1]  }
   0xa   :  { %11 = vrot.lane.b32.xlu0 %v10_v1, %s22_s0  ;;  %8 = vst.msk [vmem:[#allocation0] sm:$0x1] %vm7_vm0, %v6_v2  }
  0x7c   :  { %v12_v3 = vpop.permute.xlu0 %11  }
  0x7d   :  { %14 = vst.msk [vmem:[#allocation0] sm:$0x1] %vm13_vm1, %v12_v3  }
  0x84   :  { %v18_v4 = vld [vmem:[#allocation0] sm:$0x1] }
  0x85   :  { %20 = vst [vmem:[%s40_s1] sm:$0x1] %v18_v4 }

// kernel: decoder_forward.1
= control target key start
LH: loop header
LB: loop body
LE: loop exit
PB: predicated region body
PF: predicated region fallthrough
CT: control target
= control target key end

     0   :  { %s6123_s0 = inlined_call_operand.vmem [shape: f32[16,32], index: 0, kind: input, shape index: {}]   ;;  %s6124_s1 = inlined_call_operand.vmem [shape: f32[32,32], index: 1, kind: input, shape index: {}]   ;;  %s6125_s2 = inlined_call_operand.vmem [shape: f32[16,16], index: 2, kind: input, shape index: {}]   ;;  %s6126_s3 = inlined_call_operand.vmem [shape: f32[16,32], index: 3, kind: input, shape index: {}]   ;;  %s6127_s4 = inlined_call_operand.vmem [shape: f32[16,2], index: 4, kind: input, shape index: {}]   ;;  %s6128_s5 = inlined_call_operand.vmem [shape: f32[16,32], index: 5, kind: input, shape index: {}]   ;;  %s6129_s6 = inlined_call_operand.vmem [shape: f32[32,32], index: 6, kind: input, shape index: {}]   ;;  %s6130_s7 = inlined_call_operand.vmem [shape: f32[7,32], index: 7, kind: input, shape index: {}]   ;;  %s6131_s8 = inlined_call_operand.vmem [shape: f32[7,32], index: 8, kind: input, shape index: {}]   ;;  %s6132_s9 = inlined_call_operand.vmem [shape: f32[2,32,96], index: 9, kind: input, shape index: {}]   ;;  %s6133_s10 = inlined_call_operand.vmem [shape: f32[2,32,32], index: 10, kind: input, shape index: {}]   ;;  %s6134_s11 = inlined_call_operand.vmem [shape: f32[2,32,32], index: 11, kind: input, shape index: {}]   ;;  %s6135_s12 = inlined_call_operand.vmem [shape: f32[2,32,64], index: 12, kind: input, shape index: {}]   ;;  %s6136_s13 = inlined_call_operand.vmem [shape: f32[2,32,32], index: 13, kind: input, shape index: {}]   ;;  %s6137_s14 = inlined_call_operand.vmem [shape: f32[2,96,64], index: 14, kind: input, shape index: {}]   ;;  %s6138_s15 = inlined_call_operand.vmem [shape: f32[2,64], index: 15, kind: input, shape index: {}]   ;;  %s6139_s16 = inlined_call_operand.vmem [shape: f32[2,192,32], index: 16, kind: input, shape index: {}]   ;;  %s6140_s17 = inlined_call_operand.vmem [shape: f32[2,32], index: 17, kind: input, shape index: {}]   ;;  %s6141_s18 = inlined_call_operand.hbm [shape: f32[16,32], index: 18, kind: output, shape index: {0}]   ;;  %s6142_s19 = inlined_call_operand.hbm [shape: f32[2,8,16], index: 19, kind: output, shape index: {1}]  }
   0x1   :  { %6147 = sst [smem:[#allocation8_spill]] %s6123_s0 }
   0x2   :  { %6148 = sst [smem:[#allocation9_spill]] %s6124_s1 }
   0x3   :  { %6149 = sst [smem:[#allocation10_spill]] %s6125_s2 }
   0x4   :  { %6150 = sst [smem:[#allocation11_spill]] %s6126_s3 }
   0x5   :  { %25 = vsyncpa [#allocation3], 0  ;;  %v79_v0 = vld [vmem:[%s6129_s6] sm:$0xff]  ;;  %v80_v1 = vld [vmem:[%s6129_s6 + $0x8] sm:$0xff]  ;;  %vm85_vm0 = vcmask 261120   ;;  %s6151_s3 = sld [smem:[#allocation8_spill]] }
   0x6   :  { %v81_v2 = vld [vmem:[%s6129_s6 + $0x10] sm:$0xff]  ;;  %v4427_v3 = vpack.c.bf16 %v80_v1, %v79_v0  ;;  %v82_v4 = vld [vmem:[%s6129_s6 + $0x18] sm:$0xff] }
   0x7   :  { %v4431_v6 = vpack.c.bf16 %v82_v4, %v81_v2 }
   0xb   :  { %v77_v5 = vld [vmem:[%s6151_s3] sm:$0xff] }
   0xc   :  { %4110 = vmatprep.mubr.msk.f32.mxu0 %vm85_vm0, %v77_v5 }
   0xd   :  { %26 = vsyncpa [#allocation5], 0  ;;  %4428 = vmatprep.subr.bf16.mxu0 %v4427_v3  ;;  %v78_v7 = vld [vmem:[%s6151_s3 + $0x8] sm:$0xff]  ;;  %v83_v8 = vld [vmem:[%s6128_s5] sm:$0xff]  ;;  %vm316_vm5 = vcmask 130048   ;;  %s5044_s27 = smov 96  }
   0xe   :  { %4430 = vmatpush3.bf16.msra.mxu0 %v4427_v3  ;;  %v84_v10 = vld [vmem:[%s6128_s5 + $0x8] sm:$0xff]  ;;  %v223_v26 = vld [vmem:[%s6132_s9] sm:$0xff]  ;;  %v225_v28 = vld [vmem:[%s6132_s9 + $0x10] sm:$0xff]  ;;  %s5045_s28 = smov 80   ;;  %s5046_s6 = smov 112  }
   0xf   :  { %4432 = vmatprep.subr.bf16.mxu0 %v4431_v6  ;;  %v224_v27 = vld [vmem:[%s6132_s9 + $0x8] sm:$0xff]  ;;  %v226_v30 = vld [vmem:[%s6132_s9 + $0x18] sm:$0xff]  ;;  %v3762_v48 = vld [vmem:[%s6130_s7] ss:$0 sm:$0xff]  ;;  %s6154_s5 = sld [smem:[#allocation10_spill]]  ;;  %s5047_s21 = smov 64  }
  0x10   :  { %v4435_v29 = vpack.c.bf16 %v224_v27, %v223_v26  ;;  %v4439_v31 = vpack.c.bf16 %v226_v30, %v225_v28  ;;  %v3763_v51 = vld [vmem:[%s6131_s8] ss:$0 sm:$0xff]  ;;  %vm5227_vm6 = vmpackc.low %vm316_vm5, %vm316_vm5  ;;  %s5048_s1 = smov 48   ;;  %s5049_s0 = smov 16  }
  0x11   :  { %s6155_s29 = sld [smem:[#allocation9_spill]] }
  0x12   :  { %4434 = vmatpush3.bf16.msra.mxu0 %v4431_v6  ;;  %4436 = vmatprep.subr.bf16.mxu1 %v4435_v29 }
  0x13   :  { %4438 = vmatpush3.bf16.msra.mxu1 %v4435_v29 }
  0x14   :  { %4440 = vmatprep.subr.bf16.mxu1 %v4439_v31 }
  0x15   :  { %4111 = vmatmul.mubr.msk.f32.vlgmr.msra.gmra.mrb[0].mxu0 %vm85_vm0, %v78_v7  ;;  %v5239_v4 = vld [vmem:[%s6154_s5] sm:$0xff]  ;;  %v5244_v5 = vld [vmem:[%s6154_s5 + $0x8] sm:$0xff]  ;;  %s6156_s5 = sld [smem:[#allocation11_spill]] }
  0x16   :  { %vm65_vm7 = vcmp.gt.f32.partialorder %v5239_v4, 0.5  ;;  %vm66_vm8 = vcmp.gt.f32.partialorder %v5244_v5, 0.5 }
  0x17   :  { %4442 = vmatpush3.bf16.msra.mxu1 %v4439_v31 }
  0xe8   :  { %v4112_v9 = vpop.f32.mrb[0].mxu0 }
  0xe9   :  { %v158_v11 = vpop.f32.mrb[1].mxu0  ;;  %v5186_v13 = vadd.f32 %v4112_v9, %v84_v10 }
  0xea   :  { %v5184_v12 = vadd.f32 %v158_v11, %v83_v8 }
  0xeb   :  { %v172_v15 = vsel %vm85_vm0, %v5186_v13, 0.0 }
  0xec   :  { %v169_v14 = vsel %vm85_vm0, %v5184_v12, 0.0 }
  0xed   :  { %170 = vadd.xlane.f32.xlu0 %v169_v14 }
  0xf1   :  { %173 = vadd.xlane.f32.xlu0 %v172_v15 }
 0x17a   :  { %v171_v16 = vpop.xlane.xlu0 %170 }
 0x17b   :  { %v176_v17 = vmul.f32 0.03125, %v171_v16 }
 0x17d   :  { %v178_v18 = vsub.f32 %v5184_v12, %v176_v17 }
 0x17e   :  { %v174_v19 = vpop.xlane.xlu0 %173 }
 0x17f   :  { %v177_v20 = vmul.f32 0.03125, %v174_v19  ;;  %v180_v21 = vmul.f32 %v178_v18, %v178_v18  ;;  %v195_v49 = vmul.f32 %v3762_v48, %v178_v18 }
 0x181   :  { %v179_v22 = vsub.f32 %v5186_v13, %v177_v20  ;;  %v182_v23 = vsel %vm85_vm0, %v180_v21, 0.0 }
 0x182   :  { %183 = vadd.xlane.f32.xlu1 %v182_v23 }
 0x183   :  { %v181_v24 = vmul.f32 %v179_v22, %v179_v22  ;;  %v196_v53 = vmul.f32 %v3762_v48, %v179_v22 }
 0x185   :  { %v185_v25 = vsel %vm85_vm0, %v181_v24, 0.0 }
 0x186   :  { %186 = vadd.xlane.f32.xlu1 %v185_v25 }
 0x20f   :  { %v184_v32 = vpop.xlane.xlu1 %183 }
 0x210   :  { %v189_v33 = vmul.f32 0.032258064, %v184_v32 }
 0x212   :  { %4872 = vrsqrt.f32 %v189_v33  ;;  %vm199_vm1 = vcmp.eq.f32.partialorder %v189_v33, inf  ;;  %v202_v38 = vand.u32 2147483648, %v189_v33  ;;  %vm201_vm2 = vcmp.eq.f32.partialorder %v189_v33, 0.0 }
 0x213   :  { %v187_v34 = vpop.xlane.xlu1 %186 }
 0x214   :  { %v190_v35 = vmul.f32 0.032258064, %v187_v34 }
 0x216   :  { %4874 = vrsqrt.f32 %v190_v35  ;;  %vm206_vm3 = vcmp.eq.f32.partialorder %v190_v35, inf  ;;  %v209_v44 = vand.u32 2147483648, %v190_v35  ;;  %vm208_vm4 = vcmp.eq.f32.partialorder %v190_v35, 0.0 }
 0x21c   :  { %v4873_v36 = vpop.eup %4872 }
 0x21d   :  { %v198_v37 = vmul.f32 %v4873_v36, %v189_v33 }
 0x21f   :  { %v200_v39 = vsel %vm199_vm1, %v189_v33, %v198_v37 }
 0x220   :  { %v4875_v40 = vpop.eup %4874  ;;  %v203_v41 = vsel %vm201_vm2, %v202_v38, %v200_v39 }
 0x221   :  { %v205_v42 = vmul.f32 %v4875_v40, %v190_v35  ;;  %v211_v43 = vadd.f32 1e-06, %v203_v41 }
 0x223   :  { %v207_v45 = vsel %vm206_vm3, %v190_v35, %v205_v42  ;;  %4876 = vrcp.f32 %v211_v43 }
 0x224   :  { %v210_v46 = vsel %vm208_vm4, %v209_v44, %v207_v45  ;;  %vm1665_vm4 = vcmask 1040384  }
 0x225   :  { %v212_v47 = vadd.f32 1e-06, %v210_v46 }
 0x227   :  { %4878 = vrcp.f32 %v212_v47 }
 0x22d   :  { %v4877_v50 = vpop.eup %4876 }
 0x22e   :  { %v214_v52 = vmul.f32 %v4877_v50, %v195_v49 }
 0x230   :  { %v221_v54 = vadd.f32 %v3763_v51, %v214_v52 }
 0x231   :  { %v4879_v55 = vpop.eup %4878 }
 0x232   :  { %v216_v56 = vmul.f32 %v4879_v55, %v196_v53  ;;  %4121 = vmatprep.mubr.msk.f32.mxu1 %vm85_vm0, %v221_v54 }
 0x234   :  { %v222_v57 = vadd.f32 %v3763_v51, %v216_v56 }
 0x236   :  { %4122 = vmatmul.mubr.msk.f32.vlgmr.msra.gmra.mrb[0].mxu1 %vm85_vm0, %v222_v57 }
 0x309   :  { %v4123_v58 = vpop.f32.mrb[0].mxu1 }
 0x30a   :  { %v299_v59 = vpop.f32.mrb[1].mxu1  ;;  %v309_v62 = vmul.f32 0.25, %v4123_v58 }
 0x30b   :  { %v5216_v60 = vpack.i.bf16 %v4123_v58, %v299_v59  ;;  %v308_v61 = vmul.f32 0.25, %v299_v59 }
 0x30d   :  { %4770 = vrot.lane.b32.xlu0 %v5216_v60, %s5044_s27  ;;  %4128 = vmatprep.mubr.msk.f32.mxu0 %vm316_vm5, %v308_v61 }
 0x311   :  { %4780 = vrot.lane.b32.xlu0 %v5216_v60, %s5045_s28 }
 0x315   :  { %513 = vrot.lane.b32.xlu0 %v308_v61, %s5046_s6 }
 0x319   :  { %515 = vrot.lane.b32.xlu0 %v309_v62, %s5046_s6 }
 0x37f   :  { %v4771_v63 = vpop.permute.xlu0 %4770 }
 0x380   :  { %v4773_v0 = vunpack.i.h.bf16 %v4771_v63  ;;  %v4772_v1 = vunpack.i.l.bf16 %v4771_v63 }
 0x382   :  { %v4443_v3 = vpack.c.bf16 %v4773_v0, %v4772_v1 }
 0x383   :  { %v4781_v26 = vpop.permute.xlu0 %4780 }
 0x384   :  { %4445 = vmatprep.subr.msk.bf16.mxu0 %vm5227_vm6, %v4443_v3  ;;  %v4783_v28 = vunpack.i.h.bf16 %v4781_v26  ;;  %v4782_v29 = vunpack.i.l.bf16 %v4781_v26 }
 0x385   :  { %4448 = vmatpush3.bf16.xpose.msk.msra.mxu0 %vm5227_vm6, %v4443_v3 }
 0x386   :  { %v4453_v33 = vpack.c.bf16 %v4783_v28, %v4782_v29 }
 0x387   :  { %v514_v38 = vpop.permute.xlu0 %513 }
 0x38b   :  { %v516_v39 = vpop.permute.xlu0 %515 }
 0x38c   :  { %4129 = vmatmul.mubr.msk.f32.vlgmr.msra.gmra.mrb[2].mxu0 %vm316_vm5, %v309_v62 }
 0x45f   :  { %v4130_v6 = vpop.f32.mrb[2].mxu0 }
 0x460   :  { %v393_v7 = vpop.f32.mrb[3].mxu0  ;;  %v403_v10 = vsel %vm66_vm8, -1e+18, %v4130_v6 }
 0x461   :  { %v402_v8 = vsel %vm65_vm7, -1e+18, %v393_v7  ;;  %v407_v11 = vsel %vm316_vm5, %v403_v10, -inf  ;;  %v725_v7 = vld [vmem:[%s6133_s10] sm:$0xff] }
 0x462   :  { %v404_v9 = vsel %vm316_vm5, %v402_v8, -inf }
 0x463   :  { %405 = vmax.xlane.f32.xlu1 %v404_v9  ;;  %v727_v9 = vld [vmem:[%s6133_s10 + $0x10] sm:$0xff] }
 0x467   :  { %408 = vmax.xlane.f32.xlu1 %v407_v11  ;;  %v728_v11 = vld [vmem:[%s6133_s10 + $0x18] sm:$0xff] }
 0x4f0   :  { %v406_v14 = vpop.xlane.xlu1 %405 }
 0x4f1   :  { %v410_v15 = vsub.f32 %v402_v8, %v406_v14  ;;  %v726_v8 = vld [vmem:[%s6133_s10 + $0x8] sm:$0xff]  ;;  %v4467_v14 = vpack.c.bf16 %v728_v11, %v727_v9  ;;  %v3781_v11 = vld [vmem:[%s6131_s8 + $0x1] ss:$0 sm:$0xff] }
 0x4f3   :  { %v412_v18 = vmul.f32 1.442695, %v410_v15 }
 0x4f4   :  { %v409_v16 = vpop.xlane.xlu1 %408 }
 0x4f5   :  { %v411_v17 = vsub.f32 %v403_v10, %v409_v16  ;;  %v4463_v10 = vpack.c.bf16 %v726_v8, %v725_v7 }
 0x4f7   :  { %v414_v19 = vmul.f32 1.442695, %v411_v17 }
 0x4f9   :  { %4880 = vpow2.f32 %v414_v19 }
 0x4fa   :  { %4882 = vpow2.f32 %v412_v18 }
 0x503   :  { %v4881_v20 = vpop.eup %4880 }
 0x504   :  { %v419_v21 = vsel %vm316_vm5, %v4881_v20, 0.0  ;;  %v4883_v22 = vpop.eup %4882 }
 0x505   :  { %420 = vadd.xlane.f32.xlu1 %v419_v21  ;;  %v416_v23 = vsel %vm316_vm5, %v4883_v22, 0.0 }
 0x509   :  { %417 = vadd.xlane.f32.xlu1 %v416_v23 }
 0x51a   :  { %4775 = vrot.lane.b32.xlu1 %v5216_v60, %s5047_s21 }
 0x592   :  { %v421_v24 = vpop.xlane.xlu1 %420 }
 0x593   :  { %4884 = vrcp.f32 %v421_v24 }
 0x596   :  { %v418_v25 = vpop.xlane.xlu1 %417 }
 0x597   :  { %4886 = vrcp.f32 %v418_v25 }
 0x59a   :  { %v4776_v27 = vpop.permute.xlu1 %4775 }
 0x59b   :  { %v4778_v30 = vunpack.i.h.bf16 %v4776_v27  ;;  %v4777_v31 = vunpack.i.l.bf16 %v4776_v27 }
 0x59d   :  { %v4449_v32 = vpack.c.bf16 %v4778_v30, %v4777_v31  ;;  %v4885_v34 = vpop.eup %4884 }
 0x59e   :  { %v425_v37 = vmul.f32 %v4885_v34, %v4881_v20 }
 0x59f   :  { %4450 = vmatprep.subr.bf16.mxu1 %v4449_v32 }
 0x5a0   :  { %4452 = vmatpush3.bf16.msra.mxu1 %v4449_v32 }
 0x5a1   :  { %v4887_v35 = vpop.eup %4886  ;;  %4455 = vmatprep.subr.msk.bf16.mxu1 %vm5227_vm6, %v4453_v33 }
 0x5a2   :  { %v424_v36 = vmul.f32 %v4887_v35, %v4883_v22  ;;  %v953_v35 = vld [vmem:[%s6135_s12] sm:$0xff] }
 0x5a4   :  { %4135 = vmatprep.mubr.msk.f32.mxu1 %vm316_vm5, %v424_v36  ;;  %v954_v36 = vld [vmem:[%s6135_s12 + $0x8] sm:$0xff] }
 0x5a5   :  { %4136 = vmatmul.mubr.msk.f32.vlgmr.msra.gmra.mrb[2].mxu1 %vm316_vm5, %v425_v37  ;;  %v4479_v37 = vpack.c.bf16 %v954_v36, %v953_v35 }
 0x5a6   :  { %4142 = vmatprep.mubr.msk.f32.mxu1 %vm316_vm5, %v514_v38  ;;  %v955_v38 = vld [vmem:[%s6135_s12 + $0x10] sm:$0xff] }
 0x5a9   :  { %4458 = vmatpush3.bf16.xpose.msk.msra.mxu1 %vm5227_vm6, %v4453_v33 }
 0x5b0   :  { %4143 = vmatmul.mubr.msk.f32.vlgmr.msra.gmra.mrb[4].mxu1 %vm316_vm5, %v516_v39  ;;  %v956_v39 = vld [vmem:[%s6135_s12 + $0x18] sm:$0xff] }
 0x678   :  { %v4137_v40 = vpop.f32.mrb[2].mxu1 }
 0x679   :  { %v504_v41 = vpop.f32.mrb[3].mxu1 }
 0x683   :  { %v4144_v42 = vpop.f32.mrb[4].mxu1 }
 0x684   :  { %v605_v43 = vsel %vm66_vm8, -1e+18, %v4144_v42  ;;  %v595_v44 = vpop.f32.mrb[5].mxu1  ;;  %v74_v42 = vld [vmem:[%s6155_s29 + $0x8] sm:$0xff] }
 0x685   :  { %v604_v45 = vsel %vm65_vm7, -1e+18, %v595_v44  ;;  %v609_v46 = vsel %vm316_vm5, %v605_v43, -inf  ;;  %v76_v44 = vld [vmem:[%s6155_s29 + $0x18] sm:$0xff] }
 0x686   :  { %610 = vmax.xlane.f32.xlu0 %v609_v46  ;;  %v606_v47 = vsel %vm316_vm5, %v604_v45, -inf  ;;  %v867_v46 = vld [vmem:[%s6134_s11 + $0x8] sm:$0xff] }
 0x687   :  { %607 = vmax.xlane.f32.xlu1 %v606_v47  ;;  %v868_v47 = vld [vmem:[%s6134_s11 + $0x10] sm:$0xff] }
 0x698   :  { %4785 = vrot.lane.b32.xlu1 %v5216_v60, %s5048_s1 }
 0x713   :  { %v611_v48 = vpop.xlane.xlu0 %610 }
 0x714   :  { %v613_v49 = vsub.f32 %v605_v43, %v611_v48  ;;  %v608_v50 = vpop.xlane.xlu1 %607  ;;  %v75_v43 = vld [vmem:[%s6155_s29 + $0x10] sm:$0xff]  ;;  %v869_v48 = vld [vmem:[%s6134_s11 + $0x18] sm:$0xff] }
 0x715   :  { %v612_v51 = vsub.f32 %v604_v45, %v608_v50  ;;  %v866_v45 = vld [vmem:[%s6134_s11] sm:$0xff]  ;;  %v4475_v50 = vpack.c.bf16 %v869_v48, %v868_v47 }
 0x716   :  { %v616_v52 = vmul.f32 1.442695, %v613_v49  ;;  %v4471_v49 = vpack.c.bf16 %v867_v46, %v866_v45 }
 0x717   :  { %v614_v53 = vmul.f32 1.442695, %v612_v51 }
 0x718   :  { %v4786_v54 = vpop.permute.xlu1 %4785  ;;  %4472 = vmatprep.subr.bf16.mxu1 %v4471_v49 }
 0x719   :  { %4888 = vpow2.f32 %v614_v53  ;;  %v4788_v55 = vunpack.i.h.bf16 %v4786_v54  ;;  %v4787_v56 = vunpack.i.l.bf16 %v4786_v54  ;;  %4474 = vmatpush3.bf16.msra.mxu1 %v4471_v49 }
 0x71a   :  { %4890 = vpow2.f32 %v616_v52  ;;  %4476 = vmatprep.subr.bf16.mxu1 %v4475_v50 }
 0x71b   :  { %v4459_v57 = vpack.c.bf16 %v4788_v55, %v4787_v56 }
 0x71d   :  { %4460 = vmatprep.subr.bf16.mxu0 %v4459_v57  ;;  %4478 = vmatpush3.bf16.msra.mxu1 %v4475_v50 }
 0x71e   :  { %4462 = vmatpush3.bf16.msra.mxu0 %v4459_v57 }
 0x71f   :  { %4464 = vmatprep.subr.bf16.mxu0 %v4463_v10 }
 0x723   :  { %v4889_v58 = vpop.eup %4888 }
 0x724   :  { %v618_v59 = vsel %vm316_vm5, %v4889_v58, 0.0  ;;  %v4891_v61 = vpop.eup %4890 }
 0x725   :  { %619 = vadd.xlane.f32.xlu0 %v618_v59  ;;  %v621_v60 = vsel %vm316_vm5, %v4891_v61, 0.0 }
 0x729   :  { %622 = vadd.xlane.f32.xlu0 %v621_v60 }
 0x7b2   :  { %v620_v62 = vpop.xlane.xlu0 %619 }
 0x7b3   :  { %4892 = vrcp.f32 %v620_v62 }
 0x7b6   :  { %v623_v63 = vpop.xlane.xlu0 %622 }
 0x7b7   :  { %4894 = vrcp.f32 %v623_v63 }
 0x7bd   :  { %v4893_v0 = vpop.eup %4892 }
 0x7be   :  { %v626_v1 = vmul.f32 %v4893_v0, %v4889_v58 }
 0x7c0   :  { %4149 = vmatprep.mubr.msk.f32.mxu0 %vm316_vm5, %v626_v1 }
 0x7c1   :  { %v4895_v3 = vpop.eup %4894 }
 0x7c2   :  { %v627_v6 = vmul.f32 %v4895_v3, %v4891_v61 }
 0x7c4   :  { %4150 = vmatmul.mubr.msk.f32.vlgmr.msra.gmra.mrb[4].mxu0 %vm316_vm5, %v627_v6  ;;  %v3780_v6 = vld [vmem:[%s6130_s7 + $0x1] ss:$0 sm:$0xff] }
 0x7c5   :  { %4466 = vmatpush3.bf16.msra.mxu0 %v4463_v10 }
 0x7c6   :  { %4468 = vmatprep.subr.bf16.mxu0 %v4467_v14 }
 0x7c9   :  { %4470 = vmatpush3.bf16.msra.mxu0 %v4467_v14 }
 0x7ca   :  { %4480 = vmatprep.subr.bf16.mxu0 %v4479_v37 }
 0x897   :  { %v4151_v15 = vpop.f32.mrb[4].mxu0 }
 0x898   :  { %719 = vrot.lane.b32.xlu1 %v4151_v15, %s5049_s0  ;;  %v706_v16 = vpop.f32.mrb[5].mxu0 }
 0x899   :  { %717 = vrot.lane.b32.xlu0 %v706_v16, %s5049_s0 }
 0x90a   :  { %v720_v17 = vpop.permute.xlu1 %719 }
 0x90b   :  { %v718_v18 = vpop.permute.xlu0 %717  ;;  %v724_v20 = vsel %vm316_vm5, %v4137_v40, %v720_v17  ;;  %v4483_v40 = vpack.c.bf16 %v956_v39, %v955_v38 }
 0x90c   :  { %v723_v19 = vsel %vm316_vm5, %v504_v41, %v718_v18  ;;  %v73_v41 = vld [vmem:[%s6155_s29] sm:$0xff] }
 0x90d   :  { %4160 = vmatprep.mubr.msk.f32.mxu0 %vm85_vm0, %v723_v19 }
 0x90e   :  { %4161 = vmatmul.mubr.msk.f32.vlgmr.msra.gmra.mrb[6].mxu0 %vm85_vm0, %v724_v20 }
 0x90f   :  { %4482 = vmatpush3.bf16.msra.mxu0 %v4479_v37  ;;  %4182 = vmatprep.mubr.msk.f32.mxu0 %vm85_vm0, %v73_v41 }
 0x910   :  { %4484 = vmatprep.subr.bf16.mxu0 %v4483_v40 }
 0x913   :  { %4486 = vmatpush3.bf16.msra.mxu0 %v4483_v40 }
 0x916   :  { %4183 = vmatmul.mubr.msk.f32.vlgmr.msra.gmra.mrb[8].mxu0 %vm85_vm0, %v74_v42  ;;  %v5391_v42 = vld [vmem:[%s6156_s5 + $0x8] sm:$0xff] }
 0x917   :  { %4185 = vmatprep.mubr.msk.f32.mxu0 %vm85_vm0, %v75_v43  ;;  %v5396_v43 = vld [vmem:[%s6156_s5] sm:$0xff]  ;;  %vm70_vm13 = vcmp.gt.f32.partialorder %v5391_v42, 0.5  ;;  %s5052_s5 = smov 32  }
 0x918   :  { %vm69_vm14 = vcmp.gt.f32.partialorder %v5396_v43, 0.5 }
 0x91a   :  { %4186 = vmatmul.mubr.msk.f32.gmra.mrb[10].mxu0 %vm85_vm0, %v76_v44 }
 0x9e1   :  { %v4162_v21 = vpop.f32.mrb[6].mxu0 }
 0x9e2   :  { %v5297_v22 = vadd.f32 %v4162_v21, %v5186_v13  ;;  %v801_v23 = vpop.f32.mrb[7].mxu0 }
 0x9e3   :  { %v5300_v24 = vadd.f32 %v801_v23, %v5184_v12 }
 0x9e4   :  { %v817_v25 = vsel %vm85_vm0, %v5297_v22, 0.0 }
 0x9e5   :  { %818 = vadd.xlane.f32.xlu0 %v817_v25  ;;  %v814_v26 = vsel %vm85_vm0, %v5300_v24, 0.0 }
 0x9e6   :  { %815 = vadd.xlane.f32.xlu1 %v814_v26 }
 0x9e9   :  { %v4184_v18 = vpop.f32.mrb[8].mxu0 }
 0x9ea   :  { %v1035_v19 = vpop.f32.mrb[9].mxu0 }
 0x9eb   :  { %v4487_v20 = vpack.c.bf16 %v4184_v18, %v1035_v19  ;;  %v5358_v21 = vpack.i.bf16 %v4184_v18, %v1035_v19 }
 0x9ed   :  { %4489 = vmatprep.subr.msk.bf16.mxu1 %vm5227_vm6, %v4487_v20  ;;  %v4187_v23 = vpop.f32.mrb[10].mxu0 }
 0x9ee   :  { %v1045_v25 = vpop.f32.mrb[11].mxu0 }
 0x9ef   :  { %v4493_v26 = vpack.c.bf16 %v4187_v23, %v1045_v25 }
 0xa72   :  { %v819_v27 = vpop.xlane.xlu0 %818 }
 0xa73   :  { %v821_v28 = vmul.f32 0.03125, %v819_v27  ;;  %v816_v29 = vpop.xlane.xlu1 %815  ;;  %v5366_v27 = vpack.i.bf16 %v4187_v23, %v1045_v25 }
 0xa74   :  { %v820_v30 = vmul.f32 0.03125, %v816_v29 }
 0xa75   :  { %v823_v31 = vsub.f32 %v5297_v22, %v821_v28 }
 0xa76   :  { %v822_v13 = vsub.f32 %v5300_v24, %v820_v30 }
 0xa77   :  { %v825_v32 = vmul.f32 %v823_v31, %v823_v31  ;;  %v839_v7 = vmul.f32 %v3780_v6, %v823_v31 }
 0xa78   :  { %v824_v33 = vmul.f32 %v822_v13, %v822_v13  ;;  %v838_v9 = vmul.f32 %v3780_v6, %v822_v13 }
 0xa79   :  { %v829_v12 = vsel %vm85_vm0, %v825_v32, 0.0 }
 0xa7a   :  { %830 = vadd.xlane.f32.xlu1 %v829_v12  ;;  %v826_v34 = vsel %vm85_vm0, %v824_v33, 0.0 }
 0xa7b   :  { %827 = vadd.xlane.f32.xlu0 %v826_v34 }
 0xa8b   :  { %4795 = vrot.lane.b32.xlu1 %v5366_v27, %s5046_s6 }
 0xa91   :  { %4790 = vrot.lane.b32.xlu0 %v5358_v21, %s5046_s6 }
 0xb07   :  { %v831_v51 = vpop.xlane.xlu1 %830 }
 0xb08   :  { %v833_v52 = vmul.f32 0.032258064, %v831_v51  ;;  %v828_v53 = vpop.xlane.xlu0 %827 }
 0xb09   :  { %v832_v54 = vmul.f32 0.032258064, %v828_v53 }
 0xb0a   :  { %4896 = vrsqrt.f32 %v833_v52  ;;  %vm849_vm9 = vcmp.eq.f32.partialorder %v833_v52, inf  ;;  %v852_v58 = vand.u32 2147483648, %v833_v52  ;;  %vm851_vm10 = vcmp.eq.f32.partialorder %v833_v52, 0.0 }
 0xb0b   :  { %4898 = vrsqrt.f32 %v832_v54  ;;  %vm842_vm11 = vcmp.eq.f32.partialorder %v832_v54, inf  ;;  %v845_v60 = vand.u32 2147483648, %v832_v54  ;;  %vm844_vm12 = vcmp.eq.f32.partialorder %v832_v54, 0.0  ;;  %v4796_v13 = vpop.permute.xlu1 %4795 }
 0xb0c   :  { %v4791_v28 = vpop.permute.xlu0 %4790  ;;  %v4798_v32 = vunpack.i.h.bf16 %v4796_v13  ;;  %v4797_v33 = vunpack.i.l.bf16 %v4796_v13 }
 0xb0d   :  { %v4793_v29 = vunpack.i.h.bf16 %v4791_v28  ;;  %v4792_v30 = vunpack.i.l.bf16 %v4791_v28 }
 0xb0e   :  { %v4513_v37 = vpack.c.bf16 %v4798_v32, %v4797_v33 }
 0xb0f   :  { %v4507_v31 = vpack.c.bf16 %v4793_v29, %v4792_v30 }
 0xb14   :  { %v4897_v55 = vpop.eup %4896 }
 0xb15   :  { %v4899_v56 = vpop.eup %4898  ;;  %v848_v57 = vmul.f32 %v4897_v55, %v833_v52 }
 0xb16   :  { %v841_v59 = vmul.f32 %v4899_v56, %v832_v54 }
 0xb17   :  { %v850_v61 = vsel %vm849_vm9, %v833_v52, %v848_v57  ;;  %vm1646_vm9 = vcmask 1041408  }
 0xb18   :  { %v853_v62 = vsel %vm851_vm10, %v852_v58, %v850_v61  ;;  %v843_v63 = vsel %vm842_vm11, %v832_v54, %v841_v59  ;;  %vm1698_vm10 = vcmask 523264   ;;  %vm1705_vm11 = vcmask 785408  }
 0xb19   :  { %v855_v0 = vadd.f32 1e-06, %v853_v62  ;;  %v846_v1 = vsel %vm844_vm12, %v845_v60, %v843_v63 }
 0xb1a   :  { %v854_v3 = vadd.f32 1e-06, %v846_v1 }
 0xb1b   :  { %4900 = vrcp.f32 %v855_v0 }
 0xb1c   :  { %4902 = vrcp.f32 %v854_v3 }
 0xb25   :  { %v4901_v8 = vpop.eup %4900 }
 0xb26   :  { %v4903_v10 = vpop.eup %4902  ;;  %v859_v14 = vmul.f32 %v4901_v8, %v839_v7 }
 0xb27   :  { %v857_v15 = vmul.f32 %v4903_v10, %v838_v9 }
 0xb28   :  { %v865_v17 = vadd.f32 %v3781_v11, %v859_v14 }
 0xb29   :  { %v864_v16 = vadd.f32 %v3781_v11, %v857_v15 }
 0xb2b   :  { %4171 = vmatprep.mubr.msk.f32.mxu1 %vm85_vm0, %v864_v16 }
 0xb2c   :  { %4172 = vmatmul.mubr.msk.f32.vlgmr.msra.gmra.mrb[6].mxu1 %vm85_vm0, %v865_v17 }
 0xb2d   :  { %4492 = vmatpush3.bf16.xpose.msk.msra.mxu1 %vm5227_vm6, %v4487_v20 }
 0xb2e   :  { %4495 = vmatprep.subr.msk.bf16.mxu1 %vm5227_vm6, %v4493_v26 }
 0xb35   :  { %4498 = vmatpush3.bf16.xpose.msk.msra.mxu1 %vm5227_vm6, %v4493_v26 }
 0xb36   :  { %4509 = vmatprep.subr.msk.bf16.mxu1 %vm5227_vm6, %v4507_v31 }
 0xbff   :  { %v4173_v12 = vpop.f32.mrb[6].mxu1 }
 0xc00   :  { %v942_v34 = vpop.f32.mrb[7].mxu1  ;;  %v952_v36 = vmul.f32 0.25, %v4173_v12 }
 0xc01   :  { %v951_v35 = vmul.f32 0.25, %v942_v34 }
 0xc03   :  { %1264 = vrot.lane.b32.xlu1 %v951_v35, %s5046_s6  ;;  %4196 = vmatprep.mubr.msk.f32.mxu1 %vm316_vm5, %v951_v35 }
 0xc04   :  { %4197 = vmatmul.mubr.msk.f32.vlgmr.msra.gmra.mrb[8].mxu1 %vm316_vm5, %v952_v36 }
 0xc05   :  { %4512 = vmatpush3.bf16.xpose.msk.msra.mxu1 %vm5227_vm6, %v4507_v31 }
 0xc06   :  { %4515 = vmatprep.subr.msk.bf16.mxu1 %vm5227_vm6, %v4513_v37 }
 0xc07   :  { %1266 = vrot.lane.b32.xlu1 %v952_v36, %s5046_s6 }
 0xc0d   :  { %4518 = vmatpush3.bf16.xpose.msk.msra.mxu1 %vm5227_vm6, %v4513_v37 }
 0xc75   :  { %v1265_v38 = vpop.permute.xlu1 %1264 }
 0xc76   :  { %4218 = vmatprep.mubr.msk.f32.mxu1 %vm316_vm5, %v1265_v38 }
 0xc79   :  { %v1267_v39 = vpop.permute.xlu1 %1266 }
 0xc7a   :  { %4219 = vmatmul.mubr.msk.f32.vlgmr.msra.gmra.mrb[10].mxu1 %vm316_vm5, %v1267_v39 }
 0xcd7   :  { %v4198_v40 = vpop.f32.mrb[8].mxu1 }
 0xcd8   :  { %v1138_v41 = vpop.f32.mrb[9].mxu1  ;;  %v1148_v52 = vsel %vm70_vm13, -1e+18, %v4198_v40 }
 0xcd9   :  { %v1147_v50 = vsel %vm69_vm14, -1e+18, %v1138_v41  ;;  %v1152_v53 = vsel %vm85_vm0, %v1148_v52, -inf }
 0xcda   :  { %v1149_v51 = vsel %vm85_vm0, %v1147_v50, -inf }
 0xd4d   :  { %v4220_v44 = vpop.f32.mrb[10].mxu1 }
 0xd4e   :  { %v1364_v45 = vsel %vm70_vm13, -1e+18, %v4220_v44  ;;  %v1354_v46 = vpop.f32.mrb[11].mxu1 }
 0xd4f   :  { %v1363_v47 = vsel %vm69_vm14, -1e+18, %v1354_v46  ;;  %v1368_v48 = vsel %vm85_vm0, %v1364_v45, -inf  ;;  %v1491_v46 = vld [vmem:[%s6136_s13 + $0x8] sm:$0xff] }
 0xd50   :  { %1369 = vmax.xlane.f32.xlu1 %v1368_v48  ;;  %v1365_v49 = vsel %vm85_vm0, %v1363_v47, -inf  ;;  %v1492_v48 = vld [vmem:[%s6136_s13 + $0x10] sm:$0xff] }
 0xd51   :  { %1366 = vmax.xlane.f32.xlu0 %v1365_v49  ;;  %v1493_v49 = vld [vmem:[%s6136_s13 + $0x18] sm:$0xff] }
 0xd55   :  { %1150 = vmax.xlane.f32.xlu0 %v1149_v51 }
 0xd59   :  { %1153 = vmax.xlane.f32.xlu0 %v1152_v53 }
 0xddd   :  { %v1370_v54 = vpop.xlane.xlu1 %1369 }
 0xdde   :  { %v1372_v55 = vsub.f32 %v1364_v45, %v1370_v54  ;;  %v1367_v56 = vpop.xlane.xlu0 %1366  ;;  %v1490_v45 = vld [vmem:[%s6136_s13] sm:$0xff] }
 0xddf   :  { %v1371_v57 = vsub.f32 %v1363_v47, %v1367_v56  ;;  %v4527_v47 = vpack.c.bf16 %v1491_v46, %v1490_v45  ;;  %v1638_v45 = vld [vmem:[%s6137_s14 + $0x38] sm:$0xff] }
 0xde0   :  { %v1375_v58 = vmul.f32 1.442695, %v1372_v55 }
 0xde1   :  { %v1373_v59 = vmul.f32 1.442695, %v1371_v57 }
 0xde2   :  { %4904 = vpow2.f32 %v1375_v58  ;;  %v1151_v0 = vpop.xlane.xlu0 %1150 }
 0xde3   :  { %4906 = vpow2.f32 %v1373_v59  ;;  %v1155_v3 = vsub.f32 %v1147_v50, %v1151_v0  ;;  %v4531_v50 = vpack.c.bf16 %v1493_v49, %v1492_v48  ;;  %v3806_v48 = vld [vmem:[%s6130_s7 + $0x2] ss:$0 sm:$0xff] }
 0xde4   :  { %v1639_v49 = vld [vmem:[%s6137_s14 + $0x40] sm:$0xff] }
 0xde5   :  { %v1157_v7 = vmul.f32 1.442695, %v1155_v3  ;;  %v5050_v3 = vmov 0  }
 0xde6   :  { %v1154_v1 = vpop.xlane.xlu0 %1153  ;;  %4820 = vset.pattern.permute.xlu1 %v5050_v3  ;;  %4819 = vset.pattern.permute.xlu0 %v5050_v3 }
 0xde7   :  { %v1156_v6 = vsub.f32 %v1148_v52, %v1154_v1  ;;  %4908 = vpow2.f32 %v1157_v7  ;;  %v72_v1 = vld [vmem:[%s6127_s4 + $0x8] sm:$0xff] }
 0xde9   :  { %v1159_v8 = vmul.f32 1.442695, %v1156_v6 }
 0xdeb   :  { %4910 = vpow2.f32 %v1159_v8 }
 0xdec   :  { %v4905_v61 = vpop.eup %4904 }
 0xded   :  { %v4907_v60 = vpop.eup %4906  ;;  %v1380_v62 = vsel %vm85_vm0, %v4905_v61, 0.0 }
 0xdee   :  { %1381 = vadd.xlane.f32.xlu1 %v1380_v62  ;;  %v1377_v63 = vsel %vm85_vm0, %v4907_v60, 0.0 }
 0xdef   :  { %1378 = vadd.xlane.f32.xlu0 %v1377_v63 }
 0xdf1   :  { %v4909_v9 = vpop.eup %4908 }
 0xdf2   :  { %v1161_v11 = vsel %vm85_vm0, %v4909_v9, 0.0 }
 0xdf5   :  { %v4911_v10 = vpop.eup %4910 }
 0xdf6   :  { %v1164_v14 = vsel %vm85_vm0, %v4911_v10, 0.0 }
 0xdff   :  { %4805 = vrot.lane.b32.xlu1 %v5366_v27, %s5045_s28 }
 0xe05   :  { %4800 = vrot.lane.b32.xlu0 %v5358_v21, %s5045_s28 }
 0xe23   :  { %1162 = vadd.xlane.f32.xlu1 %v1161_v11 }
 0xe24   :  { %1165 = vadd.xlane.f32.xlu0 %v1164_v14 }
 0xe34   :  { %4815 = vrot.lane.b32.xlu1 %v5366_v27, %s5044_s27 }
 0xe3a   :  { %4810 = vrot.lane.b32.xlu0 %v5358_v21, %s5044_s27 }
 0xe7b   :  { %v1382_v15 = vpop.xlane.xlu1 %1381 }
 0xe7c   :  { %v1379_v16 = vpop.xlane.xlu0 %1378 }
 0xe7d   :  { %4912 = vrcp.f32 %v1379_v16 }
 0xe7e   :  { %4914 = vrcp.f32 %v1382_v15 }
 0xe7f   :  { %v4806_v17 = vpop.permute.xlu1 %4805 }
 0xe80   :  { %v4801_v18 = vpop.permute.xlu0 %4800  ;;  %v4808_v19 = vunpack.i.h.bf16 %v4806_v17  ;;  %v4807_v20 = vunpack.i.l.bf16 %v4806_v17 }
 0xe81   :  { %v4803_v23 = vunpack.i.h.bf16 %v4801_v18  ;;  %v4802_v25 = vunpack.i.l.bf16 %v4801_v18  ;;  %v1631_v18 = vld [vmem:[%s6137_s14] sm:$0xff] }
 0xe82   :  { %v4523_v28 = vpack.c.bf16 %v4808_v19, %v4807_v20  ;;  %v1632_v19 = vld [vmem:[%s6137_s14 + $0x8] sm:$0xff]  ;;  %v1633_v20 = vld [vmem:[%s6137_s14 + $0x10] sm:$0xff] }
 0xe83   :  { %v4519_v26 = vpack.c.bf16 %v4803_v23, %v4802_v25  ;;  %v4535_v23 = vpack.c.bf16 %v1632_v19, %v1631_v18  ;;  %v1634_v25 = vld [vmem:[%s6137_s14 + $0x18] sm:$0xff] }
 0xe85   :  { %4520 = vmatprep.subr.bf16.mxu1 %v4519_v26 }
 0xe86   :  { %4522 = vmatpush3.bf16.msra.mxu1 %v4519_v26  ;;  %v4539_v26 = vpack.c.bf16 %v1634_v25, %v1633_v20 }
 0xe87   :  { %v4913_v29 = vpop.eup %4912  ;;  %4524 = vmatprep.subr.bf16.mxu1 %v4523_v28 }
 0xe88   :  { %v4915_v27 = vpop.eup %4914  ;;  %v1385_v30 = vmul.f32 %v4913_v29, %v4907_v60  ;;  %v1636_v29 = vld [vmem:[%s6137_s14 + $0x28] sm:$0xff] }
 0xe89   :  { %v1386_v21 = vmul.f32 %v4915_v27, %v4905_v61 }
 0xe8a   :  { %4526 = vmatpush3.bf16.msra.mxu1 %v4523_v28  ;;  %4229 = vmatprep.mubr.msk.f32.mxu1 %vm85_vm0, %v1385_v30  ;;  %v1635_v28 = vld [vmem:[%s6137_s14 + $0x20] sm:$0xff] }
 0xe8b   :  { %4528 = vmatprep.subr.bf16.mxu1 %v4527_v47  ;;  %v4543_v27 = vpack.c.bf16 %v1636_v29, %v1635_v28 }
 0xe8d   :  { %4230 = vmatmul.mubr.msk.f32.vlgmr.msra.gmra.mrb[12].mxu1 %vm85_vm0, %v1386_v21 }
 0xe8e   :  { %4530 = vmatpush3.bf16.msra.mxu1 %v4527_v47 }
 0xe8f   :  { %4532 = vmatprep.subr.bf16.mxu1 %v4531_v50 }
 0xe92   :  { %4534 = vmatpush3.bf16.msra.mxu1 %v4531_v50  ;;  %v1640_v50 = vld [vmem:[%s6137_s14 + $0x48] sm:$0xff] }
 0xeb0   :  { %v1163_v31 = vpop.xlane.xlu1 %1162 }
 0xeb1   :  { %4916 = vrcp.f32 %v1163_v31  ;;  %v1166_v13 = vpop.xlane.xlu0 %1165 }
 0xeb2   :  { %4918 = vrcp.f32 %v1166_v13 }
 0xeb4   :  { %v4816_v32 = vpop.permute.xlu1 %4815 }
 0xeb5   :  { %v4811_v33 = vpop.permute.xlu0 %4810  ;;  %v4818_v12 = vunpack.i.h.bf16 %v4816_v32  ;;  %v4817_v34 = vunpack.i.l.bf16 %v4816_v32 }
 0xeb6   :  { %v4813_v35 = vunpack.i.h.bf16 %v4811_v33  ;;  %v4812_v36 = vunpack.i.l.bf16 %v4811_v33 }
 0xeb7   :  { %v4503_v38 = vpack.c.bf16 %v4818_v12, %v4817_v34 }
 0xeb8   :  { %v4499_v37 = vpack.c.bf16 %v4813_v35, %v4812_v36 }
 0xeba   :  { %4500 = vmatprep.subr.bf16.mxu0 %v4499_v37 }
 0xebb   :  { %v4917_v39 = vpop.eup %4916  ;;  %4502 = vmatpush3.bf16.msra.mxu0 %v4499_v37 }
 0xebc   :  { %4504 = vmatprep.subr.bf16.mxu0 %v4503_v38  ;;  %v1169_v40 = vmul.f32 %v4917_v39, %v4909_v9  ;;  %v4919_v41 = vpop.eup %4918 }
 0xebd   :  { %v1170_v44 = vmul.f32 %v4919_v41, %v4911_v10 }
 0xebe   :  { %4207 = vmatprep.mubr.msk.f32.mxu0 %vm85_vm0, %v1169_v40 }
 0xebf   :  { %4506 = vmatpush3.bf16.msra.mxu0 %v4503_v38 }
 0xec0   :  { %4536 = vmatprep.subr.bf16.mxu0 %v4535_v23 }
 0xec2   :  { %4208 = vmatmul.mubr.msk.f32.vlgmr.msra.gmra.mrb[12].mxu0 %vm85_vm0, %v1170_v44  ;;  %v1637_v44 = vld [vmem:[%s6137_s14 + $0x30] sm:$0xff] }
 0xec3   :  { %4538 = vmatpush3.bf16.msra.mxu0 %v4535_v23  ;;  %v4547_v47 = vpack.c.bf16 %v1638_v45, %v1637_v44  ;;  %v1797_v44 = vld [vmem:[%s6139_s16 + $0x40] sm:$0xff]  ;;  %v1798_v45 = vld [vmem:[%s6139_s16 + $0x48] sm:$0xff] }
 0xec4   :  { %4540 = vmatprep.subr.bf16.mxu0 %v4539_v26 }
 0xec7   :  { %4542 = vmatpush3.bf16.msra.mxu0 %v4539_v26 }
 0xec8   :  { %4544 = vmatprep.subr.bf16.mxu0 %v4543_v27 }
 0xecb   :  { %4546 = vmatpush3.bf16.msra.mxu0 %v4543_v27 }
 0xecc   :  { %4548 = vmatprep.subr.bf16.mxu0 %v4547_v47 }
 0xecf   :  { %4550 = vmatpush3.bf16.msra.mxu0 %v4547_v47  ;;  %v1799_v47 = vld [vmem:[%s6139_s16 + $0x50] sm:$0xff] }
 0xf60   :  { %v4231_v51 = vpop.f32.mrb[12].mxu1 }
 0xf61   :  { %v1471_v52 = vpop.f32.mrb[13].mxu1 }
 0xf62   :  { %1482 = vrot.lane.b32.xlu1 %v1471_v52, %s5049_s0 }
 0xf66   :  { %1484 = vrot.lane.b32.xlu1 %v4231_v51, %s5049_s0  ;;  %v4551_v51 = vpack.c.bf16 %v1640_v50, %v1639_v49  ;;  %v1801_v50 = vld [vmem:[%s6139_s16 + $0x60] sm:$0xff] }
 0xf68   :  { %4552 = vmatprep.subr.bf16.mxu0 %v4551_v51 }
 0xf69   :  { %4554 = vmatpush3.bf16.msra.mxu0 %v4551_v51  ;;  %v1802_v51 = vld [vmem:[%s6139_s16 + $0x68] sm:$0xff] }
 0xf95   :  { %v4209_v53 = vpop.f32.mrb[12].mxu0 }
 0xf96   :  { %v1255_v54 = vpop.f32.mrb[13].mxu0 }
 0xfd4   :  { %v1483_v55 = vpop.permute.xlu1 %1482 }
 0xfd5   :  { %v1488_v56 = vsel %vm316_vm5, %v1255_v54, %v1483_v55  ;;  %v3807_v54 = vld [vmem:[%s6131_s8 + $0x2] ss:$0 sm:$0xff]  ;;  %v1641_v55 = vld [vmem:[%s6137_s14 + $0x50] sm:$0xff] }
 0xfd6   :  { %4240 = vmatprep.mubr.msk.f32.mxu1 %vm85_vm0, %v1488_v56  ;;  %v1642_v56 = vld [vmem:[%s6137_s14 + $0x58] sm:$0xff] }
 0xfd8   :  { %v1485_v57 = vpop.permute.xlu1 %1484 }
 0xfd9   :  { %v1489_v58 = vsel %vm316_vm5, %v4209_v53, %v1485_v57 }
 0xfda   :  { %4241 = vmatmul.mubr.msk.f32.vlgmr.msra.gmra.mrb[14].mxu1 %vm85_vm0, %v1489_v58  ;;  %v4555_v58 = vpack.c.bf16 %v1642_v56, %v1641_v55  ;;  %v1805_v56 = vld [vmem:[%s6139_s16 + $0x80] sm:$0xff] }
 0xfdc   :  { %4556 = vmatprep.subr.bf16.mxu0 %v4555_v58 }
 0xfdd   :  { %4558 = vmatpush3.bf16.msra.mxu0 %v4555_v58 }
0x10ad   :  { %v4242_v59 = vpop.f32.mrb[14].mxu1 }
0x10ae   :  { %v5447_v61 = vadd.f32 %v4242_v59, %v5297_v22  ;;  %v1566_v60 = vpop.f32.mrb[15].mxu1  ;;  %v71_v22 = vld [vmem:[%s6127_s4] sm:$0xff] }
0x10af   :  { %v5450_v62 = vadd.f32 %v1566_v60, %v5300_v24  ;;  %v5051_v24 = vmov 1  }
0x10b0   :  { %v1582_v63 = vsel %vm85_vm0, %v5447_v61, 0.0 }
0x10b1   :  { %1583 = vadd.xlane.f32.xlu1 %v1582_v63  ;;  %v1579_v0 = vsel %vm85_vm0, %v5450_v62, 0.0 }
0x10b2   :  { %1580 = vadd.xlane.f32.xlu0 %v1579_v0 }
0x10c2   :  { %1677 = vperm.xlu1 %4820, %v72_v1  }
0x10c6   :  { %4821 = vset.pattern.permute.xlu1 %v5051_v24 }
0x10c7   :  { %1655 = vperm.xlu1 %4821, %v71_v22  }
0x10cb   :  { %1660 = vperm.xlu1 %4821, %v72_v1  }
0x113e   :  { %v1584_v6 = vpop.xlane.xlu1 %1583 }
0x113f   :  { %v1586_v7 = vmul.f32 0.03125, %v1584_v6  ;;  %v1581_v8 = vpop.xlane.xlu0 %1580 }
0x1140   :  { %v1585_v9 = vmul.f32 0.03125, %v1581_v8 }
0x1141   :  { %v5463_v10 = vsub.f32 %v5447_v61, %v1586_v7 }
0x1142   :  { %v1587_v11 = vsub.f32 %v5450_v62, %v1585_v9 }
0x1143   :  { %v1590_v16 = vmul.f32 %v5463_v10, %v5463_v10  ;;  %v1604_v59 = vmul.f32 %v3806_v48, %v5463_v10  ;;  %v5519_v10 = vpop.permute.xlu1 %1677 }
0x1144   :  { %v1589_v14 = vmul.f32 %v1587_v11, %v1587_v11  ;;  %v1603_v52 = vmul.f32 %v3806_v48, %v1587_v11  ;;  %v1800_v48 = vld [vmem:[%s6139_s16 + $0x58] sm:$0xff] }
0x1145   :  { %v1594_v17 = vsel %vm85_vm0, %v1590_v16, 0.0  ;;  %v4575_v49 = vpack.c.bf16 %v1800_v48, %v1799_v47 }
0x1146   :  { %v1591_v15 = vsel %vm85_vm0, %v1589_v14, 0.0 }
0x1147   :  { %1592 = vadd.xlane.f32.xlu0 %v1591_v15  ;;  %v5526_v16 = vpop.permute.xlu1 %1655 }
0x114b   :  { %1595 = vadd.xlane.f32.xlu0 %v1594_v17  ;;  %v5528_v17 = vpop.permute.xlu1 %1660 }
0x1161   :  { %1673 = vperm.xlu0 %4819, %v71_v22  }
0x11d4   :  { %v1593_v30 = vpop.xlane.xlu0 %1592 }
0x11d5   :  { %v1597_v21 = vmul.f32 0.032258064, %v1593_v30 }
0x11d7   :  { %4920 = vrsqrt.f32 %v1597_v21  ;;  %vm1607_vm15 = vcmp.eq.f32.partialorder %v1597_v21, inf  ;;  %v1610_v12 = vand.u32 2147483648, %v1597_v21  ;;  %vm1609_vm1 = vcmp.eq.f32.partialorder %v1597_v21, 0.0 }
0x11d8   :  { %v1596_v31 = vpop.xlane.xlu0 %1595 }
0x11d9   :  { %v1598_v13 = vmul.f32 0.032258064, %v1596_v31  ;;  %v1789_v31 = vld [vmem:[%s6139_s16] sm:$0xff] }
0x11db   :  { %4922 = vrsqrt.f32 %v1598_v13  ;;  %vm1614_vm2 = vcmp.eq.f32.partialorder %v1598_v13, inf  ;;  %v1617_v39 = vand.u32 2147483648, %v1598_v13  ;;  %vm1616_vm3 = vcmp.eq.f32.partialorder %v1598_v13, 0.0 }
0x11e0   :  { %v5514_v1 = vpop.permute.xlu0 %1673 }
0x11e1   :  { %v4921_v32 = vpop.eup %4920 }
0x11e2   :  { %v1606_v33 = vmul.f32 %v4921_v32, %v1597_v21  ;;  %v1791_v32 = vld [vmem:[%s6139_s16 + $0x10] sm:$0xff] }
0x11e4   :  { %v1608_v34 = vsel %vm1607_vm15, %v1597_v21, %v1606_v33  ;;  %v5053_v33 = vmov 0.0|0.0  }
0x11e5   :  { %v4923_v35 = vpop.eup %4922  ;;  %v1611_v36 = vsel %vm1609_vm1, %v1610_v12, %v1608_v34  ;;  %4559 = vmatprep.subr.bf16.mxu1 %v5053_v33  ;;  %v1792_v34 = vld [vmem:[%s6139_s16 + $0x18] sm:$0xff] }
0x11e6   :  { %v1613_v37 = vmul.f32 %v4923_v35, %v1598_v13  ;;  %v1619_v38 = vadd.f32 1e-06, %v1611_v36  ;;  %v4563_v35 = vpack.c.bf16 %v1792_v34, %v1791_v32  ;;  %v1793_v36 = vld [vmem:[%s6139_s16 + $0x20] sm:$0xff] }
0x11e8   :  { %v1615_v40 = vsel %vm1614_vm2, %v1598_v13, %v1613_v37  ;;  %4924 = vrcp.f32 %v1619_v38  ;;  %v1790_v13 = vld [vmem:[%s6139_s16 + $0x8] sm:$0xff] }
0x11e9   :  { %v1618_v41 = vsel %vm1616_vm3, %v1617_v39, %v1615_v40  ;;  %v4560_v12 = vpack.c.bf16 %v1790_v13, %v1789_v31  ;;  %v1794_v37 = vld [vmem:[%s6139_s16 + $0x28] sm:$0xff]  ;;  %v1795_v39 = vld [vmem:[%s6139_s16 + $0x30] sm:$0xff]  ;;  %v1796_v40 = vld [vmem:[%s6139_s16 + $0x38] sm:$0xff] }
0x11ea   :  { %v1620_v46 = vadd.f32 1e-06, %v1618_v41  ;;  %v4566_v38 = vpack.c.bf16 %v1794_v37, %v1793_v36  ;;  %v4569_v41 = vpack.c.bf16 %v1796_v40, %v1795_v39  ;;  %v3811_v37 = vld [vmem:[%s6140_s17] ss:$0 sm:$0xff] }
0x11eb   :  { %4561 = vmatpush1.bf16.msra.mxu1 %v4560_v12 }
0x11ec   :  { %4926 = vrcp.f32 %v1620_v46  ;;  %4562 = vmatprep.subr.bf16.mxu1 %v5053_v33  ;;  %v4572_v46 = vpack.c.bf16 %v1798_v45, %v1797_v44 }
0x11ef   :  { %4564 = vmatpush1.bf16.msra.mxu1 %v4563_v35 }
0x11f0   :  { %4565 = vmatprep.subr.bf16.mxu1 %v5053_v33 }
0x11f2   :  { %v4925_v53 = vpop.eup %4924 }
0x11f3   :  { %v1622_v57 = vmul.f32 %v4925_v53, %v1603_v52  ;;  %4567 = vmatpush1.bf16.msra.mxu1 %v4566_v38  ;;  %v4578_v52 = vpack.c.bf16 %v1802_v51, %v1801_v50  ;;  %v1803_v53 = vld [vmem:[%s6139_s16 + $0x70] sm:$0xff] }
0x11f4   :  { %4568 = vmatprep.subr.bf16.mxu1 %v5053_v33 }
0x11f5   :  { %v1629_v60 = vadd.f32 %v3807_v54, %v1622_v57  ;;  %v1806_v57 = vld [vmem:[%s6139_s16 + $0x88] sm:$0xff] }
0x11f6   :  { %v4927_v63 = vpop.eup %4926  ;;  %v4584_v58 = vpack.c.bf16 %v1806_v57, %v1805_v56 }
0x11f7   :  { %1690 = vrot.lane.b32.xlu1 %v1629_v60, %s5047_s21  ;;  %v1624_v0 = vmul.f32 %v4927_v63, %v1604_v59  ;;  %v1666_v3 = vrot.slane %v1629_v60, 7  ;;  %v1647_v7 = vrot.slane %v1629_v60, 6  ;;  %4570 = vmatpush1.bf16.msra.mxu1 %v4569_v41  ;;  %v1807_v59 = vld [vmem:[%s6139_s16 + $0x90] sm:$0xff]  ;;  %v1808_v60 = vld [vmem:[%s6139_s16 + $0x98] sm:$0xff] }
0x11f8   :  { %4571 = vmatprep.subr.bf16.mxu1 %v5053_v33  ;;  %v4587_v63 = vpack.c.bf16 %v1808_v60, %v1807_v59  ;;  %v3816_v60 = vld [vmem:[%s6132_s9 + $0x20] sm:$0xff] }
0x11f9   :  { %v1630_v22 = vadd.f32 %v3807_v54, %v1624_v0  ;;  %v1671_v24 = vsel %vm1665_vm4, 0.0, %v1666_v3  ;;  %v1652_v19 = vsel %vm1646_vm9, 0.0, %v1647_v7  ;;  %v1804_v54 = vld [vmem:[%s6139_s16 + $0x78] sm:$0xff]  ;;  %v1809_v0 = vld [vmem:[%s6139_s16 + $0xa0] sm:$0xff] }
0x11fa   :  { %v1680_v6 = vmul.f32 %v5514_v1, %v1671_v24  ;;  %v1663_v20 = vmul.f32 %v5526_v16, %v1652_v19  ;;  %v4581_v55 = vpack.c.bf16 %v1804_v54, %v1803_v53  ;;  %v1811_v24 = vld [vmem:[%s6139_s16 + $0xb0] sm:$0xff] }
0x11fb   :  { %v1648_v8 = vrot.slane %v1630_v22, 6  ;;  %v1667_v9 = vrot.slane %v1630_v22, 7  ;;  %4573 = vmatpush1.bf16.msra.mxu1 %v4572_v46 }
0x11fc   :  { %1684 = vrot.lane.b32.xlu1 %v1680_v6, %s5052_s5  ;;  %4574 = vmatprep.subr.bf16.mxu1 %v5053_v33  ;;  %v1812_v6 = vld [vmem:[%s6139_s16 + $0xb8] sm:$0xff] }
0x11fd   :  { %v1649_v11 = vsel %vm1646_vm9, %v1647_v7, %v1648_v8  ;;  %v1668_v14 = vsel %vm1665_vm4, %v1666_v3, %v1667_v9  ;;  %v1810_v3 = vld [vmem:[%s6139_s16 + $0xa8] sm:$0xff]  ;;  %v4593_v7 = vpack.c.bf16 %v1812_v6, %v1811_v24  ;;  %v3808_v8 = vld [vmem:[%s6138_s15] ss:$0 sm:$0xff] }
0x11fe   :  { %v1681_v15 = vmul.f32 %v5519_v10, %v1668_v14  ;;  %v1664_v29 = vmul.f32 %v5528_v17, %v1649_v11 }
0x11ff   :  { %4576 = vmatpush1.bf16.msra.mxu1 %v4575_v49 }
0x1200   :  { %1686 = vrot.lane.b32.xlu1 %v1681_v15, %s5052_s5  ;;  %4577 = vmatprep.subr.bf16.mxu1 %v5053_v33 }
0x1203   :  { %4579 = vmatpush1.bf16.msra.mxu1 %v4578_v52 }
0x1204   :  { %1692 = vrot.lane.b32.xlu1 %v1630_v22, %s5047_s21  ;;  %4580 = vmatprep.subr.bf16.mxu1 %v5053_v33  ;;  %v4590_v22 = vpack.c.bf16 %v1810_v3, %v1809_v0  ;;  %v3818_v0 = vld [vmem:[%s6132_s9 + $0x30] sm:$0xff] }
0x1207   :  { %4582 = vmatpush1.bf16.msra.mxu1 %v4581_v55 }
0x1208   :  { %4583 = vmatprep.subr.bf16.mxu1 %v5053_v33 }
0x120b   :  { %4585 = vmatpush1.bf16.msra.mxu1 %v4584_v58 }
0x120c   :  { %4586 = vmatprep.subr.bf16.mxu1 %v5053_v33 }
0x120f   :  { %4588 = vmatpush1.bf16.msra.mxu1 %v4587_v63  ;;  %v3817_v63 = vld [vmem:[%s6132_s9 + $0x28] sm:$0xff] }
0x1210   :  { %4589 = vmatprep.subr.bf16.mxu1 %v5053_v33  ;;  %v4595_v3 = vpack.c.bf16 %v3817_v63, %v3816_v60 }
0x1212   :  { %4596 = vmatprep.subr.bf16.mxu0 %v4595_v3 }
0x1213   :  { %4591 = vmatpush1.bf16.msra.mxu1 %v4590_v22  ;;  %v3819_v22 = vld [vmem:[%s6132_s9 + $0x38] sm:$0xff] }
0x1214   :  { %4592 = vmatprep.subr.bf16.mxu1 %v5053_v33  ;;  %v4599_v24 = vpack.c.bf16 %v3819_v22, %v3818_v0 }
0x1217   :  { %4594 = vmatpush1.bf16.msra.mxu1 %v4593_v7 }
0x1269   :  { %v1691_v18 = vpop.permute.xlu1 %1690 }
0x126e   :  { %v1685_v23 = vpop.permute.xlu1 %1684 }
0x126f   :  { %v1696_v25 = vsel %vm85_vm0, %v1663_v20, %v1685_v23 }
0x1270   :  { %v1699_v26 = vsel %vm1698_vm10, %v1696_v25, %v1691_v18 }
0x1271   :  { %4267 = vmatprep.mubr.msk.f32.mxu0 %vm1705_vm11, %v1699_v26 }
0x1272   :  { %v1687_v28 = vpop.permute.xlu1 %1686 }
0x1273   :  { %v1697_v27 = vsel %vm85_vm0, %v1664_v29, %v1687_v28 }
0x1276   :  { %v1693_v30 = vpop.permute.xlu1 %1692 }
0x1277   :  { %v1700_v21 = vsel %vm1698_vm10, %v1697_v27, %v1693_v30 }
0x1278   :  { %4268 = vmatmul.mubr.msk.f32.vlgmr.msra.gmra.mrb[14].mxu0 %vm1705_vm11, %v1700_v21 }
0x1279   :  { %4598 = vmatpush3.bf16.msra.mxu0 %v4595_v3 }
0x127a   :  { %4600 = vmatprep.subr.bf16.mxu0 %v4599_v24 }
0x127d   :  { %4602 = vmatpush3.bf16.msra.mxu0 %v4599_v24 }
0x134b   :  { %v4269_v9 = vpop.f32.mrb[14].mxu0 }
0x134c   :  { %v1784_v11 = vadd.f32 %v4269_v9, %v3808_v8  ;;  %v1778_v14 = vpop.f32.mrb[15].mxu0 }
0x134d   :  { %v1779_v15 = vadd.f32 %v3808_v8, %v1778_v14 }
0x134e   :  { %v1788_v18 = vmax.f32 %v1784_v11, 0.0 }
0x134f   :  { %v1787_v19 = vmax.f32 %v1779_v15, 0.0 }
0x1350   :  { %v1825_v20 = vrot.slane %v1788_v18, 7  ;;  %v1817_v30 = vrot.slane %v1788_v18, 6 }
0x1351   :  { %v1824_v23 = vrot.slane %v1787_v19, 7  ;;  %3812 = vmatprep.mubr.msk.f32.mxu1 %vm1698_vm10, %v1787_v19  ;;  %v1816_v27 = vrot.slane %v1787_v19, 6 }
0x1353   :  { %v1829_v25 = vsel %vm1665_vm4, 0.0, %v1824_v23  ;;  %v1826_v26 = vsel %vm1665_vm4, %v1824_v23, %v1825_v20  ;;  %v1821_v21 = vsel %vm1646_vm9, 0.0, %v1816_v27  ;;  %v1818_v32 = vsel %vm1646_vm9, %v1816_v27, %v1817_v30  ;;  %v3814_v30 = vld [vmem:[%s6130_s7 + $0x3] ss:$0 sm:$0xff] }
0x1354   :  { %v1830_v28 = vmul.f32 %v1829_v25, %v5514_v1  ;;  %v1831_v29 = vmul.f32 %v1826_v26, %v5519_v10  ;;  %v1822_v31 = vmul.f32 %v1821_v21, %v5526_v16  ;;  %v1823_v35 = vmul.f32 %v1818_v32, %v5528_v17 }
0x1356   :  { %1834 = vrot.lane.b32.xlu1 %v1830_v28, %s5047_s21  ;;  %1836 = vrot.lane.b32.xlu0 %v1831_v29, %s5047_s21 }
0x13c8   :  { %v1835_v13 = vpop.permute.xlu1 %1834  ;;  %v1837_v34 = vpop.permute.xlu0 %1836 }
0x13c9   :  { %v1840_v12 = vsel %vm1698_vm10, %v1822_v31, %v1835_v13  ;;  %v1841_v36 = vsel %vm1698_vm10, %v1823_v35, %v1837_v34  ;;  %v3815_v13 = vld [vmem:[%s6131_s8 + $0x3] ss:$0 sm:$0xff] }
0x13ca   :  { %1915 = vmatmul.mubr.f32.vlgmr.msra.gmra.mrb[16].mxu1 %v1840_v12 }
0x13cb   :  { %3813 = vmatprep.mubr.msk.f32.mxu1 %vm1698_vm10, %v1788_v18 }
0x13ce   :  { %1920 = vmatmul.mubr.f32.gmra.mrb[18].mxu1 %v1841_v36 }
0x149d   :  { %v1916_v38 = vpop.f32.mrb[16].mxu1 }
0x149e   :  { %v1917_v39 = vadd.f32 %v3811_v37, %v1916_v38  ;;  %v1918_v40 = vpop.f32.mrb[17].mxu1 }
0x14a0   :  { %v1925_v41 = vmax.f32 %v1917_v39, 0.0 }
0x14a1   :  { %v1921_v44 = vpop.f32.mrb[18].mxu1 }
0x14a2   :  { %v5644_v45 = vadd.f32 %v1925_v41, %v5450_v62  ;;  %v1922_v46 = vadd.f32 %v3811_v37, %v1921_v44  ;;  %v1923_v47 = vpop.f32.mrb[19].mxu1 }
0x14a4   :  { %v1926_v48 = vmax.f32 %v1922_v46, 0.0  ;;  %v1931_v49 = vsel %vm85_vm0, %v5644_v45, 0.0 }
0x14a5   :  { %1932 = vadd.xlane.f32.xlu1 %v1931_v49 }
0x14a6   :  { %v5649_v50 = vadd.f32 %v1926_v48, %v5447_v61 }
0x14a8   :  { %v1934_v51 = vsel %vm85_vm0, %v5649_v50, 0.0 }
0x14a9   :  { %1935 = vadd.xlane.f32.xlu0 %v1934_v51 }
0x1532   :  { %v1933_v52 = vpop.xlane.xlu1 %1932 }
0x1533   :  { %v1937_v53 = vmul.f32 0.03125, %v1933_v52 }
0x1535   :  { %v1939_v54 = vsub.f32 %v5644_v45, %v1937_v53 }
0x1536   :  { %v1936_v62 = vpop.xlane.xlu0 %1935 }
0x1537   :  { %v1938_v55 = vmul.f32 0.03125, %v1936_v62  ;;  %v1941_v56 = vmul.f32 %v1939_v54, %v1939_v54  ;;  %v1955_v21 = vmul.f32 %v3814_v30, %v1939_v54 }
0x1539   :  { %v1940_v57 = vsub.f32 %v5649_v50, %v1938_v55  ;;  %v1943_v58 = vsel %vm85_vm0, %v1941_v56, 0.0 }
0x153a   :  { %1944 = vadd.xlane.f32.xlu0 %v1943_v58 }
0x153b   :  { %v1942_v59 = vmul.f32 %v1940_v57, %v1940_v57  ;;  %v1956_v12 = vmul.f32 %v3814_v30, %v1940_v57 }
0x153d   :  { %v1946_v61 = vsel %vm85_vm0, %v1942_v59, 0.0 }
0x153e   :  { %1947 = vadd.xlane.f32.xlu1 %v1946_v61 }
0x15c7   :  { %v1945_v6 = vpop.xlane.xlu0 %1944 }
0x15c8   :  { %v1949_v7 = vmul.f32 0.032258064, %v1945_v6 }
0x15ca   :  { %4928 = vrsqrt.f32 %v1949_v7  ;;  %vm1959_vm12 = vcmp.eq.f32.partialorder %v1949_v7, inf  ;;  %v1962_v15 = vand.u32 2147483648, %v1949_v7  ;;  %vm1961_vm15 = vcmp.eq.f32.partialorder %v1949_v7, 0.0 }
0x15cb   :  { %v1948_v8 = vpop.xlane.xlu1 %1947 }
0x15cc   :  { %v1950_v9 = vmul.f32 0.032258064, %v1948_v8 }
0x15ce   :  { %4930 = vrsqrt.f32 %v1950_v9  ;;  %vm1966_vm1 = vcmp.eq.f32.partialorder %v1950_v9, inf  ;;  %v1969_v26 = vand.u32 2147483648, %v1950_v9  ;;  %vm1968_vm2 = vcmp.eq.f32.partialorder %v1950_v9, 0.0 }
0x15d4   :  { %v4929_v11 = vpop.eup %4928 }
0x15d5   :  { %v1958_v14 = vmul.f32 %v4929_v11, %v1949_v7 }
0x15d7   :  { %v1960_v18 = vsel %vm1959_vm12, %v1949_v7, %v1958_v14 }
0x15d8   :  { %v4931_v19 = vpop.eup %4930  ;;  %v1963_v20 = vsel %vm1961_vm15, %v1962_v15, %v1960_v18 }
0x15d9   :  { %v1965_v23 = vmul.f32 %v4931_v19, %v1950_v9  ;;  %v1971_v25 = vadd.f32 1e-06, %v1963_v20 }
0x15db   :  { %v1967_v28 = vsel %vm1966_vm1, %v1950_v9, %v1965_v23  ;;  %4932 = vrcp.f32 %v1971_v25 }
0x15dc   :  { %v1970_v29 = vsel %vm1968_vm2, %v1969_v26, %v1967_v28 }
0x15dd   :  { %v1972_v27 = vadd.f32 1e-06, %v1970_v29 }
0x15df   :  { %4934 = vrcp.f32 %v1972_v27 }
0x15e5   :  { %v4933_v31 = vpop.eup %4932 }
0x15e6   :  { %v1974_v32 = vmul.f32 %v4933_v31, %v1955_v21 }
0x15e8   :  { %v1981_v34 = vadd.f32 %v3815_v13, %v1974_v32 }
0x15e9   :  { %v4935_v35 = vpop.eup %4934 }
0x15ea   :  { %v1976_v36 = vmul.f32 %v4935_v35, %v1956_v12  ;;  %4278 = vmatprep.mubr.msk.f32.mxu0 %vm85_vm0, %v1981_v34 }
0x15ec   :  { %v1982_v37 = vadd.f32 %v3815_v13, %v1976_v36 }
0x15ee   :  { %4279 = vmatmul.mubr.msk.f32.vlgmr.msra.gmra.mrb[16].mxu0 %vm85_vm0, %v1982_v37 }
0x16c1   :  { %v4280_v38 = vpop.f32.mrb[16].mxu0 }
0x16c2   :  { %v2060_v39 = vpop.f32.mrb[17].mxu0  ;;  %v2070_v44 = vmul.f32 0.25, %v4280_v38 }
0x16c3   :  { %v5677_v40 = vpack.i.bf16 %v4280_v38, %v2060_v39  ;;  %v2069_v41 = vmul.f32 0.25, %v2060_v39 }
0x16c5   :  { %4823 = vrot.lane.b32.xlu0 %v5677_v40, %s5044_s27  ;;  %4285 = vmatprep.mubr.msk.f32.mxu0 %vm316_vm5, %v2069_v41 }
0x16c9   :  { %4833 = vrot.lane.b32.xlu0 %v5677_v40, %s5045_s28 }
0x16cd   :  { %2273 = vrot.lane.b32.xlu0 %v2069_v41, %s5046_s6 }
0x16d1   :  { %2275 = vrot.lane.b32.xlu0 %v2070_v44, %s5046_s6 }
0x1737   :  { %v4824_v46 = vpop.permute.xlu0 %4823 }
0x1738   :  { %v4826_v47 = vunpack.i.h.bf16 %v4824_v46  ;;  %v4825_v48 = vunpack.i.l.bf16 %v4824_v46 }
0x173a   :  { %v4603_v49 = vpack.c.bf16 %v4826_v47, %v4825_v48 }
0x173b   :  { %v4834_v7 = vpop.permute.xlu0 %4833 }
0x173c   :  { %4605 = vmatprep.subr.msk.bf16.mxu0 %vm5227_vm6, %v4603_v49  ;;  %v4836_v9 = vunpack.i.h.bf16 %v4834_v7  ;;  %v4835_v11 = vunpack.i.l.bf16 %v4834_v7  ;;  %v4992_v7 = vld [vmem:[%s6155_s29] sm:$0xff] }
0x173d   :  { %4608 = vmatpush3.bf16.xpose.msk.msra.mxu0 %vm5227_vm6, %v4603_v49 }
0x173e   :  { %v4613_v19 = vpack.c.bf16 %v4836_v9, %v4835_v11 }
0x173f   :  { %v2274_v28 = vpop.permute.xlu0 %2273 }
0x1743   :  { %v2276_v29 = vpop.permute.xlu0 %2275 }
0x1744   :  { %4286 = vmatmul.mubr.msk.f32.vlgmr.msra.gmra.mrb[18].mxu0 %vm316_vm5, %v2070_v44 }
0x1817   :  { %v4287_v51 = vpop.f32.mrb[18].mxu0 }
0x1818   :  { %v2153_v52 = vpop.f32.mrb[19].mxu0  ;;  %v2163_v62 = vsel %vm66_vm8, -1e+18, %v4287_v51 }
0x1819   :  { %v2162_v53 = vsel %vm65_vm7, -1e+18, %v2153_v52  ;;  %v2167_v55 = vsel %vm316_vm5, %v2163_v62, -inf }
0x181a   :  { %v2164_v54 = vsel %vm316_vm5, %v2162_v53, -inf }
0x181b   :  { %2165 = vmax.xlane.f32.xlu1 %v2164_v54 }
0x181f   :  { %2168 = vmax.xlane.f32.xlu1 %v2167_v55 }
0x18a8   :  { %v2166_v56 = vpop.xlane.xlu1 %2165 }
0x18a9   :  { %v2170_v57 = vsub.f32 %v2162_v53, %v2166_v56  ;;  %v3834_v56 = vld [vmem:[%s6133_s10 + $0x20] sm:$0xff] }
0x18ab   :  { %v2172_v61 = vmul.f32 1.442695, %v2170_v57  ;;  %v3835_v57 = vld [vmem:[%s6133_s10 + $0x28] sm:$0xff] }
0x18ac   :  { %v2169_v58 = vpop.xlane.xlu1 %2168 }
0x18ad   :  { %v2171_v59 = vsub.f32 %v2163_v62, %v2169_v58  ;;  %v3836_v58 = vld [vmem:[%s6133_s10 + $0x30] sm:$0xff] }
0x18af   :  { %v2174_v60 = vmul.f32 1.442695, %v2171_v59  ;;  %v4623_v59 = vpack.c.bf16 %v3835_v57, %v3834_v56 }
0x18b1   :  { %4936 = vpow2.f32 %v2174_v60  ;;  %4624 = vmatprep.subr.bf16.mxu1 %v4623_v59 }
0x18b2   :  { %4938 = vpow2.f32 %v2172_v61  ;;  %v3837_v61 = vld [vmem:[%s6133_s10 + $0x38] sm:$0xff]  ;;  %4626 = vmatpush3.bf16.msra.mxu1 %v4623_v59 }
0x18b3   :  { %v4627_v60 = vpack.c.bf16 %v3837_v61, %v3836_v58  ;;  %v3840_v61 = vld [vmem:[%s6130_s7 + $0x4] ss:$0 sm:$0xff] }
0x18b5   :  { %4628 = vmatprep.subr.bf16.mxu1 %v4627_v60 }
0x18b6   :  { %4630 = vmatpush3.bf16.msra.mxu1 %v4627_v60 }
0x18bb   :  { %v4937_v63 = vpop.eup %4936 }
0x18bc   :  { %v2179_v0 = vsel %vm316_vm5, %v4937_v63, 0.0  ;;  %v4939_v3 = vpop.eup %4938 }
0x18bd   :  { %2180 = vadd.xlane.f32.xlu1 %v2179_v0  ;;  %v2176_v22 = vsel %vm316_vm5, %v4939_v3, 0.0 }
0x18c1   :  { %2177 = vadd.xlane.f32.xlu1 %v2176_v22 }
0x18d2   :  { %4828 = vrot.lane.b32.xlu1 %v5677_v40, %s5047_s21 }
0x194a   :  { %v2181_v24 = vpop.xlane.xlu1 %2180 }
0x194b   :  { %4940 = vrcp.f32 %v2181_v24 }
0x194e   :  { %v2178_v6 = vpop.xlane.xlu1 %2177 }
0x194f   :  { %4942 = vrcp.f32 %v2178_v6 }
0x1952   :  { %v4829_v8 = vpop.permute.xlu1 %4828 }
0x1953   :  { %v4831_v14 = vunpack.i.h.bf16 %v4829_v8  ;;  %v4830_v15 = vunpack.i.l.bf16 %v4829_v8 }
0x1955   :  { %v4609_v18 = vpack.c.bf16 %v4831_v14, %v4830_v15  ;;  %v4941_v20 = vpop.eup %4940 }
0x1956   :  { %v2185_v26 = vmul.f32 %v4941_v20, %v4937_v63 }
0x1957   :  { %4610 = vmatprep.subr.bf16.mxu0 %v4609_v18 }
0x1958   :  { %4612 = vmatpush3.bf16.msra.mxu0 %v4609_v18 }
0x1959   :  { %v4943_v23 = vpop.eup %4942  ;;  %4615 = vmatprep.subr.msk.bf16.mxu0 %vm5227_vm6, %v4613_v19 }
0x195a   :  { %v2184_v25 = vmul.f32 %v4943_v23, %v4939_v3 }
0x195c   :  { %4292 = vmatprep.mubr.msk.f32.mxu0 %vm316_vm5, %v2184_v25 }
0x195d   :  { %4293 = vmatmul.mubr.msk.f32.vlgmr.msra.gmra.mrb[20].mxu0 %vm316_vm5, %v2185_v26 }
0x195e   :  { %4299 = vmatprep.mubr.msk.f32.mxu0 %vm316_vm5, %v2274_v28 }
0x1961   :  { %4618 = vmatpush3.bf16.xpose.msk.msra.mxu0 %vm5227_vm6, %v4613_v19 }
0x1968   :  { %4300 = vmatmul.mubr.msk.f32.vlgmr.msra.gmra.mrb[22].mxu0 %vm316_vm5, %v2276_v29 }
0x1a30   :  { %v4294_v27 = vpop.f32.mrb[20].mxu0 }
0x1a31   :  { %v2264_v30 = vpop.f32.mrb[21].mxu0 }
0x1a3b   :  { %v4301_v21 = vpop.f32.mrb[22].mxu0 }
0x1a3c   :  { %v2365_v31 = vsel %vm66_vm8, -1e+18, %v4301_v21  ;;  %v2355_v13 = vpop.f32.mrb[23].mxu0  ;;  %v3849_v21 = vld [vmem:[%s6135_s12 + $0x28] sm:$0xff] }
0x1a3d   :  { %v2364_v32 = vsel %vm65_vm7, -1e+18, %v2355_v13  ;;  %v2369_v12 = vsel %vm316_vm5, %v2365_v31, -inf  ;;  %v3850_v13 = vld [vmem:[%s6135_s12 + $0x30] sm:$0xff] }
0x1a3e   :  { %2370 = vmax.xlane.f32.xlu1 %v2369_v12  ;;  %v2366_v34 = vsel %vm316_vm5, %v2364_v32, -inf }
0x1a3f   :  { %2367 = vmax.xlane.f32.xlu0 %v2366_v34  ;;  %v3842_v34 = vld [vmem:[%s6134_s11 + $0x20] sm:$0xff] }
0x1a4f   :  { %4838 = vrot.lane.b32.xlu1 %v5677_v40, %s5048_s1 }
0x1acb   :  { %v2371_v35 = vpop.xlane.xlu1 %2370 }
0x1acc   :  { %v2373_v36 = vsub.f32 %v2365_v31, %v2371_v35  ;;  %v2368_v37 = vpop.xlane.xlu0 %2367  ;;  %v3843_v35 = vld [vmem:[%s6134_s11 + $0x28] sm:$0xff] }
0x1acd   :  { %v2372_v38 = vsub.f32 %v2364_v32, %v2368_v37  ;;  %v3851_v32 = vld [vmem:[%s6135_s12 + $0x38] sm:$0xff]  ;;  %v4993_v37 = vld [vmem:[%s6155_s29 + $0x8] sm:$0xff] }
0x1ace   :  { %v2376_v39 = vmul.f32 1.442695, %v2373_v36  ;;  %v4643_v12 = vpack.c.bf16 %v3851_v32, %v3850_v13  ;;  %v3844_v36 = vld [vmem:[%s6134_s11 + $0x30] sm:$0xff] }
0x1acf   :  { %v2374_v5 = vmul.f32 1.442695, %v2372_v38  ;;  %v4839_v41 = vpop.permute.xlu1 %4838  ;;  %v4631_v38 = vpack.c.bf16 %v3843_v35, %v3842_v34 }
0x1ad0   :  { %v4841_v44 = vunpack.i.h.bf16 %v4839_v41  ;;  %v4840_v46 = vunpack.i.l.bf16 %v4839_v41 }
0x1ad1   :  { %4944 = vpow2.f32 %v2374_v5  ;;  %v4994_v5 = vld [vmem:[%s6155_s29 + $0x10] sm:$0xff] }
0x1ad2   :  { %v4619_v4 = vpack.c.bf16 %v4841_v44, %v4840_v46  ;;  %4946 = vpow2.f32 %v2376_v39  ;;  %v3845_v39 = vld [vmem:[%s6134_s11 + $0x38] sm:$0xff] }
0x1ad3   :  { %v4635_v41 = vpack.c.bf16 %v3845_v39, %v3844_v36  ;;  %v4995_v44 = vld [vmem:[%s6155_s29 + $0x18] sm:$0xff] }
0x1ad4   :  { %4620 = vmatprep.subr.bf16.mxu0 %v4619_v4 }
0x1ad5   :  { %4622 = vmatpush3.bf16.msra.mxu0 %v4619_v4 }
0x1ad6   :  { %4632 = vmatprep.subr.bf16.mxu0 %v4631_v38 }
0x1adb   :  { %v4945_v47 = vpop.eup %4944 }
0x1adc   :  { %v2378_v48 = vsel %vm316_vm5, %v4945_v47, 0.0  ;;  %v4947_v49 = vpop.eup %4946 }
0x1add   :  { %2379 = vadd.xlane.f32.xlu0 %v2378_v48  ;;  %v2381_v40 = vsel %vm316_vm5, %v4947_v49, 0.0 }
0x1ae1   :  { %2382 = vadd.xlane.f32.xlu0 %v2381_v40 }
0x1b6a   :  { %v2380_v51 = vpop.xlane.xlu0 %2379 }
0x1b6b   :  { %4948 = vrcp.f32 %v2380_v51 }
0x1b6e   :  { %v2383_v52 = vpop.xlane.xlu0 %2382 }
0x1b6f   :  { %4950 = vrcp.f32 %v2383_v52 }
0x1b75   :  { %v4949_v53 = vpop.eup %4948 }
0x1b76   :  { %v2386_v54 = vmul.f32 %v4949_v53, %v4945_v47 }
0x1b78   :  { %4306 = vmatprep.mubr.msk.f32.mxu0 %vm316_vm5, %v2386_v54 }
0x1b79   :  { %v4951_v62 = vpop.eup %4950 }
0x1b7a   :  { %v2387_v55 = vmul.f32 %v4951_v62, %v4947_v49 }
0x1b7c   :  { %4307 = vmatmul.mubr.msk.f32.vlgmr.msra.gmra.mrb[24].mxu0 %vm316_vm5, %v2387_v55 }
0x1b7d   :  { %4634 = vmatpush3.bf16.msra.mxu0 %v4631_v38 }
0x1b7e   :  { %4636 = vmatprep.subr.bf16.mxu0 %v4635_v41 }
0x1b81   :  { %4638 = vmatpush3.bf16.msra.mxu0 %v4635_v41 }
0x1c4f   :  { %v4308_v63 = vpop.f32.mrb[24].mxu0 }
0x1c50   :  { %2479 = vrot.lane.b32.xlu1 %v4308_v63, %s5049_s0  ;;  %v2466_v0 = vpop.f32.mrb[25].mxu0 }
0x1c51   :  { %2477 = vrot.lane.b32.xlu0 %v2466_v0, %s5049_s0 }
0x1cc2   :  { %v2480_v3 = vpop.permute.xlu1 %2479 }
0x1cc3   :  { %v2478_v22 = vpop.permute.xlu0 %2477  ;;  %v2484_v6 = vsel %vm316_vm5, %v4294_v27, %v2480_v3 }
0x1cc4   :  { %v2483_v24 = vsel %vm316_vm5, %v2264_v30, %v2478_v22  ;;  %v3848_v30 = vld [vmem:[%s6135_s12 + $0x20] sm:$0xff] }
0x1cc5   :  { %4317 = vmatprep.mubr.msk.f32.mxu1 %vm85_vm0, %v2483_v24  ;;  %v4639_v31 = vpack.c.bf16 %v3849_v21, %v3848_v30  ;;  %v3841_v22 = vld [vmem:[%s6131_s8 + $0x4] ss:$0 sm:$0xff] }
0x1cc6   :  { %4318 = vmatmul.mubr.msk.f32.vlgmr.msra.gmra.mrb[20].mxu1 %vm85_vm0, %v2484_v6 }
0x1cc7   :  { %4339 = vmatprep.mubr.msk.f32.mxu1 %vm85_vm0, %v4992_v7  ;;  %4640 = vmatprep.subr.bf16.mxu1 %v4639_v31 }
0x1cc8   :  { %4642 = vmatpush3.bf16.msra.mxu1 %v4639_v31 }
0x1cc9   :  { %4644 = vmatprep.subr.bf16.mxu1 %v4643_v12 }
0x1ccc   :  { %4646 = vmatpush3.bf16.msra.mxu1 %v4643_v12 }
0x1ccf   :  { %4340 = vmatmul.mubr.msk.f32.vlgmr.msra.gmra.mrb[22].mxu1 %vm85_vm0, %v4993_v37 }
0x1cd0   :  { %4342 = vmatprep.mubr.msk.f32.mxu1 %vm85_vm0, %v4994_v5 }
0x1cd3   :  { %4343 = vmatmul.mubr.msk.f32.gmra.mrb[24].mxu1 %vm85_vm0, %v4995_v44 }
0x1d99   :  { %v4319_v8 = vpop.f32.mrb[20].mxu1 }
0x1d9a   :  { %v5744_v9 = vadd.f32 %v4319_v8, %v5649_v50  ;;  %v2562_v11 = vpop.f32.mrb[21].mxu1 }
0x1d9b   :  { %v5747_v14 = vadd.f32 %v2562_v11, %v5644_v45 }
0x1d9c   :  { %v2578_v15 = vsel %vm85_vm0, %v5744_v9, 0.0 }
0x1d9d   :  { %2579 = vadd.xlane.f32.xlu0 %v2578_v15  ;;  %v2575_v18 = vsel %vm85_vm0, %v5747_v14, 0.0 }
0x1d9e   :  { %2576 = vadd.xlane.f32.xlu1 %v2575_v18 }
0x1da2   :  { %v4341_v11 = vpop.f32.mrb[22].mxu1 }
0x1da3   :  { %v2786_v15 = vpop.f32.mrb[23].mxu1 }
0x1da4   :  { %v4647_v18 = vpack.c.bf16 %v4341_v11, %v2786_v15 }
0x1da6   :  { %4649 = vmatprep.subr.msk.bf16.mxu0 %vm5227_vm6, %v4647_v18 }
0x1e2a   :  { %v2580_v19 = vpop.xlane.xlu0 %2579 }
0x1e2b   :  { %v2582_v20 = vmul.f32 0.03125, %v2580_v19  ;;  %v2577_v23 = vpop.xlane.xlu1 %2576  ;;  %v5801_v19 = vpack.i.bf16 %v4341_v11, %v2786_v15 }
0x1e2c   :  { %v2581_v25 = vmul.f32 0.03125, %v2577_v23 }
0x1e2d   :  { %v2584_v26 = vsub.f32 %v5744_v9, %v2582_v20  ;;  %v4344_v20 = vpop.f32.mrb[24].mxu1 }
0x1e2e   :  { %v2583_v50 = vsub.f32 %v5747_v14, %v2581_v25  ;;  %v2796_v23 = vpop.f32.mrb[25].mxu1 }
0x1e2f   :  { %v2586_v28 = vmul.f32 %v2584_v26, %v2584_v26  ;;  %v2600_v60 = vmul.f32 %v3840_v61, %v2584_v26  ;;  %v5807_v25 = vpack.i.bf16 %v4344_v20, %v2796_v23  ;;  %v4653_v26 = vpack.c.bf16 %v4344_v20, %v2796_v23 }
0x1e30   :  { %v2585_v29 = vmul.f32 %v2583_v50, %v2583_v50  ;;  %v2599_v0 = vmul.f32 %v3840_v61, %v2583_v50 }
0x1e31   :  { %v2590_v45 = vsel %vm85_vm0, %v2586_v28, 0.0 }
0x1e32   :  { %2591 = vadd.xlane.f32.xlu1 %v2590_v45  ;;  %v2587_v27 = vsel %vm85_vm0, %v2585_v29, 0.0 }
0x1e33   :  { %2588 = vadd.xlane.f32.xlu0 %v2587_v27 }
0x1ebf   :  { %v2592_v46 = vpop.xlane.xlu1 %2591 }
0x1ec0   :  { %v2594_v4 = vmul.f32 0.032258064, %v2592_v46  ;;  %v2589_v47 = vpop.xlane.xlu0 %2588 }
0x1ec1   :  { %v2593_v48 = vmul.f32 0.032258064, %v2589_v47 }
0x1ec2   :  { %4952 = vrsqrt.f32 %v2594_v4  ;;  %vm2610_vm7 = vcmp.eq.f32.partialorder %v2594_v4, inf  ;;  %v2613_v52 = vand.u32 2147483648, %v2594_v4  ;;  %vm2612_vm8 = vcmp.eq.f32.partialorder %v2594_v4, 0.0 }
0x1ec3   :  { %4954 = vrsqrt.f32 %v2593_v48  ;;  %vm2603_vm3 = vcmp.eq.f32.partialorder %v2593_v48, inf  ;;  %v2606_v62 = vand.u32 2147483648, %v2593_v48  ;;  %vm2605_vm12 = vcmp.eq.f32.partialorder %v2593_v48, 0.0 }
0x1ecc   :  { %v4953_v49 = vpop.eup %4952 }
0x1ecd   :  { %v4955_v40 = vpop.eup %4954  ;;  %v2609_v51 = vmul.f32 %v4953_v49, %v2594_v4 }
0x1ece   :  { %v2602_v53 = vmul.f32 %v4955_v40, %v2593_v48 }
0x1ecf   :  { %v2611_v54 = vsel %vm2610_vm7, %v2594_v4, %v2609_v51 }
0x1ed0   :  { %v2614_v55 = vsel %vm2612_vm8, %v2613_v52, %v2611_v54  ;;  %v2604_v56 = vsel %vm2603_vm3, %v2593_v48, %v2602_v53 }
0x1ed1   :  { %v2616_v57 = vadd.f32 1e-06, %v2614_v55  ;;  %v2607_v58 = vsel %vm2605_vm12, %v2606_v62, %v2604_v56 }
0x1ed2   :  { %v2615_v59 = vadd.f32 1e-06, %v2607_v58 }
0x1ed3   :  { %4956 = vrcp.f32 %v2616_v57 }
0x1ed4   :  { %4958 = vrcp.f32 %v2615_v59 }
0x1edd   :  { %v4957_v63 = vpop.eup %4956 }
0x1ede   :  { %v4959_v3 = vpop.eup %4958  ;;  %v2620_v24 = vmul.f32 %v4957_v63, %v2600_v60 }
0x1edf   :  { %v2618_v6 = vmul.f32 %v4959_v3, %v2599_v0 }
0x1ee0   :  { %v2626_v8 = vadd.f32 %v3841_v22, %v2620_v24 }
0x1ee1   :  { %v2625_v7 = vadd.f32 %v3841_v22, %v2618_v6 }
0x1ee3   :  { %4328 = vmatprep.mubr.msk.f32.mxu0 %vm85_vm0, %v2625_v7 }
0x1ee4   :  { %4329 = vmatmul.mubr.msk.f32.vlgmr.msra.gmra.mrb[26].mxu0 %vm85_vm0, %v2626_v8 }
0x1ee5   :  { %4652 = vmatpush3.bf16.xpose.msk.msra.mxu0 %vm5227_vm6, %v4647_v18 }
0x1ee6   :  { %4655 = vmatprep.subr.msk.bf16.mxu0 %vm5227_vm6, %v4653_v26 }
0x1eed   :  { %4658 = vmatpush3.bf16.xpose.msk.msra.mxu0 %vm5227_vm6, %v4653_v26 }
0x1fb7   :  { %v4330_v50 = vpop.f32.mrb[26].mxu0 }
0x1fb8   :  { %v2704_v28 = vpop.f32.mrb[27].mxu0  ;;  %v2714_v45 = vmul.f32 0.25, %v4330_v50 }
0x1fb9   :  { %v2713_v29 = vmul.f32 0.25, %v2704_v28 }
0x1fbb   :  { %4353 = vmatprep.mubr.msk.f32.mxu0 %vm316_vm5, %v2713_v29 }
0x1fbc   :  { %4354 = vmatmul.mubr.msk.f32.vlgmr.msra.gmra.mrb[28].mxu0 %vm316_vm5, %v2714_v45 }
0x208f   :  { %v4355_v27 = vpop.f32.mrb[28].mxu0 }
0x2090   :  { %v5817_v30 = vsel %vm70_vm13, -1e+18, %v4355_v27  ;;  %v2889_v21 = vpop.f32.mrb[29].mxu0 }
0x2091   :  { %v5821_v31 = vsel %vm69_vm14, -1e+18, %v2889_v21  ;;  %v2903_v13 = vsel %vm85_vm0, %v5817_v30, -inf }
0x2092   :  { %2904 = vmax.xlane.f32.xlu1 %v2903_v13  ;;  %v2900_v32 = vsel %vm85_vm0, %v5821_v31, -inf }
0x2093   :  { %2901 = vmax.xlane.f32.xlu0 %v2900_v32 }
0x211f   :  { %v2905_v12 = vpop.xlane.xlu1 %2904 }
0x2120   :  { %v2907_v34 = vsub.f32 %v5817_v30, %v2905_v12  ;;  %v2902_v35 = vpop.xlane.xlu0 %2901 }
0x2121   :  { %v2906_v36 = vsub.f32 %v5821_v31, %v2902_v35 }
0x2122   :  { %v2910_v37 = vmul.f32 1.442695, %v2907_v34 }
0x2123   :  { %v2908_v38 = vmul.f32 1.442695, %v2906_v36 }
0x2124   :  { %4960 = vpow2.f32 %v2910_v37 }
0x2125   :  { %4962 = vpow2.f32 %v2908_v38 }
0x212e   :  { %v4961_v39 = vpop.eup %4960 }
0x212f   :  { %v4963_v5 = vpop.eup %4962  ;;  %v2915_v41 = vsel %vm85_vm0, %v4961_v39, 0.0 }
0x2130   :  { %2916 = vadd.xlane.f32.xlu1 %v2915_v41  ;;  %v2912_v44 = vsel %vm85_vm0, %v4963_v5, 0.0 }
0x2131   :  { %2913 = vadd.xlane.f32.xlu0 %v2912_v44 }
0x2141   :  { %4848 = vrot.lane.b32.xlu1 %v5807_v25, %s5044_s27 }
0x2145   :  { %4853 = vrot.lane.b32.xlu1 %v5801_v19, %s5046_s6 }
0x2147   :  { %4843 = vrot.lane.b32.xlu0 %v5801_v19, %s5044_s27 }
0x2149   :  { %3015 = vrot.lane.b32.xlu1 %v2713_v29, %s5046_s6 }
0x214b   :  { %4858 = vrot.lane.b32.xlu0 %v5807_v25, %s5046_s6 }
0x214f   :  { %3017 = vrot.lane.b32.xlu0 %v2714_v45, %s5046_s6 }
0x21bd   :  { %v2917_v46 = vpop.xlane.xlu1 %2916 }
0x21be   :  { %v2914_v4 = vpop.xlane.xlu0 %2913 }
0x21bf   :  { %4964 = vrcp.f32 %v2914_v4 }
0x21c0   :  { %4966 = vrcp.f32 %v2917_v46 }
0x21c1   :  { %v4849_v47 = vpop.permute.xlu1 %4848 }
0x21c2   :  { %v4844_v48 = vpop.permute.xlu0 %4843  ;;  %v4851_v49 = vunpack.i.h.bf16 %v4849_v47  ;;  %v4850_v40 = vunpack.i.l.bf16 %v4849_v47  ;;  %v3872_v47 = vld [vmem:[%s6136_s13 + $0x20] sm:$0xff] }
0x21c3   :  { %v4846_v51 = vunpack.i.h.bf16 %v4844_v48  ;;  %v4845_v52 = vunpack.i.l.bf16 %v4844_v48  ;;  %v3873_v48 = vld [vmem:[%s6136_s13 + $0x28] sm:$0xff] }
0x21c4   :  { %v4663_v62 = vpack.c.bf16 %v4851_v49, %v4850_v40  ;;  %v3874_v49 = vld [vmem:[%s6136_s13 + $0x30] sm:$0xff]  ;;  %v4687_v40 = vpack.c.bf16 %v3873_v48, %v3872_v47 }
0x21c5   :  { %v4659_v53 = vpack.c.bf16 %v4846_v51, %v4845_v52  ;;  %v4854_v54 = vpop.permute.xlu1 %4853  ;;  %v3875_v51 = vld [vmem:[%s6136_s13 + $0x38] sm:$0xff] }
0x21c6   :  { %v4856_v55 = vunpack.i.h.bf16 %v4854_v54  ;;  %v4855_v56 = vunpack.i.l.bf16 %v4854_v54  ;;  %v4859_v63 = vpop.permute.xlu0 %4858  ;;  %v4691_v52 = vpack.c.bf16 %v3875_v51, %v3874_v49  ;;  %v3878_v49 = vld [vmem:[%s6130_s7 + $0x5] ss:$0 sm:$0xff]  ;;  %v3891_v51 = vld [vmem:[%s6137_s14 + $0xb8] sm:$0xff] }
0x21c7   :  { %4660 = vmatprep.subr.bf16.mxu1 %v4659_v53  ;;  %v4861_v3 = vunpack.i.h.bf16 %v4859_v63  ;;  %v4860_v22 = vunpack.i.l.bf16 %v4859_v63 }
0x21c8   :  { %4662 = vmatpush3.bf16.msra.mxu1 %v4659_v53  ;;  %v4667_v61 = vpack.c.bf16 %v4856_v55, %v4855_v56 }
0x21c9   :  { %v4965_v57 = vpop.eup %4964  ;;  %4664 = vmatprep.subr.bf16.mxu1 %v4663_v62  ;;  %v3016_v0 = vpop.permute.xlu1 %3015  ;;  %v4673_v24 = vpack.c.bf16 %v4861_v3, %v4860_v22 }
0x21ca   :  { %v4967_v58 = vpop.eup %4966  ;;  %v2920_v59 = vmul.f32 %v4965_v57, %v4963_v5  ;;  %v3018_v6 = vpop.permute.xlu0 %3017 }
0x21cb   :  { %v2921_v60 = vmul.f32 %v4967_v58, %v4961_v39 }
0x21cc   :  { %4666 = vmatpush3.bf16.msra.mxu1 %v4663_v62  ;;  %4364 = vmatprep.mubr.msk.f32.mxu1 %vm85_vm0, %v2920_v59 }
0x21cd   :  { %4669 = vmatprep.subr.msk.bf16.mxu1 %vm5227_vm6, %v4667_v61 }
0x21cf   :  { %4365 = vmatmul.mubr.msk.f32.vlgmr.msra.gmra.mrb[26].mxu1 %vm85_vm0, %v2921_v60 }
0x21d0   :  { %4375 = vmatprep.mubr.msk.f32.mxu1 %vm316_vm5, %v3016_v0 }
0x21d5   :  { %4672 = vmatpush3.bf16.xpose.msk.msra.mxu1 %vm5227_vm6, %v4667_v61 }
0x21d6   :  { %4675 = vmatprep.subr.msk.bf16.mxu1 %vm5227_vm6, %v4673_v24 }
0x21dd   :  { %4678 = vmatpush3.bf16.xpose.msk.msra.mxu1 %vm5227_vm6, %v4673_v24 }
0x21e4   :  { %4376 = vmatmul.mubr.msk.f32.vlgmr.msra.gmra.mrb[28].mxu1 %vm316_vm5, %v3018_v6 }
0x22a2   :  { %v5853_v7 = vpop.f32.mrb[26].mxu1 }
0x22a3   :  { %v5855_v8 = vpop.f32.mrb[27].mxu1 }
0x22b7   :  { %v4377_v11 = vpop.f32.mrb[28].mxu1 }
0x22b8   :  { %v5859_v15 = vsel %vm70_vm13, -1e+18, %v4377_v11  ;;  %v3105_v18 = vpop.f32.mrb[29].mxu1 }
0x22b9   :  { %v3114_v20 = vsel %vm69_vm14, -1e+18, %v3105_v18  ;;  %v3121_v2 = vsel %vm85_vm0, %v5859_v15, -inf }
0x22ba   :  { %v3116_v23 = vadd.f32 %v3114_v20, %v5821_v31  ;;  %3122 = vmax.xlane.f32.xlu0 %v3121_v2  ;;  %v3118_v26 = vsel %vm85_vm0, %v3114_v20, -inf  ;;  %v3881_v2 = vld [vmem:[%s6137_s14 + $0x68] sm:$0xff] }
0x22bb   :  { %3119 = vmax.xlane.f32.xlu1 %v3118_v26 }
0x22bc   :  { %v3243_v50 = vmul.f32 0.5, %v3116_v23  ;;  %v3882_v23 = vld [vmem:[%s6137_s14 + $0x70] sm:$0xff] }
0x22be   :  { %3244 = vst.msk [vmem:[#allocation4] sm:$0xff] %vm316_vm5, %v3243_v50  ;;  %v3883_v50 = vld [vmem:[%s6137_s14 + $0x78] sm:$0xff] }
0x2347   :  { %v3123_v28 = vpop.xlane.xlu0 %3122 }
0x2348   :  { %v3125_v42 = vsub.f32 %v5859_v15, %v3123_v28  ;;  %v3120_v29 = vpop.xlane.xlu1 %3119  ;;  %v4699_v28 = vpack.c.bf16 %v3883_v50, %v3882_v23 }
0x2349   :  { %v3124_v45 = vsub.f32 %v3114_v20, %v3120_v29  ;;  %v3880_v20 = vld [vmem:[%s6137_s14 + $0x60] sm:$0xff]  ;;  %v3885_v29 = vld [vmem:[%s6137_s14 + $0x88] sm:$0xff] }
0x234a   :  { %v3128_v27 = vmul.f32 1.442695, %v3125_v42  ;;  %v4695_v26 = vpack.c.bf16 %v3881_v2, %v3880_v20  ;;  %v3884_v42 = vld [vmem:[%s6137_s14 + $0x80] sm:$0xff] }
0x234b   :  { %v3126_v43 = vmul.f32 1.442695, %v3124_v45  ;;  %v4703_v45 = vpack.c.bf16 %v3885_v29, %v3884_v42 }
0x234c   :  { %4968 = vpow2.f32 %v3128_v27  ;;  %4696 = vmatprep.subr.bf16.mxu1 %v4695_v26  ;;  %v3886_v27 = vld [vmem:[%s6137_s14 + $0x90] sm:$0xff] }
0x234d   :  { %4970 = vpow2.f32 %v3126_v43  ;;  %4698 = vmatpush3.bf16.msra.mxu1 %v4695_v26  ;;  %v3887_v43 = vld [vmem:[%s6137_s14 + $0x98] sm:$0xff] }
0x234e   :  { %4700 = vmatprep.subr.bf16.mxu1 %v4699_v28 }
0x2351   :  { %4702 = vmatpush3.bf16.msra.mxu1 %v4699_v28 }
0x2352   :  { %4704 = vmatprep.subr.bf16.mxu1 %v4703_v45 }
0x2355   :  { %4706 = vmatpush3.bf16.msra.mxu1 %v4703_v45 }
0x2356   :  { %v4969_v21 = vpop.eup %4968 }
0x2357   :  { %v4971_v13 = vpop.eup %4970  ;;  %v3133_v31 = vsel %vm85_vm0, %v4969_v21, 0.0 }
0x2358   :  { %3134 = vadd.xlane.f32.xlu1 %v3133_v31  ;;  %v3130_v32 = vsel %vm85_vm0, %v4971_v13, 0.0  ;;  %v3889_v31 = vld [vmem:[%s6137_s14 + $0xa8] sm:$0xff] }
0x2359   :  { %3131 = vadd.xlane.f32.xlu0 %v3130_v32 }
0x2369   :  { %4868 = vrot.lane.b32.xlu1 %v5807_v25, %s5045_s28 }
0x236f   :  { %4863 = vrot.lane.b32.xlu0 %v5801_v19, %s5045_s28 }
0x23e5   :  { %v3135_v12 = vpop.xlane.xlu1 %3134 }
0x23e6   :  { %v3132_v34 = vpop.xlane.xlu0 %3131 }
0x23e7   :  { %4972 = vrcp.f32 %v3132_v34 }
0x23e8   :  { %4974 = vrcp.f32 %v3135_v12 }
0x23e9   :  { %v4869_v35 = vpop.permute.xlu1 %4868 }
0x23ea   :  { %v4864_v36 = vpop.permute.xlu0 %4863  ;;  %v4871_v37 = vunpack.i.h.bf16 %v4869_v35  ;;  %v4870_v38 = vunpack.i.l.bf16 %v4869_v35 }
0x23eb   :  { %v4866_v39 = vunpack.i.h.bf16 %v4864_v36  ;;  %v4865_v5 = vunpack.i.l.bf16 %v4864_v36 }
0x23ec   :  { %v4683_v44 = vpack.c.bf16 %v4871_v37, %v4870_v38 }
0x23ed   :  { %v4679_v41 = vpack.c.bf16 %v4866_v39, %v4865_v5 }
0x23ef   :  { %4680 = vmatprep.subr.bf16.mxu0 %v4679_v41 }
0x23f0   :  { %4682 = vmatpush3.bf16.msra.mxu0 %v4679_v41 }
0x23f1   :  { %v4973_v46 = vpop.eup %4972  ;;  %4684 = vmatprep.subr.bf16.mxu0 %v4683_v44 }
0x23f2   :  { %v4975_v25 = vpop.eup %4974  ;;  %v3138_v4 = vmul.f32 %v4973_v46, %v4971_v13  ;;  %v3888_v13 = vld [vmem:[%s6137_s14 + $0xa0] sm:$0xff] }
0x23f3   :  { %v3139_v19 = vmul.f32 %v4975_v25, %v4969_v21  ;;  %v4707_v21 = vpack.c.bf16 %v3887_v43, %v3886_v27  ;;  %v4711_v32 = vpack.c.bf16 %v3889_v31, %v3888_v13  ;;  %v3895_v27 = vld [vmem:[%s6139_s16 + $0xc0] sm:$0xff]  ;;  %v3896_v43 = vld [vmem:[%s6139_s16 + $0xc8] sm:$0xff]  ;;  %v3898_v31 = vld [vmem:[%s6139_s16 + $0xd8] sm:$0xff] }
0x23f4   :  { %4686 = vmatpush3.bf16.msra.mxu0 %v4683_v44  ;;  %4386 = vmatprep.mubr.msk.f32.mxu0 %vm85_vm0, %v3138_v4  ;;  %v4720_v13 = vpack.c.bf16 %v3896_v43, %v3895_v27  ;;  %v3919_v43 = vld [vmem:[%s6140_s17 + $0x1] ss:$0 sm:$0xff]  ;;  %s5054_s17 = smov [#allocation4]  }
0x23f5   :  { %4688 = vmatprep.subr.bf16.mxu0 %v4687_v40  ;;  %4708 = vmatprep.subr.bf16.mxu1 %v4707_v21 }
0x23f6   :  { %4710 = vmatpush3.bf16.msra.mxu1 %v4707_v21  ;;  %v3897_v21 = vld [vmem:[%s6139_s16 + $0xd0] sm:$0xff] }
0x23f7   :  { %4387 = vmatmul.mubr.msk.f32.vlgmr.msra.gmra.mrb[30].mxu0 %vm85_vm0, %v3139_v19  ;;  %4712 = vmatprep.subr.bf16.mxu1 %v4711_v32 }
0x23f8   :  { %4690 = vmatpush3.bf16.msra.mxu0 %v4687_v40  ;;  %v3890_v40 = vld [vmem:[%s6137_s14 + $0xb0] sm:$0xff] }
0x23f9   :  { %4692 = vmatprep.subr.bf16.mxu0 %v4691_v52 }
0x23fa   :  { %4714 = vmatpush3.bf16.msra.mxu1 %v4711_v32  ;;  %v4723_v32 = vpack.c.bf16 %v3898_v31, %v3897_v21 }
0x23fc   :  { %4694 = vmatpush3.bf16.msra.mxu0 %v4691_v52 }
0x23fd   :  { %4719 = vmatprep.subr.bf16.mxu0 %v5053_v33 }
0x24ca   :  { %v4388_v53 = vpop.f32.mrb[30].mxu0 }
0x24cb   :  { %3237 = vrot.lane.b32.xlu0 %v4388_v53, %s5049_s0  ;;  %v3224_v54 = vpop.f32.mrb[31].mxu0  ;;  %v4715_v53 = vpack.c.bf16 %v3891_v51, %v3890_v40  ;;  %v3911_v51 = vld [vmem:[%s6139_s16 + $0x140] sm:$0xff] }
0x24cc   :  { %3235 = vrot.lane.b32.xlu1 %v3224_v54, %s5049_s0 }
0x24cd   :  { %4716 = vmatprep.subr.bf16.mxu1 %v4715_v53 }
0x24ce   :  { %4718 = vmatpush3.bf16.msra.mxu1 %v4715_v53 }
0x253d   :  { %v3238_v62 = vpop.permute.xlu0 %3237 }
0x253e   :  { %v3236_v55 = vpop.permute.xlu1 %3235  ;;  %v3242_v57 = vsel %vm316_vm5, %v5853_v7, %v3238_v62 }
0x253f   :  { %v3241_v56 = vsel %vm316_vm5, %v5855_v8, %v3236_v55  ;;  %v3879_v55 = vld [vmem:[%s6131_s8 + $0x5] ss:$0 sm:$0xff] }
0x2540   :  { %4397 = vmatprep.mubr.msk.f32.mxu0 %vm85_vm0, %v3241_v56 }
0x2541   :  { %4398 = vmatmul.mubr.msk.f32.vlgmr.msra.gmra.mrb[32].mxu0 %vm85_vm0, %v3242_v57 }
0x2542   :  { %4721 = vmatpush1.bf16.msra.mxu0 %v4720_v13 }
0x2543   :  { %4722 = vmatprep.subr.bf16.mxu0 %v5053_v33 }
0x2546   :  { %4724 = vmatpush1.bf16.msra.mxu0 %v4723_v32 }
0x2547   :  { %4725 = vmatprep.subr.bf16.mxu0 %v5053_v33 }
0x2614   :  { %v4399_v58 = vpop.f32.mrb[32].mxu0 }
0x2615   :  { %v5899_v59 = vadd.f32 %v4399_v58, %v5744_v9  ;;  %v3329_v61 = vpop.f32.mrb[33].mxu0 }
0x2616   :  { %v5902_v60 = vadd.f32 %v3329_v61, %v5747_v14 }
0x2617   :  { %v3345_v63 = vsel %vm85_vm0, %v5899_v59, 0.0 }
0x2618   :  { %3346 = vadd.xlane.f32.xlu0 %v3345_v63  ;;  %v3342_v0 = vsel %vm85_vm0, %v5902_v60, 0.0 }
0x2619   :  { %3343 = vadd.xlane.f32.xlu1 %v3342_v0 }
0x26a5   :  { %v3347_v3 = vpop.xlane.xlu0 %3346 }
0x26a6   :  { %v3349_v22 = vmul.f32 0.03125, %v3347_v3  ;;  %v3344_v24 = vpop.xlane.xlu1 %3343 }
0x26a7   :  { %v3348_v6 = vmul.f32 0.03125, %v3344_v24 }
0x26a8   :  { %v3351_v7 = vsub.f32 %v5899_v59, %v3349_v22 }
0x26a9   :  { %v3350_v9 = vsub.f32 %v5902_v60, %v3348_v6 }
0x26aa   :  { %v3353_v8 = vmul.f32 %v3351_v7, %v3351_v7  ;;  %v3367_v52 = vmul.f32 %v3878_v49, %v3351_v7 }
0x26ab   :  { %v3352_v11 = vmul.f32 %v3350_v9, %v3350_v9  ;;  %v3366_v62 = vmul.f32 %v3878_v49, %v3350_v9  ;;  %v3910_v49 = vld [vmem:[%s6139_s16 + $0x138] sm:$0xff] }
0x26ac   :  { %v3357_v14 = vsel %vm85_vm0, %v3353_v8, 0.0 }
0x26ad   :  { %3358 = vadd.xlane.f32.xlu1 %v3357_v14  ;;  %v3354_v18 = vsel %vm85_vm0, %v3352_v11, 0.0 }
0x26ae   :  { %3355 = vadd.xlane.f32.xlu0 %v3354_v18 }
0x273a   :  { %v3359_v12 = vpop.xlane.xlu1 %3358 }
0x273b   :  { %v3361_v34 = vmul.f32 0.032258064, %v3359_v12  ;;  %v3356_v35 = vpop.xlane.xlu0 %3355  ;;  %v3899_v12 = vld [vmem:[%s6139_s16 + $0xe0] sm:$0xff] }
0x273c   :  { %v3360_v36 = vmul.f32 0.032258064, %v3356_v35 }
0x273d   :  { %4976 = vrsqrt.f32 %v3361_v34  ;;  %vm3377_vm6 = vcmp.eq.f32.partialorder %v3361_v34, inf  ;;  %v3380_v5 = vand.u32 2147483648, %v3361_v34  ;;  %vm3379_vm13 = vcmp.eq.f32.partialorder %v3361_v34, 0.0 }
0x273e   :  { %4978 = vrsqrt.f32 %v3360_v36  ;;  %vm3370_vm14 = vcmp.eq.f32.partialorder %v3360_v36, inf  ;;  %v3373_v46 = vand.u32 2147483648, %v3360_v36  ;;  %vm3372_vm15 = vcmp.eq.f32.partialorder %v3360_v36, 0.0 }
0x2747   :  { %v4977_v37 = vpop.eup %4976 }
0x2748   :  { %v4979_v38 = vpop.eup %4978  ;;  %v3376_v39 = vmul.f32 %v4977_v37, %v3361_v34  ;;  %v3902_v37 = vld [vmem:[%s6139_s16 + $0xf8] sm:$0xff] }
0x2749   :  { %v3369_v41 = vmul.f32 %v4979_v38, %v3360_v36 }
0x274a   :  { %v3378_v44 = vsel %vm3377_vm6, %v3361_v34, %v3376_v39  ;;  %v3900_v34 = vld [vmem:[%s6139_s16 + $0xe8] sm:$0xff]  ;;  %v3903_v39 = vld [vmem:[%s6139_s16 + $0x100] sm:$0xff] }
0x274b   :  { %v3381_v25 = vsel %vm3379_vm13, %v3380_v5, %v3378_v44  ;;  %v3371_v4 = vsel %vm3370_vm14, %v3360_v36, %v3369_v41  ;;  %v4726_v35 = vpack.c.bf16 %v3900_v34, %v3899_v12  ;;  %v3901_v36 = vld [vmem:[%s6139_s16 + $0xf0] sm:$0xff]  ;;  %v3904_v5 = vld [vmem:[%s6139_s16 + $0x108] sm:$0xff] }
0x274c   :  { %v3383_v19 = vadd.f32 1e-06, %v3381_v25  ;;  %v3374_v47 = vsel %vm3372_vm15, %v3373_v46, %v3371_v4  ;;  %v4729_v38 = vpack.c.bf16 %v3902_v37, %v3901_v36  ;;  %v4732_v41 = vpack.c.bf16 %v3904_v5, %v3903_v39  ;;  %v3905_v44 = vld [vmem:[%s6139_s16 + $0x110] sm:$0xff]  ;;  %v3906_v46 = vld [vmem:[%s6139_s16 + $0x118] sm:$0xff]  ;;  %v3907_v4 = vld [vmem:[%s6139_s16 + $0x120] sm:$0xff] }
0x274d   :  { %v3382_v48 = vadd.f32 1e-06, %v3374_v47  ;;  %4727 = vmatpush1.bf16.msra.mxu0 %v4726_v35  ;;  %v4735_v25 = vpack.c.bf16 %v3906_v46, %v3905_v44 }
0x274e   :  { %4980 = vrcp.f32 %v3383_v19  ;;  %4728 = vmatprep.subr.bf16.mxu0 %v5053_v33  ;;  %v3908_v19 = vld [vmem:[%s6139_s16 + $0x128] sm:$0xff] }
0x274f   :  { %4982 = vrcp.f32 %v3382_v48  ;;  %v4738_v47 = vpack.c.bf16 %v3908_v19, %v3907_v4  ;;  %v3909_v48 = vld [vmem:[%s6139_s16 + $0x130] sm:$0xff] }
0x2750   :  { %v4741_v40 = vpack.c.bf16 %v3910_v49, %v3909_v48 }
0x2751   :  { %4730 = vmatpush1.bf16.msra.mxu0 %v4729_v38 }
0x2752   :  { %4731 = vmatprep.subr.bf16.mxu0 %v5053_v33 }
0x2755   :  { %4733 = vmatpush1.bf16.msra.mxu0 %v4732_v41 }
0x2756   :  { %4734 = vmatprep.subr.bf16.mxu0 %v5053_v33 }
0x2758   :  { %v4981_v54 = vpop.eup %4980 }
0x2759   :  { %v4983_v56 = vpop.eup %4982  ;;  %v3387_v57 = vmul.f32 %v4981_v54, %v3367_v52  ;;  %4736 = vmatpush1.bf16.msra.mxu0 %v4735_v25  ;;  %v3912_v52 = vld [vmem:[%s6139_s16 + $0x148] sm:$0xff]  ;;  %v3913_v54 = vld [vmem:[%s6139_s16 + $0x150] sm:$0xff] }
0x275a   :  { %v3385_v58 = vmul.f32 %v4983_v56, %v3366_v62  ;;  %4737 = vmatprep.subr.bf16.mxu0 %v5053_v33  ;;  %v4744_v53 = vpack.c.bf16 %v3912_v52, %v3911_v51  ;;  %v3914_v62 = vld [vmem:[%s6139_s16 + $0x158] sm:$0xff]  ;;  %v3915_v56 = vld [vmem:[%s6139_s16 + $0x160] sm:$0xff] }
0x275b   :  { %v3393_v61 = vadd.f32 %v3879_v55, %v3387_v57  ;;  %v3916_v57 = vld [vmem:[%s6139_s16 + $0x168] sm:$0xff] }
0x275c   :  { %v3392_v63 = vadd.f32 %v3879_v55, %v3385_v58  ;;  %v4747_v55 = vpack.c.bf16 %v3914_v62, %v3913_v54  ;;  %v4750_v58 = vpack.c.bf16 %v3916_v57, %v3915_v56 }
0x275d   :  { %v3419_v0 = vrot.slane %v3393_v61, 7  ;;  %v3411_v3 = vrot.slane %v3393_v61, 6  ;;  %4739 = vmatpush1.bf16.msra.mxu0 %v4738_v47 }
0x275e   :  { %v3418_v22 = vrot.slane %v3392_v63, 7  ;;  %v3410_v24 = vrot.slane %v3392_v63, 6  ;;  %4740 = vmatprep.subr.bf16.mxu0 %v5053_v33 }
0x2760   :  { %v3423_v6 = vsel %vm1665_vm4, 0.0, %v3418_v22  ;;  %v3420_v7 = vsel %vm1665_vm4, %v3418_v22, %v3419_v0  ;;  %v3412_v9 = vsel %vm1646_vm9, %v3410_v24, %v3411_v3  ;;  %v3415_v14 = vsel %vm1646_vm9, 0.0, %v3410_v24  ;;  %v3892_v3 = vld [vmem:[%s6138_s15 + $0x1] ss:$0 sm:$0xff] }
0x2761   :  { %v3424_v8 = vmul.f32 %v3423_v6, %v5514_v1  ;;  %v3425_v11 = vmul.f32 %v3420_v7, %v5519_v10  ;;  %v3416_v2 = vmul.f32 %v3415_v14, %v5526_v16  ;;  %v3417_v23 = vmul.f32 %v3412_v9, %v5528_v17  ;;  %4742 = vmatpush1.bf16.msra.mxu0 %v4741_v40 }
0x2762   :  { %4743 = vmatprep.subr.bf16.mxu0 %v5053_v33 }
0x2763   :  { %3428 = vrot.lane.b32.xlu0 %v3424_v8, %s5052_s5  ;;  %3430 = vrot.lane.b32.xlu1 %v3425_v11, %s5052_s5 }
0x2765   :  { %4745 = vmatpush1.bf16.msra.mxu0 %v4744_v53 }
0x2766   :  { %4746 = vmatprep.subr.bf16.mxu0 %v5053_v33 }
0x2767   :  { %3436 = vrot.lane.b32.xlu0 %v3393_v61, %s5047_s21  ;;  %3434 = vrot.lane.b32.xlu1 %v3392_v63, %s5047_s21  ;;  %v3917_v61 = vld [vmem:[%s6139_s16 + $0x170] sm:$0xff]  ;;  %v3918_v63 = vld [vmem:[%s6139_s16 + $0x178] sm:$0xff] }
0x2768   :  { %v4753_v0 = vpack.c.bf16 %v3918_v63, %v3917_v61 }
0x2769   :  { %4748 = vmatpush1.bf16.msra.mxu0 %v4747_v55 }
0x276a   :  { %4749 = vmatprep.subr.bf16.mxu0 %v5053_v33 }
0x276d   :  { %4751 = vmatpush1.bf16.msra.mxu0 %v4750_v58 }
0x276e   :  { %4752 = vmatprep.subr.bf16.mxu0 %v5053_v33 }
0x2771   :  { %4754 = vmatpush1.bf16.msra.mxu0 %v4753_v0 }
0x27d5   :  { %v3429_v18 = vpop.permute.xlu0 %3428  ;;  %v3431_v20 = vpop.permute.xlu1 %3430 }
0x27d6   :  { %v3440_v26 = vsel %vm85_vm0, %v3416_v2, %v3429_v18  ;;  %v3441_v50 = vsel %vm85_vm0, %v3417_v23, %v3431_v20 }
0x27d9   :  { %v3437_v28 = vpop.permute.xlu0 %3436  ;;  %v3435_v42 = vpop.permute.xlu1 %3434 }
0x27da   :  { %v3443_v29 = vsel %vm1698_vm10, %v3441_v50, %v3437_v28  ;;  %v3442_v45 = vsel %vm1698_vm10, %v3440_v26, %v3435_v42 }
0x27db   :  { %4424 = vmatprep.mubr.msk.f32.mxu1 %vm1705_vm11, %v3442_v45 }
0x27dc   :  { %4425 = vmatmul.mubr.msk.f32.vlgmr.msra.gmra.mrb[30].mxu1 %vm1705_vm11, %v3443_v29 }
0x28af   :  { %v4426_v22 = vpop.f32.mrb[30].mxu1 }
0x28b0   :  { %v3526_v24 = vadd.f32 %v4426_v22, %v3892_v3  ;;  %v3520_v6 = vpop.f32.mrb[31].mxu1 }
0x28b1   :  { %v3521_v7 = vadd.f32 %v3892_v3, %v3520_v6 }
0x28b2   :  { %v3530_v9 = vmax.f32 %v3526_v24, 0.0 }
0x28b3   :  { %v3529_v8 = vmax.f32 %v3521_v7, 0.0 }
0x28b4   :  { %v3568_v11 = vrot.slane %v3530_v9, 7  ;;  %v3560_v26 = vrot.slane %v3530_v9, 6 }
0x28b5   :  { %v3567_v14 = vrot.slane %v3529_v8, 7  ;;  %3920 = vmatprep.mubr.msk.f32.mxu0 %vm1698_vm10, %v3529_v8  ;;  %v3559_v23 = vrot.slane %v3529_v8, 6 }
0x28b7   :  { %v3572_v18 = vsel %vm1665_vm4, 0.0, %v3567_v14  ;;  %v3569_v20 = vsel %vm1665_vm4, %v3567_v14, %v3568_v11  ;;  %v3564_v50 = vsel %vm1646_vm9, 0.0, %v3559_v23  ;;  %v3561_v29 = vsel %vm1646_vm9, %v3559_v23, %v3560_v26 }
0x28b8   :  { %v3573_v33 = vmul.f32 %v3572_v18, %v5514_v1  ;;  %v3574_v2 = vmul.f32 %v3569_v20, %v5519_v10  ;;  %v3565_v28 = vmul.f32 %v3564_v50, %v5526_v16  ;;  %v3566_v1 = vmul.f32 %v3561_v29, %v5528_v17 }
0x28ba   :  { %3577 = vrot.lane.b32.xlu1 %v3573_v33, %s5047_s21  ;;  %3579 = vrot.lane.b32.xlu0 %v3574_v2, %s5047_s21  ;;  %s3745_s21 = sshll.u32 %s5054_s17, 4  ;;  %s3746_s21 = int_to_ptr.vmem [resolvable:$true] %s3745_s21 }
0x28bb   :  { %s4996_s27 = scalar_lea.vmem %s3746_s21, 256  ;;  %p5001_p1 = scmp.lt.s32.totalorder %s3746_s21, %s3746_s21 }
0x28bc   :  { %p4997_p0 = scmp.ne.s32.totalorder %s3746_s21, %s4996_s27  ;;  %p5002_p2 = scmp.lt.s32.totalorder %s4996_s27, %s4996_s27 }
0x28be   :  { %p5003_p3 = por %p5002_p2, %p5001_p1 }
0x28c0   :  { %p5004_p4 = pnand %p5003_p3, %p4997_p0 }
0x292c   :  { %v3578_v42 = vpop.permute.xlu1 %3577  ;;  %v3580_v27 = vpop.permute.xlu0 %3579 }
0x292d   :  { %v3583_v45 = vsel %vm1698_vm10, %v3565_v28, %v3578_v42  ;;  %v3584_v10 = vsel %vm1698_vm10, %v3566_v1, %v3580_v27 }
0x292e   :  { %3658 = vmatmul.mubr.f32.vlgmr.msra.gmra.mrb[34].mxu0 %v3583_v45 }
0x292f   :  { %3921 = vmatprep.mubr.msk.f32.mxu0 %vm1698_vm10, %v3530_v9 }
0x2932   :  { %3663 = vmatmul.mubr.f32.gmra.mrb[36].mxu0 %v3584_v10 }
0x2a01   :  { %v3659_v21 = vpop.f32.mrb[34].mxu0 }
0x2a02   :  { %v3660_v16 = vadd.f32 %v3919_v43, %v3659_v21  ;;  %v3661_v13 = vpop.f32.mrb[35].mxu0 }
0x2a04   :  { %v3668_v31 = vmax.f32 %v3660_v16, 0.0 }
0x2a05   :  { %v3664_v32 = vpop.f32.mrb[36].mxu0 }
0x2a06   :  { %v3670_v12 = vadd.f32 %v3668_v31, %v5902_v60  ;;  %v3665_v34 = vadd.f32 %v3919_v43, %v3664_v32  ;;  %v3666_v35 = vpop.f32.mrb[37].mxu0 }
0x2a08   :  { %v3669_v36 = vmax.f32 %v3665_v34, 0.0  ;;  %v3674_v37 = vsel %vm85_vm0, %v3670_v12, 0.0 }
0x2a09   :  { %3675 = vadd.xlane.f32.xlu1 %v3674_v37 }
0x2a0a   :  { %v3671_v17 = vadd.f32 %v3669_v36, %v5899_v59  ;;  %v3117_v59 = vadd.f32 %v5859_v15, %v5817_v30 }
0x2a0c   :  { %v3677_v38 = vsel %vm85_vm0, %v3671_v17, 0.0  ;;  %v3245_v48 = vmul.f32 0.5, %v3117_v59 }
0x2a0d   :  { %3678 = vadd.xlane.f32.xlu0 %v3677_v38 }
0x2a96   :  { %v3676_v39 = vpop.xlane.xlu1 %3675 }
0x2a97   :  { %v3680_v5 = vmul.f32 0.03125, %v3676_v39 }
0x2a99   :  { %v3682_v41 = vsub.f32 %v3670_v12, %v3680_v5 }
0x2a9a   :  { %v3679_v44 = vpop.xlane.xlu0 %3678 }
0x2a9b   :  { %v3681_v46 = vmul.f32 0.03125, %v3679_v44  ;;  %v3684_v25 = vmul.f32 %v3682_v41, %v3682_v41 }
0x2a9d   :  { %v3683_v4 = vsub.f32 %v3671_v17, %v3681_v46  ;;  %v3686_v60 = vsel %vm85_vm0, %v3684_v25, 0.0 }
0x2a9e   :  { %3687 = vadd.xlane.f32.xlu0 %v3686_v60 }
0x2a9f   :  { %v3685_v19 = vmul.f32 %v3683_v4, %v3683_v4 }
0x2aa1   :  { %v3689_v47 = vsel %vm85_vm0, %v3685_v19, 0.0 }
0x2aa2   :  { %3690 = vadd.xlane.f32.xlu1 %v3689_v47 }
0x2ab4   :  { %3247 = vrot.lane.b32.xlu0 %v3245_v48, %s5046_s6 }
0x2b2b   :  { %v3688_v49 = vpop.xlane.xlu0 %3687 }
0x2b2c   :  { %v3692_v40 = vmul.f32 0.032258064, %v3688_v49 }
0x2b2e   :  { %4984 = vrsqrt.f32 %v3692_v40 }
0x2b2f   :  { %v3691_v51 = vpop.xlane.xlu1 %3690  ;;  %v3248_v52 = vpop.permute.xlu0 %3247 }
0x2b30   :  { %v3693_v53 = vmul.f32 0.032258064, %v3691_v51  ;;  %3251 = vst.msk [vmem:[#allocation4 + $0x8] sm:$0xff] %vm316_vm5, %v3248_v52 }
0x2b31   :  { %5007 = shalt.err (!%p5004_p4)
}
0x2b32   :  { %s5008_s26 = scalar_lea.hbm %s6142_s19, 256 }
0x2b33   :  { %p5009_p5 = scmp.ne.s32.totalorder %s6142_s19, %s5008_s26  ;;  %p5012_p6 = scmp.lt.u32.totalorder %s5008_s26, %s6142_s19 }
0x2b35   :  { %p5014_p7 = pnand %p5012_p6, %p5009_p5 }
0x2b37   :  { %5017 = shalt.err (!%p5014_p7)
}
0x2b38   :  { %s5055_s22 = smov 128   ;;  %s5056_s13 = smov 8   ;;  %4986 = vrsqrt.f32 %v3693_v53  ;;  %v4985_v30 = vpop.eup %4984  ;;  %vm3702_vm5 = vcmp.eq.f32.partialorder %v3692_v40, inf  ;;  %v3705_v54 = vand.u32 2147483648, %v3692_v40  ;;  %vm3704_vm4 = vcmp.eq.f32.partialorder %v3692_v40, 0.0 }
0x2b39   :  { %3751 = dma.vmem_to_hbm [thread:$0]  %s3746_s21, 256, %s6142_s19, [#allocation5], %s5055_s22, %s5055_s22, %s5056_s13   ;;  %v3701_v15 = vmul.f32 %v4985_v30, %v3692_v40  ;;  %vm3709_vm9 = vcmp.eq.f32.partialorder %v3693_v53, inf  ;;  %v3712_v61 = vand.u32 2147483648, %v3693_v53  ;;  %vm3711_vm10 = vcmp.eq.f32.partialorder %v3693_v53, 0.0 }
0x2b3a   :  { %v3922_v22 = vld [vmem:[%s6130_s7 + $0x6] ss:$0 sm:$0xff]  ;;  %s5057_s23 = smov [#allocation2]  }
0x2b3b   :  { %v3703_v62 = vsel %vm3702_vm5, %v3692_v40, %v3701_v15  ;;  %v3698_v24 = vmul.f32 %v3922_v22, %v3682_v41  ;;  %v3923_v7 = vld [vmem:[%s6131_s8 + $0x6] ss:$0 sm:$0xff]  ;;  %v3699_v8 = vmul.f32 %v3922_v22, %v3683_v4  ;;  %s3733_s24 = sshll.u32 %s5057_s23, 4  ;;  %s3734_s24 = int_to_ptr.vmem [resolvable:$true] %s3733_s24 }
0x2b3c   :  { %v3706_v56 = vsel %vm3704_vm4, %v3705_v54, %v3703_v62  ;;  %s5018_s7 = scalar_lea.vmem %s3734_s24, 256  ;;  %p5023_p9 = scmp.lt.s32.totalorder %s3734_s24, %s3734_s24 }
0x2b3d   :  { %v3714_v57 = vadd.f32 1e-06, %v3706_v56  ;;  %p5019_p8 = scmp.ne.s32.totalorder %s3734_s24, %s5018_s7  ;;  %p5024_p10 = scmp.lt.s32.totalorder %s5018_s7, %s5018_s7 }
0x2b3f   :  { %4988 = vrcp.f32 %v3714_v57  ;;  %p5025_p11 = por %p5024_p10, %p5023_p9 }
0x2b41   :  { %p5026_p12 = pnand %p5025_p11, %p5019_p8 }
0x2b42   :  { %v4987_v55 = vpop.eup %4986 }
0x2b43   :  { %v3708_v58 = vmul.f32 %v4987_v55, %v3693_v53 }
0x2b45   :  { %v3710_v63 = vsel %vm3709_vm9, %v3693_v53, %v3708_v58 }
0x2b46   :  { %v3713_v0 = vsel %vm3711_vm10, %v3712_v61, %v3710_v63 }
0x2b47   :  { %v3715_v3 = vadd.f32 1e-06, %v3713_v0 }
0x2b49   :  { %4990 = vrcp.f32 %v3715_v3  ;;  %v4989_v6 = vpop.eup %4988 }
0x2b4a   :  { %v3717_v9 = vmul.f32 %v4989_v6, %v3698_v24 }
0x2b4c   :  { %v3724_v11 = vadd.f32 %v3923_v7, %v3717_v9 }
0x2b4e   :  { %3726 = vst.msk [vmem:[#allocation2] sm:$0xff] %vm85_vm0, %v3724_v11 }
0x2b53   :  { %v4991_v14 = vpop.eup %4990 }
0x2b54   :  { %v3719_v18 = vmul.f32 %v4991_v14, %v3699_v8 }
0x2b56   :  { %v3725_v20 = vadd.f32 %v3923_v7, %v3719_v18 }
0x2b58   :  { %3727 = vst.msk [vmem:[#allocation2 + $0x8] sm:$0xff] %vm85_vm0, %v3725_v20 }
0x2b59   :  { %5029 = shalt.err (!%p5026_p12)
}
0x2b5a   :  { %s5030_s5 = scalar_lea.hbm %s6141_s18, 256 }
0x2b5b   :  { %p5031_p13 = scmp.ne.s32.totalorder %s6141_s18, %s5030_s5  ;;  %p5034_p0 = scmp.lt.u32.totalorder %s5030_s5, %s6141_s18 }
0x2b5d   :  { %p5036_p1 = pnand %p5034_p0, %p5031_p13 }
0x2b5f   :  { %5039 = shalt.err (!%p5036_p1)
}
0x2b60   :  { %3739 = dma.vmem_to_hbm [thread:$0]  %s3734_s24, 256, %s6141_s18, [#allocation3], %s5055_s22, %s5055_s22, %s5056_s13  }
0x2b61   :  { %5040 = dma.done.wait [#allocation3], 256  }
0x2b62   :  { %5041 = vsyncadd [#allocation3], 4294967040 }
0x2b63   :  { %5042 = dma.done.wait [#allocation5], 256  }
0x2b64   :  { %5043 = vsyncadd [#allocation5], 4294967040 }
0x2b65   :  { %3758 = vsyncpa [#allocation3], 1 }
0x2b66   :  { %3759 = vsyncpa [#allocation5], 1 }

</bundles_post_ra>
